<compile_context>
chip_gen: v7x
topology: tpu7x:2x2x1
jax: 0.10.0
libtpu: 0.0.40
codegen_flags: <defaults>
</compile_context>

<pallas_src>
import functools

import jax
import jax.numpy as jnp
from jax.experimental import pallas as pl
from jax.experimental.pallas import tpu as pltpu


# ----------------------------------------------------------------------------
# Pallas kernel: entire NeRF MLP for one tile of packed rows.
#   x_ref        (TR, pack*6)        merged [pts, views] per packed point, f32
#   w_in_ref     (2, pack*6, pack*W) bf16  [layer-0 weight, skip-layer pts part]
#   w_sq_ref     (D, pack*W, pack*W) bf16  layers 1..D-1 then feature_linear
#   b_w_ref      (D+1, pack*W)       f32   biases b0..b_{D-1}, feature bias
#   wv_view_ref  (pack*6, pack*W//2) bf16  views part of views_linears[0]
#   wv_feat_ref  (pack*W, pack*W//2) bf16  feature part of views_linears[0]
#   bv_ref       (1, pack*W//2)      f32
#   w_head_a_ref (pack*W, pack*4)    bf16  alpha head (col 4p)
#   w_head_r_ref (pack*W//2, pack*4) bf16  rgb head   (cols 4p+1..4p+3)
#   b_out_ref    (1, pack*4)         f32
#   out_ref      (TR, pack*4)        f32   per point: [alpha, rgb0, rgb1, rgb2]
# ----------------------------------------------------------------------------
def nerf_kernel(x_ref,
                w_in_ref, w_sq_ref, b_w_ref,
                wv_view_ref, wv_feat_ref, bv_ref,
                w_head_a_ref, w_head_r_ref, b_out_ref,
                out_ref, *, D, skip_layer):
    bf16 = jnp.bfloat16
    x = x_ref[...].astype(bf16)                      # (TR, pack*6)

    def mm(a, w):
        # bf16 x bf16 -> f32 accumulate on the MXU
        return jnp.dot(a, w, preferred_element_type=jnp.float32)

    def bias(i):
        return b_w_ref[i:i + 1, :]                   # (1, pack*W) f32

    relu = lambda t: jnp.maximum(t, 0.0)

    # ---- pts_linears -----------------------------------------------------
    # layer 0: Linear(3, W), lane-packed
    h = relu(mm(x, w_in_ref[0]) + bias(0))
    # layers 1 .. D-1 (skip layer adds the pts contribution instead of a concat)
    for i in range(1, D):
        acc = mm(h.astype(bf16), w_sq_ref[i - 1]) + bias(i)
        if i == skip_layer:
            acc = acc + mm(x, w_in_ref[1])           # == cat([pts, h]) @ w_skip
        h = relu(acc)

    # ---- heads (use_viewdirs=True) ----------------------------------------
    h_bf = h.astype(bf16)
    feature = mm(h_bf, w_sq_ref[D - 1]) + bias(D)    # (TR, pack*W), no relu
    alpha = mm(h_bf, w_head_a_ref[...])              # (TR, pack*4): cols 4p

    # views_linears[0]: relu(cat([feature, views]) @ wv + bv) without the concat
    hv = relu(mm(feature.astype(bf16), wv_feat_ref[...])
              + mm(x, wv_view_ref[...]) + bv_ref[...])   # (TR, pack*W//2)
    rgb = mm(hv.astype(bf16), w_head_r_ref[...])     # (TR, pack*4): cols 4p+1..3

    out_ref[...] = (alpha + rgb + b_out_ref[...]).astype(out_ref.dtype)


# ----------------------------------------------------------------------------
# Host-side packing: PyTorch-style flat param list -> lane-packed kernel layout.
#   params = [w0,b0, ..., w7,b7, wf,bf, wa,ba, wv,bv, wr,br]
#   weights stored (in, out), biases (1, out), all f32.
# ----------------------------------------------------------------------------
def pack_params(params, *, D=8, W=64, input_ch=3, input_ch_view=3,
                skips=(4,), pack=2):
    bf16 = jnp.bfloat16
    assert len(skips) == 1, "packing assumes exactly one skip connection"
    skip_layer = skips[0] + 1                       # layer fed by cat([pts, h])
    assert 1 <= skip_layer <= D - 1, "skip must be strictly inside the MLP"

    pts_w = [params[2 * i] for i in range(D)]
    pts_b = [params[2 * i + 1] for i in range(D)]
    wf, bf_, wa, ba, wv, bv, wr, br = params[2 * D:]

    w_skip = pts_w[skip_layer]                      # (input_ch + W, W)
    w_skip_pts = w_skip[:input_ch]                  # (3, W)
    w_skip_h = w_skip[input_ch:]                    # (W, W)

    cin = input_ch + input_ch_view                  # merged features per point
    H = W // 2

    def block_diag(w, reps):
        k, m = w.shape
        out = jnp.zeros((reps * k, reps * m), jnp.float32)
        for p in range(reps):
            out = out.at[p * k:(p + 1) * k, p * m:(p + 1) * m].set(w)
        return out

    def scatter_in(w_pts, w_views, out_cols):
        # merged per-point features [pts(3), views(3)] -> packed output columns
        out = jnp.zeros((pack * cin, pack * out_cols), jnp.float32)
        for p in range(pack):
            r, c = p * cin, p * out_cols
            if w_pts is not None:
                out = out.at[r:r + input_ch, c:c + out_cols].set(w_pts)
            if w_views is not None:
                out = out.at[r + input_ch:r + cin, c:c + out_cols].set(w_views)
        return out

    # square slab: layers 1..D-1 (skip layer -> its h-part) then feature_linear
    sq = []
    for i in range(1, D):
        sq.append(w_skip_h if i == skip_layer else pts_w[i])
    sq.append(wf)
    w_sq = jnp.stack([block_diag(w, pack) for w in sq], 0).astype(bf16)

    # input-weight slab: layer-0 weight and the pts part of the skip layer
    w_in = jnp.stack([scatter_in(pts_w[0], None, W),
                      scatter_in(w_skip_pts, None, W)], 0).astype(bf16)

    # width-W biases tiled across packed points: b0..b_{D-1}, feature bias
    b_w = jnp.tile(jnp.concatenate(pts_b + [bf_], axis=0), (1, pack))

    # view layer split (cat([feature, views]) order => rows [0:W] feature)
    wv_feat = block_diag(wv[:W], pack).astype(bf16)           # (pack*W, pack*H)
    wv_view = scatter_in(None, wv[W:], H).astype(bf16)        # (pack*6, pack*H)
    bv_t = jnp.tile(bv, (1, pack))                            # (1, pack*H)

    # packed output heads: per point cols [alpha, rgb0, rgb1, rgb2]
    w_head_a = jnp.zeros((pack * W, pack * 4), jnp.float32)
    w_head_r = jnp.zeros((pack * H, pack * 4), jnp.float32)
    for p in range(pack):
        w_head_a = w_head_a.at[p * W:(p + 1) * W, p * 4:p * 4 + 1].set(wa)
        w_head_r = w_head_r.at[p * H:(p + 1) * H, p * 4 + 1:p * 4 + 4].set(wr)
    w_head_a = w_head_a.astype(bf16)
    w_head_r = w_head_r.astype(bf16)
    b_out = jnp.tile(jnp.concatenate([ba, br], axis=1), (1, pack))    # (1, pack*4)

    return (w_in, w_sq, b_w, wv_view, wv_feat, bv_t, w_head_a, w_head_r, b_out)


# ----------------------------------------------------------------------------
# Wrapper: merge pts+views, lane-pack `pack` points per row, run the kernel,
# unpack alpha / rgb.
# ----------------------------------------------------------------------------
def nerf_forward(input_pts, input_views, packed, *, tile_n=2048, pack=2,
                 D=8, skips=(4,)):
    N, d_pts = input_pts.shape
    cin = d_pts + input_views.shape[1]

    # tile_n points per grid step; keep tile_rows a multiple of 8 sublanes.
    tile_n = max(8 * pack, (tile_n // (8 * pack)) * (8 * pack))
    n_tiles = pl.cdiv(N, tile_n)
    n_pad = n_tiles * tile_n
    tile_rows = tile_n // pack

    x = jnp.concatenate([input_pts, input_views], axis=1)     # (N, 6)
    if n_pad != N:
        x = jnp.pad(x, ((0, n_pad - N), (0, 0)))
    x = x.reshape(n_pad // pack, pack * cin)                  # (rows, pack*6)

    in_specs = ([pl.BlockSpec((tile_rows, pack * cin), lambda i: (i, 0))]
                + [pl.BlockSpec(a.shape, lambda i, _nd=a.ndim: (0,) * _nd)
                   for a in packed])

    out = pl.pallas_call(
        functools.partial(nerf_kernel, D=D, skip_layer=skips[0] + 1),
        grid=(n_tiles,),
        in_specs=in_specs,
        out_specs=pl.BlockSpec((tile_rows, pack * 4), lambda i: (i, 0)),
        out_shape=jax.ShapeDtypeStruct((n_pad // pack, pack * 4), jnp.float32),
        compiler_params=pltpu.CompilerParams(
            dimension_semantics=("parallel",)),
    )(x, *packed)

    out = out.reshape(n_pad, 4)[:N]                           # unpack points
    return out[:, 0:1], out[:, 1:4]                           # alpha, rgb


# ----------------------------------------------------------------------------
# Deterministic parameter init (PyTorch nn.Linear-style uniform bounds),
# weights stored transposed as (in, out), f32.
# ----------------------------------------------------------------------------
def init_params(key, *, D=8, W=64, input_ch=3, input_ch_view=3, skips=(4,)):
    def linear(key, fan_in, fan_out):
        kw, kb = jax.random.split(key)
        bound = 1.0 / jnp.sqrt(jnp.float32(fan_in))
        w = jax.random.uniform(kw, (fan_in, fan_out), jnp.float32, -bound, bound)
        b = jax.random.uniform(kb, (1, fan_out), jnp.float32, -bound, bound)
        return w, b

    keys = jax.random.split(key, D + 4)
    params = []
    fan_ins = [input_ch] + [W + input_ch if (i in skips) else W
                            for i in range(D - 1)]
    for li in range(D):
        w, b = linear(keys[li], fan_ins[li], W)
        params += [w, b]
    wf, bf = linear(keys[D + 0], W, W)                       # feature_linear
    wa, ba = linear(keys[D + 1], W, 1)                       # alpha_linear
    wv, bv = linear(keys[D + 2], input_ch_view + W, W // 2)  # views_linears[0]
    wr, br = linear(keys[D + 3], W // 2, 3)                  # rgb_linear
    params += [wf, bf, wa, ba, wv, bv, wr, br]
    return params


# ----------------------------------------------------------------------------
# Pure-JAX reference of the same forward (bf16 matmul inputs, f32 accumulate —
# matches the kernel's numerics) for correctness checking.
# ----------------------------------------------------------------------------
def nerf_reference(input_pts, input_views, params, *, D=8, skips=(4,)):
    bf16 = jnp.bfloat16

    def lin(h, w, b):
        return jnp.dot(h.astype(bf16), w.astype(bf16),
                       preferred_element_type=jnp.float32) + b

    pts_params = params[:2 * D]
    wf, bf_, wa, ba, wv, bv, wr, br = params[2 * D:]
    h = input_pts
    for i in range(D):
        w, b = pts_params[2 * i], pts_params[2 * i + 1]
        h = jax.nn.relu(lin(h, w, b))
        if i in skips:
            h = jnp.concatenate([input_pts, h], axis=-1)
    alpha = lin(h, wa, ba)
    feature = lin(h, wf, bf_)
    hv = jnp.concatenate([feature, input_views], axis=-1)
    hv = jax.nn.relu(lin(hv, wv, bv))
    rgb = lin(hv, wr, br)
    return alpha, rgb


if __name__ == "__main__":
    # Small-but-representative shapes: N=2500 points (multiple grid steps plus
    # a padded last tile), hidden W=64, D=8 layers, 2-point lane packing.
    # TODO(synk): multires>0 positional embedding and use_viewdirs=False branch
    # (which asserts in the original forward) are not implemented.
    N, D, W, PACK = 2500, 8, 64, 2
    key = jax.random.PRNGKey(0)
    k_pts, k_views, k_params = jax.random.split(key, 3)

    input_pts = jax.random.normal(k_pts, (N, 3), jnp.float32)
    input_views = jax.random.normal(k_views, (N, 3), jnp.float32)
    params = init_params(k_params, D=D, W=W)
    packed = pack_params(params, D=D, W=W, pack=PACK)

    alpha, rgb = jax.block_until_ready(
        nerf_forward(input_pts, input_views, packed,
                     tile_n=1024, pack=PACK, D=D))

    ref_alpha, ref_rgb = nerf_reference(input_pts, input_views, params, D=D)

    assert alpha.shape == (N, 1) and rgb.shape == (N, 3)
    assert jnp.allclose(alpha, ref_alpha, rtol=5e-3, atol=5e-3)
    assert jnp.allclose(rgb, ref_rgb, rtol=5e-3, atol=5e-3)

    print("KERNEL_OK")
</pallas_src>

<mosaic_0001>
module attributes {stable_mosaic.version = 11 : i64} {
  func.func @nerf_kernel(%arg0: i32, %arg1: memref<512x12xf32, #tpu.memory_space<vmem>>, %arg2: memref<2x12x128xbf16, #tpu.memory_space<vmem>>, %arg3: memref<8x128x128xbf16, #tpu.memory_space<vmem>>, %arg4: memref<9x128xf32, #tpu.memory_space<vmem>>, %arg5: memref<12x64xbf16, #tpu.memory_space<vmem>>, %arg6: memref<128x64xbf16, #tpu.memory_space<vmem>>, %arg7: memref<1x64xf32, #tpu.memory_space<vmem>>, %arg8: memref<128x8xbf16, #tpu.memory_space<vmem>>, %arg9: memref<64x8xbf16, #tpu.memory_space<vmem>>, %arg10: memref<1x8xf32, #tpu.memory_space<vmem>>, %arg11: memref<512x8xf32, #tpu.memory_space<vmem>>) attributes {dimension_semantics = [#tpu.dimension_semantics<parallel>], iteration_bounds = array<i64: 3>, scalar_prefetch = 0 : i64, scratch_operands = 0 : i64, tpu.core_type = #tpu.core_type<tc>, window_params = [{transform_indices = @transform_0, window_bounds = array<i64: 512, 12>}, {pipeline_mode = #tpu.pipeline_mode<synchronous>, transform_indices = @transform_1, window_bounds = array<i64: 2, 12, 128>}, {pipeline_mode = #tpu.pipeline_mode<synchronous>, transform_indices = @transform_2, window_bounds = array<i64: 8, 128, 128>}, {pipeline_mode = #tpu.pipeline_mode<synchronous>, transform_indices = @transform_3, window_bounds = array<i64: 9, 128>}, {pipeline_mode = #tpu.pipeline_mode<synchronous>, transform_indices = @transform_4, window_bounds = array<i64: 12, 64>}, {pipeline_mode = #tpu.pipeline_mode<synchronous>, transform_indices = @transform_5, window_bounds = array<i64: 128, 64>}, {pipeline_mode = #tpu.pipeline_mode<synchronous>, transform_indices = @transform_6, window_bounds = array<i64: 1, 64>}, {pipeline_mode = #tpu.pipeline_mode<synchronous>, transform_indices = @transform_7, window_bounds = array<i64: 128, 8>}, {pipeline_mode = #tpu.pipeline_mode<synchronous>, transform_indices = @transform_8, window_bounds = array<i64: 64, 8>}, {pipeline_mode = #tpu.pipeline_mode<synchronous>, transform_indices = @transform_9, window_bounds = array<i64: 1, 8>}, {transform_indices = @transform_10, window_bounds = array<i64: 512, 8>}]} {
    %c0 = arith.constant 0 : index
    %c0_0 = arith.constant 0 : index
    %0 = vector.load %arg1[%c0, %c0_0] : memref<512x12xf32, #tpu.memory_space<vmem>>, vector<512x12xf32>
    %1 = arith.truncf %0 : vector<512x12xf32> to vector<512x12xbf16>
    %c0_1 = arith.constant 0 : index
    %c0_2 = arith.constant 0 : index
    %c0_3 = arith.constant 0 : index
    %2 = vector.load %arg2[%c0_1, %c0_2, %c0_3] : memref<2x12x128xbf16, #tpu.memory_space<vmem>>, vector<1x12x128xbf16>
    %3 = vector.shape_cast %2 : vector<1x12x128xbf16> to vector<12x128xbf16>
    %cst = arith.constant dense<0.000000e+00> : vector<512x128xf32>
    %4 = tpu.matmul %1, %3, %cst {dimension_numbers = #tpu.dot_dimension_numbers<[1], [0], [0], [1], [0, 0, 1, 1], [], []>} : vector<512x12xbf16>, vector<12x128xbf16>, vector<512x128xf32> -> vector<512x128xf32>
    %c0_4 = arith.constant 0 : index
    %c0_5 = arith.constant 0 : index
    %5 = vector.load %arg4[%c0_4, %c0_5] : memref<9x128xf32, #tpu.memory_space<vmem>>, vector<1x128xf32>
    %6 = vector.broadcast %5 : vector<1x128xf32> to vector<512x128xf32>
    %7 = arith.addf %4, %6 : vector<512x128xf32>
    %cst_6 = arith.constant 0.000000e+00 : f32
    %8 = vector.broadcast %cst_6 : f32 to vector<512x128xf32>
    %9 = arith.maximumf %7, %8 : vector<512x128xf32>
    %10 = arith.truncf %9 : vector<512x128xf32> to vector<512x128xbf16>
    %c0_7 = arith.constant 0 : index
    %c0_8 = arith.constant 0 : index
    %c0_9 = arith.constant 0 : index
    %11 = vector.load %arg3[%c0_7, %c0_8, %c0_9] : memref<8x128x128xbf16, #tpu.memory_space<vmem>>, vector<1x128x128xbf16>
    %12 = vector.shape_cast %11 : vector<1x128x128xbf16> to vector<128x128xbf16>
    %cst_10 = arith.constant dense<0.000000e+00> : vector<512x128xf32>
    %13 = tpu.matmul %10, %12, %cst_10 {dimension_numbers = #tpu.dot_dimension_numbers<[1], [0], [0], [1], [0, 0, 1, 1], [], []>} : vector<512x128xbf16>, vector<128x128xbf16>, vector<512x128xf32> -> vector<512x128xf32>
    %c1 = arith.constant 1 : index
    %c0_11 = arith.constant 0 : index
    %14 = vector.load %arg4[%c1, %c0_11] : memref<9x128xf32, #tpu.memory_space<vmem>>, vector<1x128xf32>
    %15 = vector.broadcast %14 : vector<1x128xf32> to vector<512x128xf32>
    %16 = arith.addf %13, %15 : vector<512x128xf32>
    %cst_12 = arith.constant 0.000000e+00 : f32
    %17 = vector.broadcast %cst_12 : f32 to vector<512x128xf32>
    %18 = arith.maximumf %16, %17 : vector<512x128xf32>
    %19 = arith.truncf %18 : vector<512x128xf32> to vector<512x128xbf16>
    %c1_13 = arith.constant 1 : index
    %c0_14 = arith.constant 0 : index
    %c0_15 = arith.constant 0 : index
    %20 = vector.load %arg3[%c1_13, %c0_14, %c0_15] : memref<8x128x128xbf16, #tpu.memory_space<vmem>>, vector<1x128x128xbf16>
    %21 = vector.shape_cast %20 : vector<1x128x128xbf16> to vector<128x128xbf16>
    %cst_16 = arith.constant dense<0.000000e+00> : vector<512x128xf32>
    %22 = tpu.matmul %19, %21, %cst_16 {dimension_numbers = #tpu.dot_dimension_numbers<[1], [0], [0], [1], [0, 0, 1, 1], [], []>} : vector<512x128xbf16>, vector<128x128xbf16>, vector<512x128xf32> -> vector<512x128xf32>
    %c2 = arith.constant 2 : index
    %c0_17 = arith.constant 0 : index
    %23 = vector.load %arg4[%c2, %c0_17] : memref<9x128xf32, #tpu.memory_space<vmem>>, vector<1x128xf32>
    %24 = vector.broadcast %23 : vector<1x128xf32> to vector<512x128xf32>
    %25 = arith.addf %22, %24 : vector<512x128xf32>
    %cst_18 = arith.constant 0.000000e+00 : f32
    %26 = vector.broadcast %cst_18 : f32 to vector<512x128xf32>
    %27 = arith.maximumf %25, %26 : vector<512x128xf32>
    %28 = arith.truncf %27 : vector<512x128xf32> to vector<512x128xbf16>
    %c2_19 = arith.constant 2 : index
    %c0_20 = arith.constant 0 : index
    %c0_21 = arith.constant 0 : index
    %29 = vector.load %arg3[%c2_19, %c0_20, %c0_21] : memref<8x128x128xbf16, #tpu.memory_space<vmem>>, vector<1x128x128xbf16>
    %30 = vector.shape_cast %29 : vector<1x128x128xbf16> to vector<128x128xbf16>
    %cst_22 = arith.constant dense<0.000000e+00> : vector<512x128xf32>
    %31 = tpu.matmul %28, %30, %cst_22 {dimension_numbers = #tpu.dot_dimension_numbers<[1], [0], [0], [1], [0, 0, 1, 1], [], []>} : vector<512x128xbf16>, vector<128x128xbf16>, vector<512x128xf32> -> vector<512x128xf32>
    %c3 = arith.constant 3 : index
    %c0_23 = arith.constant 0 : index
    %32 = vector.load %arg4[%c3, %c0_23] : memref<9x128xf32, #tpu.memory_space<vmem>>, vector<1x128xf32>
    %33 = vector.broadcast %32 : vector<1x128xf32> to vector<512x128xf32>
    %34 = arith.addf %31, %33 : vector<512x128xf32>
    %cst_24 = arith.constant 0.000000e+00 : f32
    %35 = vector.broadcast %cst_24 : f32 to vector<512x128xf32>
    %36 = arith.maximumf %34, %35 : vector<512x128xf32>
    %37 = arith.truncf %36 : vector<512x128xf32> to vector<512x128xbf16>
    %c3_25 = arith.constant 3 : index
    %c0_26 = arith.constant 0 : index
    %c0_27 = arith.constant 0 : index
    %38 = vector.load %arg3[%c3_25, %c0_26, %c0_27] : memref<8x128x128xbf16, #tpu.memory_space<vmem>>, vector<1x128x128xbf16>
    %39 = vector.shape_cast %38 : vector<1x128x128xbf16> to vector<128x128xbf16>
    %cst_28 = arith.constant dense<0.000000e+00> : vector<512x128xf32>
    %40 = tpu.matmul %37, %39, %cst_28 {dimension_numbers = #tpu.dot_dimension_numbers<[1], [0], [0], [1], [0, 0, 1, 1], [], []>} : vector<512x128xbf16>, vector<128x128xbf16>, vector<512x128xf32> -> vector<512x128xf32>
    %c4 = arith.constant 4 : index
    %c0_29 = arith.constant 0 : index
    %41 = vector.load %arg4[%c4, %c0_29] : memref<9x128xf32, #tpu.memory_space<vmem>>, vector<1x128xf32>
    %42 = vector.broadcast %41 : vector<1x128xf32> to vector<512x128xf32>
    %43 = arith.addf %40, %42 : vector<512x128xf32>
    %cst_30 = arith.constant 0.000000e+00 : f32
    %44 = vector.broadcast %cst_30 : f32 to vector<512x128xf32>
    %45 = arith.maximumf %43, %44 : vector<512x128xf32>
    %46 = arith.truncf %45 : vector<512x128xf32> to vector<512x128xbf16>
    %c4_31 = arith.constant 4 : index
    %c0_32 = arith.constant 0 : index
    %c0_33 = arith.constant 0 : index
    %47 = vector.load %arg3[%c4_31, %c0_32, %c0_33] : memref<8x128x128xbf16, #tpu.memory_space<vmem>>, vector<1x128x128xbf16>
    %48 = vector.shape_cast %47 : vector<1x128x128xbf16> to vector<128x128xbf16>
    %cst_34 = arith.constant dense<0.000000e+00> : vector<512x128xf32>
    %49 = tpu.matmul %46, %48, %cst_34 {dimension_numbers = #tpu.dot_dimension_numbers<[1], [0], [0], [1], [0, 0, 1, 1], [], []>} : vector<512x128xbf16>, vector<128x128xbf16>, vector<512x128xf32> -> vector<512x128xf32>
    %c5 = arith.constant 5 : index
    %c0_35 = arith.constant 0 : index
    %50 = vector.load %arg4[%c5, %c0_35] : memref<9x128xf32, #tpu.memory_space<vmem>>, vector<1x128xf32>
    %51 = vector.broadcast %50 : vector<1x128xf32> to vector<512x128xf32>
    %52 = arith.addf %49, %51 : vector<512x128xf32>
    %c1_36 = arith.constant 1 : index
    %c0_37 = arith.constant 0 : index
    %c0_38 = arith.constant 0 : index
    %53 = vector.load %arg2[%c1_36, %c0_37, %c0_38] : memref<2x12x128xbf16, #tpu.memory_space<vmem>>, vector<1x12x128xbf16>
    %54 = vector.shape_cast %53 : vector<1x12x128xbf16> to vector<12x128xbf16>
    %cst_39 = arith.constant dense<0.000000e+00> : vector<512x128xf32>
    %55 = tpu.matmul %1, %54, %cst_39 {dimension_numbers = #tpu.dot_dimension_numbers<[1], [0], [0], [1], [0, 0, 1, 1], [], []>} : vector<512x12xbf16>, vector<12x128xbf16>, vector<512x128xf32> -> vector<512x128xf32>
    %56 = arith.addf %52, %55 : vector<512x128xf32>
    %cst_40 = arith.constant 0.000000e+00 : f32
    %57 = vector.broadcast %cst_40 : f32 to vector<512x128xf32>
    %58 = arith.maximumf %56, %57 : vector<512x128xf32>
    %59 = arith.truncf %58 : vector<512x128xf32> to vector<512x128xbf16>
    %c5_41 = arith.constant 5 : index
    %c0_42 = arith.constant 0 : index
    %c0_43 = arith.constant 0 : index
    %60 = vector.load %arg3[%c5_41, %c0_42, %c0_43] : memref<8x128x128xbf16, #tpu.memory_space<vmem>>, vector<1x128x128xbf16>
    %61 = vector.shape_cast %60 : vector<1x128x128xbf16> to vector<128x128xbf16>
    %cst_44 = arith.constant dense<0.000000e+00> : vector<512x128xf32>
    %62 = tpu.matmul %59, %61, %cst_44 {dimension_numbers = #tpu.dot_dimension_numbers<[1], [0], [0], [1], [0, 0, 1, 1], [], []>} : vector<512x128xbf16>, vector<128x128xbf16>, vector<512x128xf32> -> vector<512x128xf32>
    %c6 = arith.constant 6 : index
    %c0_45 = arith.constant 0 : index
    %63 = vector.load %arg4[%c6, %c0_45] : memref<9x128xf32, #tpu.memory_space<vmem>>, vector<1x128xf32>
    %64 = vector.broadcast %63 : vector<1x128xf32> to vector<512x128xf32>
    %65 = arith.addf %62, %64 : vector<512x128xf32>
    %cst_46 = arith.constant 0.000000e+00 : f32
    %66 = vector.broadcast %cst_46 : f32 to vector<512x128xf32>
    %67 = arith.maximumf %65, %66 : vector<512x128xf32>
    %68 = arith.truncf %67 : vector<512x128xf32> to vector<512x128xbf16>
    %c6_47 = arith.constant 6 : index
    %c0_48 = arith.constant 0 : index
    %c0_49 = arith.constant 0 : index
    %69 = vector.load %arg3[%c6_47, %c0_48, %c0_49] : memref<8x128x128xbf16, #tpu.memory_space<vmem>>, vector<1x128x128xbf16>
    %70 = vector.shape_cast %69 : vector<1x128x128xbf16> to vector<128x128xbf16>
    %cst_50 = arith.constant dense<0.000000e+00> : vector<512x128xf32>
    %71 = tpu.matmul %68, %70, %cst_50 {dimension_numbers = #tpu.dot_dimension_numbers<[1], [0], [0], [1], [0, 0, 1, 1], [], []>} : vector<512x128xbf16>, vector<128x128xbf16>, vector<512x128xf32> -> vector<512x128xf32>
    %c7 = arith.constant 7 : index
    %c0_51 = arith.constant 0 : index
    %72 = vector.load %arg4[%c7, %c0_51] : memref<9x128xf32, #tpu.memory_space<vmem>>, vector<1x128xf32>
    %73 = vector.broadcast %72 : vector<1x128xf32> to vector<512x128xf32>
    %74 = arith.addf %71, %73 : vector<512x128xf32>
    %cst_52 = arith.constant 0.000000e+00 : f32
    %75 = vector.broadcast %cst_52 : f32 to vector<512x128xf32>
    %76 = arith.maximumf %74, %75 : vector<512x128xf32>
    %77 = arith.truncf %76 : vector<512x128xf32> to vector<512x128xbf16>
    %c7_53 = arith.constant 7 : index
    %c0_54 = arith.constant 0 : index
    %c0_55 = arith.constant 0 : index
    %78 = vector.load %arg3[%c7_53, %c0_54, %c0_55] : memref<8x128x128xbf16, #tpu.memory_space<vmem>>, vector<1x128x128xbf16>
    %79 = vector.shape_cast %78 : vector<1x128x128xbf16> to vector<128x128xbf16>
    %cst_56 = arith.constant dense<0.000000e+00> : vector<512x128xf32>
    %80 = tpu.matmul %77, %79, %cst_56 {dimension_numbers = #tpu.dot_dimension_numbers<[1], [0], [0], [1], [0, 0, 1, 1], [], []>} : vector<512x128xbf16>, vector<128x128xbf16>, vector<512x128xf32> -> vector<512x128xf32>
    %c8 = arith.constant 8 : index
    %c0_57 = arith.constant 0 : index
    %81 = vector.load %arg4[%c8, %c0_57] : memref<9x128xf32, #tpu.memory_space<vmem>>, vector<1x128xf32>
    %82 = vector.broadcast %81 : vector<1x128xf32> to vector<512x128xf32>
    %83 = arith.addf %80, %82 : vector<512x128xf32>
    %c0_58 = arith.constant 0 : index
    %c0_59 = arith.constant 0 : index
    %84 = vector.load %arg8[%c0_58, %c0_59] : memref<128x8xbf16, #tpu.memory_space<vmem>>, vector<128x8xbf16>
    %cst_60 = arith.constant dense<0.000000e+00> : vector<512x8xf32>
    %85 = tpu.matmul %77, %84, %cst_60 {dimension_numbers = #tpu.dot_dimension_numbers<[1], [0], [0], [1], [0, 0, 1, 1], [], []>} : vector<512x128xbf16>, vector<128x8xbf16>, vector<512x8xf32> -> vector<512x8xf32>
    %86 = arith.truncf %83 : vector<512x128xf32> to vector<512x128xbf16>
    %c0_61 = arith.constant 0 : index
    %c0_62 = arith.constant 0 : index
    %87 = vector.load %arg6[%c0_61, %c0_62] : memref<128x64xbf16, #tpu.memory_space<vmem>>, vector<128x64xbf16>
    %cst_63 = arith.constant dense<0.000000e+00> : vector<512x64xf32>
    %88 = tpu.matmul %86, %87, %cst_63 {dimension_numbers = #tpu.dot_dimension_numbers<[1], [0], [0], [1], [0, 0, 1, 1], [], []>} : vector<512x128xbf16>, vector<128x64xbf16>, vector<512x64xf32> -> vector<512x64xf32>
    %c0_64 = arith.constant 0 : index
    %c0_65 = arith.constant 0 : index
    %89 = vector.load %arg5[%c0_64, %c0_65] : memref<12x64xbf16, #tpu.memory_space<vmem>>, vector<12x64xbf16>
    %cst_66 = arith.constant dense<0.000000e+00> : vector<512x64xf32>
    %90 = tpu.matmul %1, %89, %cst_66 {dimension_numbers = #tpu.dot_dimension_numbers<[1], [0], [0], [1], [0, 0, 1, 1], [], []>} : vector<512x12xbf16>, vector<12x64xbf16>, vector<512x64xf32> -> vector<512x64xf32>
    %91 = arith.addf %88, %90 : vector<512x64xf32>
    %c0_67 = arith.constant 0 : index
    %c0_68 = arith.constant 0 : index
    %92 = vector.load %arg7[%c0_67, %c0_68] : memref<1x64xf32, #tpu.memory_space<vmem>>, vector<1x64xf32>
    %93 = vector.broadcast %92 : vector<1x64xf32> to vector<512x64xf32>
    %94 = arith.addf %91, %93 : vector<512x64xf32>
    %cst_69 = arith.constant 0.000000e+00 : f32
    %95 = vector.broadcast %cst_69 : f32 to vector<512x64xf32>
    %96 = arith.maximumf %94, %95 : vector<512x64xf32>
    %97 = arith.truncf %96 : vector<512x64xf32> to vector<512x64xbf16>
    %c0_70 = arith.constant 0 : index
    %c0_71 = arith.constant 0 : index
    %98 = vector.load %arg9[%c0_70, %c0_71] : memref<64x8xbf16, #tpu.memory_space<vmem>>, vector<64x8xbf16>
    %cst_72 = arith.constant dense<0.000000e+00> : vector<512x8xf32>
    %99 = tpu.matmul %97, %98, %cst_72 {dimension_numbers = #tpu.dot_dimension_numbers<[1], [0], [0], [1], [0, 0, 1, 1], [], []>} : vector<512x64xbf16>, vector<64x8xbf16>, vector<512x8xf32> -> vector<512x8xf32>
    %100 = arith.addf %85, %99 : vector<512x8xf32>
    %c0_73 = arith.constant 0 : index
    %c0_74 = arith.constant 0 : index
    %101 = vector.load %arg10[%c0_73, %c0_74] : memref<1x8xf32, #tpu.memory_space<vmem>>, vector<1x8xf32>
    %102 = vector.broadcast %101 : vector<1x8xf32> to vector<512x8xf32>
    %103 = arith.addf %100, %102 : vector<512x8xf32>
    %c0_75 = arith.constant 0 : index
    %c0_76 = arith.constant 0 : index
    %104 = vector.load %arg11[%c0_75, %c0_76] : memref<512x8xf32, #tpu.memory_space<vmem>>, vector<512x8xf32>
    tpu.vector_store %arg11[%c0_75, %c0_76], %103 {strides = array<i32>} : memref<512x8xf32, #tpu.memory_space<vmem>>, vector<512x8xf32>,
    return
  }
  func.func @transform_0(%arg0: i32) -> (i32, i32) {
    %c0_i32 = arith.constant 0 : i32
    %c0_i32_0 = arith.constant 0 : i32
    return %arg0, %c0_i32 : i32, i32
  }
  func.func @transform_1(%arg0: i32) -> (i32, i32, i32) {
    %c0_i32 = arith.constant 0 : i32
    %c0_i32_0 = arith.constant 0 : i32
    %c0_i32_1 = arith.constant 0 : i32
    %c0_i32_2 = arith.constant 0 : i32
    return %c0_i32, %c0_i32_0, %c0_i32_1 : i32, i32, i32
  }
  func.func @transform_2(%arg0: i32) -> (i32, i32, i32) {
    %c0_i32 = arith.constant 0 : i32
    %c0_i32_0 = arith.constant 0 : i32
    %c0_i32_1 = arith.constant 0 : i32
    %c0_i32_2 = arith.constant 0 : i32
    return %c0_i32, %c0_i32_0, %c0_i32_1 : i32, i32, i32
  }
  func.func @transform_3(%arg0: i32) -> (i32, i32) {
    %c0_i32 = arith.constant 0 : i32
    %c0_i32_0 = arith.constant 0 : i32
    %c0_i32_1 = arith.constant 0 : i32
    return %c0_i32, %c0_i32_0 : i32, i32
  }
  func.func @transform_4(%arg0: i32) -> (i32, i32) {
    %c0_i32 = arith.constant 0 : i32
    %c0_i32_0 = arith.constant 0 : i32
    %c0_i32_1 = arith.constant 0 : i32
    return %c0_i32, %c0_i32_0 : i32, i32
  }
  func.func @transform_5(%arg0: i32) -> (i32, i32) {
    %c0_i32 = arith.constant 0 : i32
    %c0_i32_0 = arith.constant 0 : i32
    %c0_i32_1 = arith.constant 0 : i32
    return %c0_i32, %c0_i32_0 : i32, i32
  }
  func.func @transform_6(%arg0: i32) -> (i32, i32) {
    %c0_i32 = arith.constant 0 : i32
    %c0_i32_0 = arith.constant 0 : i32
    %c0_i32_1 = arith.constant 0 : i32
    return %c0_i32, %c0_i32_0 : i32, i32
  }
  func.func @transform_7(%arg0: i32) -> (i32, i32) {
    %c0_i32 = arith.constant 0 : i32
    %c0_i32_0 = arith.constant 0 : i32
    %c0_i32_1 = arith.constant 0 : i32
    return %c0_i32, %c0_i32_0 : i32, i32
  }
  func.func @transform_8(%arg0: i32) -> (i32, i32) {
    %c0_i32 = arith.constant 0 : i32
    %c0_i32_0 = arith.constant 0 : i32
    %c0_i32_1 = arith.constant 0 : i32
    return %c0_i32, %c0_i32_0 : i32, i32
  }
  func.func @transform_9(%arg0: i32) -> (i32, i32) {
    %c0_i32 = arith.constant 0 : i32
    %c0_i32_0 = arith.constant 0 : i32
    %c0_i32_1 = arith.constant 0 : i32
    return %c0_i32, %c0_i32_0 : i32, i32
  }
  func.func @transform_10(%arg0: i32) -> (i32, i32) {
    %c0_i32 = arith.constant 0 : i32
    %c0_i32_0 = arith.constant 0 : i32
    return %arg0, %c0_i32 : i32, i32
  }
}

</mosaic_0001>

<bundles_post_ra>
// kernel: tpu_custom_call.1
= control target key start
LH: loop header
LB: loop body
LE: loop exit
PB: predicated region body
PF: predicated region fallthrough
CT: control target
= control target key end

     0   :  { %s9068_s13 = smov 0   ;;  %s10730_s0 = inlined_call_operand.vmem [shape: f32[1536,12], index: 0, kind: input, shape index: {}]   ;;  %s10731_s1 = inlined_call_operand.vmem [shape: bf16[2,12,128], index: 1, kind: input, shape index: {}]   ;;  %s10732_s2 = inlined_call_operand.vmem [shape: bf16[8,128,128], index: 2, kind: input, shape index: {}]   ;;  %s10733_s3 = inlined_call_operand.vmem [shape: f32[9,128], index: 3, kind: input, shape index: {}]   ;;  %s10734_s4 = inlined_call_operand.vmem [shape: bf16[12,64], index: 4, kind: input, shape index: {}]   ;;  %s10735_s5 = inlined_call_operand.vmem [shape: bf16[128,64], index: 5, kind: input, shape index: {}]   ;;  %s10736_s6 = inlined_call_operand.vmem [shape: f32[1,64], index: 6, kind: input, shape index: {}]   ;;  %s10737_s7 = inlined_call_operand.vmem [shape: bf16[128,8], index: 7, kind: input, shape index: {}]   ;;  %s10738_s8 = inlined_call_operand.vmem [shape: bf16[64,8], index: 8, kind: input, shape index: {}]   ;;  %s10739_s9 = inlined_call_operand.vmem [shape: f32[1,8], index: 9, kind: input, shape index: {}]   ;;  %s10740_s10 = inlined_call_operand.vmem [shape: f32[1536,8], index: 10, kind: output, shape index: {}]  }
   0x1 LB: > { %s6679_s14 = sadd.s32 4294967295, %s9011_s13   ;;  %p6683_p0 = scmp.ge.s32.totalorder %s9011_s13, 1  ;;  %s9011_s13 = sphi %s9068_s13, %s20_s13  }
   0x2   : > { %p313_p1 = scmp.lt.s32.totalorder %s9011_s13, 4 }
   0x4   : > { %p314_p2 = pnand %p6683_p0, %p313_p1 }
   0x5   : > { %v8918_v0 = vld [vmem:[%s10731_s1] sm:$0x3f] (!%p314_p2)   ;;  %vm569_vm0 = vcmask (!%p314_p2), 1045504   ;;  %s6684_s17 = sshll.u32 (!%p314_p2), %s6679_s14, 6  ;;  %v8920_v3 = vld [vmem:[%s10732_s2 + $0x8] sm:$0xff] (!%p314_p2)   ;;  %v8921_v4 = vld [vmem:[%s10732_s2 + $0x10] sm:$0xff] (!%p314_p2)  }
   0x6   : > { %317 = sbr.rel (%p314_p2) target bundleno = 2832 (0xb10), region = 60  ;;  %8907 = vmatprep.subr.msk.bf16.mxu0 (!%p314_p2), %vm569_vm0, %v8918_v0  ;;  %v571_v1 = vsel (!%p314_p2), %vm569_vm0, %v8918_v0, 0  ;;  %p352_p3 = scmp.lt.s32.totalorder (!%p314_p2), %s6684_s17, 191  ;;  %v8919_v2 = vld [vmem:[%s10732_s2] sm:$0xff] (!%p314_p2)   ;;  %vm472_vm1 = vcmask (!%p314_p2), 97280   ;;  %v8922_v14 = vld [vmem:[%s10732_s2 + $0x18] sm:$0xff] (!%p314_p2)  }
   0x7   : > { %7566 = vmatpush3.bf16.msra.mxu0 (!%p314_p2), %v571_v1  ;;  %7631 = vmatprep.subr.bf16.mxu1 (!%p314_p2), %v8919_v2  ;;  %v8923_v20 = vld [vmem:[%s10732_s2 + $0x20] sm:$0xff] (!%p314_p2)   ;;  %v8924_v22 = vld [vmem:[%s10732_s2 + $0x28] sm:$0xff] (!%p314_p2)   ;;  %vm5764_vm2 = vcmask (!%p314_p2), 523264   ;;  %vm6558_vm3 = vcmask (!%p314_p2), 64512  }
   0x8   : > { %7632 = vmatpush3.bf16.msra.mxu1 (!%p314_p2), %v8919_v2 }
   0x9   : > { %7633 = vmatprep.subr.bf16.mxu1 (!%p314_p2), %v8920_v3 }
   0xc   : > { %7634 = vmatpush3.bf16.msra.mxu1 (!%p314_p2), %v8920_v3 }
   0xd   : > { %s10742_s17 = smov (!%p352_p3, %s6684_s17), 191  ;;  %7635 = vmatprep.subr.bf16.mxu1 %v8921_v4 }
   0xe   : > { %s6685_s22 = sshll.u32 %s10742_s17, 3 }
   0xf   : > { %s9095_s25 = scalar_lea.vmem %s10730_s0, %s6685_s22  ;;  %s10533_s11 = scalar_lea.vmem %s10740_s10, %s6685_s22 }
  0x10   : > { %v364_v5 = vld [vmem:[%s9095_s25] sm:$0xff]  ;;  %v365_v6 = vld [vmem:[%s9095_s25 + $0x8] sm:$0xff]  ;;  %v366_v7 = vld [vmem:[%s9095_s25 + $0x10] sm:$0xff]  ;;  %7636 = vmatpush3.bf16.msra.mxu1 %v8921_v4 }
  0x11   : > { %v9103_v8 = vpack.c.bf16 %v365_v6, %v364_v5  ;;  %v367_v9 = vld [vmem:[%s9095_s25 + $0x18] sm:$0xff]  ;;  %v368_v10 = vld [vmem:[%s9095_s25 + $0x20] sm:$0xff]  ;;  %v369_v11 = vld [vmem:[%s9095_s25 + $0x28] sm:$0xff]  ;;  %7637 = vmatprep.subr.bf16.mxu1 %v8922_v14 }
  0x12   : > { %v9108_v12 = vpack.c.bf16 %v367_v9, %v366_v7  ;;  %v9110_v13 = vpack.c.bf16 %v369_v11, %v368_v10  ;;  %v370_v15 = vld [vmem:[%s9095_s25 + $0x30] sm:$0xff]  ;;  %v371_v16 = vld [vmem:[%s9095_s25 + $0x38] sm:$0xff]  ;;  %v372_v17 = vld [vmem:[%s9095_s25 + $0x40] sm:$0xff] }
  0x13   : > { %7567 = vmatprep.mubr.msk.bf16.mxu0 %vm472_vm1, %v9103_v8  ;;  %v373_v18 = vld [vmem:[%s9095_s25 + $0x48] sm:$0xff]  ;;  %v9125_v19 = vpack.c.bf16 %v371_v16, %v370_v15  ;;  %v374_v23 = vld [vmem:[%s9095_s25 + $0x50] sm:$0xff]  ;;  %v375_v24 = vld [vmem:[%s9095_s25 + $0x58] sm:$0xff] }
  0x14   : > { %7568 = vmatmul.mubr.msk.bf16.vlgmr.msra.gmra.mrb[0].mxu0 %vm472_vm1, %v9108_v12  ;;  %v9130_v21 = vpack.c.bf16 %v373_v18, %v372_v17  ;;  %7638 = vmatpush3.bf16.msra.mxu1 %v8922_v14  ;;  %v376_v25 = vld [vmem:[%s9095_s25 + $0x60] sm:$0xff]  ;;  %v377_v26 = vld [vmem:[%s9095_s25 + $0x68] sm:$0xff]  ;;  %v9143_v27 = vpack.c.bf16 %v375_v24, %v374_v23  ;;  %v378_v29 = vld [vmem:[%s9095_s25 + $0x70] sm:$0xff] }
  0x15   : > { %7571 = vmatprep.mubr.msk.bf16.mxu0 %vm472_vm1, %v9110_v13  ;;  %7639 = vmatprep.subr.bf16.mxu1 %v8923_v20  ;;  %v9145_v28 = vpack.c.bf16 %v377_v26, %v376_v25  ;;  %v379_v30 = vld [vmem:[%s9095_s25 + $0x78] sm:$0xff]  ;;  %v380_v31 = vld [vmem:[%s9095_s25 + $0x80] sm:$0xff]  ;;  %v381_v32 = vld [vmem:[%s9095_s25 + $0x88] sm:$0xff] }
  0x16   : > { %v9155_v33 = vpack.c.bf16 %v379_v30, %v378_v29  ;;  %v9157_v34 = vpack.c.bf16 %v381_v32, %v380_v31  ;;  %v382_v35 = vld [vmem:[%s9095_s25 + $0x90] sm:$0xff]  ;;  %v383_v36 = vld [vmem:[%s9095_s25 + $0x98] sm:$0xff]  ;;  %v384_v37 = vld [vmem:[%s9095_s25 + $0xa0] sm:$0xff] }
  0x17   : > { %v385_v38 = vld [vmem:[%s9095_s25 + $0xa8] sm:$0xff]  ;;  %v9167_v39 = vpack.c.bf16 %v383_v36, %v382_v35  ;;  %v386_v41 = vld [vmem:[%s9095_s25 + $0xb0] sm:$0xff]  ;;  %v387_v42 = vld [vmem:[%s9095_s25 + $0xb8] sm:$0xff] }
  0x18   : > { %7640 = vmatpush3.bf16.msra.mxu1 %v8923_v20  ;;  %v9169_v40 = vpack.c.bf16 %v385_v38, %v384_v37  ;;  %v388_v43 = vld [vmem:[%s9095_s25 + $0xc0] sm:$0xff]  ;;  %v389_v44 = vld [vmem:[%s9095_s25 + $0xc8] sm:$0xff]  ;;  %v9179_v45 = vpack.c.bf16 %v387_v42, %v386_v41  ;;  %v390_v47 = vld [vmem:[%s9095_s25 + $0xd0] sm:$0xff] }
  0x19   : > { %7641 = vmatprep.subr.bf16.mxu1 %v8924_v22  ;;  %v9181_v46 = vpack.c.bf16 %v389_v44, %v388_v43  ;;  %v391_v48 = vld [vmem:[%s9095_s25 + $0xd8] sm:$0xff]  ;;  %v392_v49 = vld [vmem:[%s9095_s25 + $0xe0] sm:$0xff]  ;;  %v393_v50 = vld [vmem:[%s9095_s25 + $0xe8] sm:$0xff] }
  0x1a   : > { %v9191_v51 = vpack.c.bf16 %v391_v48, %v390_v47  ;;  %v9193_v52 = vpack.c.bf16 %v393_v50, %v392_v49  ;;  %v394_v53 = vld [vmem:[%s9095_s25 + $0xf0] sm:$0xff]  ;;  %v395_v54 = vld [vmem:[%s9095_s25 + $0xf8] sm:$0xff]  ;;  %v396_v55 = vld [vmem:[%s9095_s25 + $0x100] sm:$0xff] }
  0x1b   : > { %v397_v56 = vld [vmem:[%s9095_s25 + $0x108] sm:$0xff]  ;;  %v9203_v57 = vpack.c.bf16 %v395_v54, %v394_v53  ;;  %v398_v59 = vld [vmem:[%s9095_s25 + $0x110] sm:$0xff]  ;;  %v399_v60 = vld [vmem:[%s9095_s25 + $0x118] sm:$0xff] }
  0x1c   : > { %7572 = vmatmul.mubr.msk.bf16.gmra.mrb[4].mxu0 %vm472_vm1, %v9125_v19  ;;  %7642 = vmatpush3.bf16.msra.mxu1 %v8924_v22  ;;  %v9205_v58 = vpack.c.bf16 %v397_v56, %v396_v55  ;;  %v400_v61 = vld [vmem:[%s9095_s25 + $0x120] sm:$0xff]  ;;  %v401_v62 = vld [vmem:[%s9095_s25 + $0x128] sm:$0xff]  ;;  %v9215_v63 = vpack.c.bf16 %v399_v60, %v398_v59  ;;  %v402_v1 = vld [vmem:[%s9095_s25 + $0x130] sm:$0xff] }
  0x1d   : > { %7575 = vmatprep.mubr.msk.bf16.mxu0 %vm472_vm1, %v9130_v21  ;;  %v9217_v0 = vpack.c.bf16 %v401_v62, %v400_v61  ;;  %v403_v2 = vld [vmem:[%s9095_s25 + $0x138] sm:$0xff]  ;;  %v404_v3 = vld [vmem:[%s9095_s25 + $0x140] sm:$0xff]  ;;  %v405_v4 = vld [vmem:[%s9095_s25 + $0x148] sm:$0xff] }
  0x1e   : > { %v9227_v5 = vpack.c.bf16 %v403_v2, %v402_v1  ;;  %v9229_v6 = vpack.c.bf16 %v405_v4, %v404_v3  ;;  %v406_v7 = vld [vmem:[%s9095_s25 + $0x150] sm:$0xff]  ;;  %v407_v9 = vld [vmem:[%s9095_s25 + $0x158] sm:$0xff]  ;;  %v408_v10 = vld [vmem:[%s9095_s25 + $0x160] sm:$0xff] }
  0x1f   : > { %v409_v11 = vld [vmem:[%s9095_s25 + $0x168] sm:$0xff]  ;;  %v9239_v14 = vpack.c.bf16 %v407_v9, %v406_v7  ;;  %v410_v16 = vld [vmem:[%s9095_s25 + $0x170] sm:$0xff]  ;;  %v411_v17 = vld [vmem:[%s9095_s25 + $0x178] sm:$0xff] }
  0x20   : > { %v9241_v15 = vpack.c.bf16 %v409_v11, %v408_v10  ;;  %v412_v18 = vld [vmem:[%s9095_s25 + $0x180] sm:$0xff]  ;;  %v413_v20 = vld [vmem:[%s9095_s25 + $0x188] sm:$0xff]  ;;  %v9251_v22 = vpack.c.bf16 %v411_v17, %v410_v16  ;;  %v8925_v23 = vld [vmem:[%s10732_s2 + $0x30] sm:$0xff]  }
  0x21   : > { %v9256_v24 = vpack.c.bf16 %v413_v20, %v412_v18  ;;  %7643 = vmatprep.subr.bf16.mxu1 %v8925_v23  ;;  %v8926_v25 = vld [vmem:[%s10732_s2 + $0x38] sm:$0xff]   ;;  %v414_v26 = vld [vmem:[%s9095_s25 + $0x190] sm:$0xff]  ;;  %v416_v30 = vld [vmem:[%s9095_s25 + $0x1a0] sm:$0xff] }
  0x22   : > { %7644 = vmatpush3.bf16.msra.mxu1 %v8925_v23  ;;  %v415_v29 = vld [vmem:[%s9095_s25 + $0x198] sm:$0xff]  ;;  %v417_v31 = vld [vmem:[%s9095_s25 + $0x1a8] sm:$0xff]  ;;  %v418_v36 = vld [vmem:[%s9095_s25 + $0x1b0] sm:$0xff] }
  0x23   : > { %7645 = vmatprep.subr.bf16.mxu1 %v8926_v25  ;;  %v9269_v32 = vpack.c.bf16 %v415_v29, %v414_v26  ;;  %v9271_v35 = vpack.c.bf16 %v417_v31, %v416_v30  ;;  %v419_v37 = vld [vmem:[%s9095_s25 + $0x1b8] sm:$0xff]  ;;  %v420_v38 = vld [vmem:[%s9095_s25 + $0x1c0] sm:$0xff]  ;;  %v421_v41 = vld [vmem:[%s9095_s25 + $0x1c8] sm:$0xff] }
  0x24   : > { %7576 = vmatmul.mubr.msk.bf16.gmra.mrb[8].mxu0 %vm472_vm1, %v9143_v27  ;;  %v9281_v42 = vpack.c.bf16 %v419_v37, %v418_v36  ;;  %v9283_v43 = vpack.c.bf16 %v421_v41, %v420_v38  ;;  %v422_v44 = vld [vmem:[%s9095_s25 + $0x1d0] sm:$0xff]  ;;  %v423_v47 = vld [vmem:[%s9095_s25 + $0x1d8] sm:$0xff]  ;;  %v424_v48 = vld [vmem:[%s9095_s25 + $0x1e0] sm:$0xff] }
  0x25   : > { %7579 = vmatprep.mubr.msk.bf16.mxu0 %vm472_vm1, %v9145_v28  ;;  %v425_v49 = vld [vmem:[%s9095_s25 + $0x1e8] sm:$0xff]  ;;  %v9293_v50 = vpack.c.bf16 %v423_v47, %v422_v44  ;;  %v426_v54 = vld [vmem:[%s9095_s25 + $0x1f0] sm:$0xff]  ;;  %v427_v55 = vld [vmem:[%s9095_s25 + $0x1f8] sm:$0xff] }
  0x26   : > { %7646 = vmatpush3.bf16.msra.mxu1 %v8926_v25  ;;  %v9295_v53 = vpack.c.bf16 %v425_v49, %v424_v48  ;;  %v9303_v56 = vpack.c.bf16 %v427_v55, %v426_v54  ;;  %v8927_v59 = vld [vmem:[%s10732_s2 + $0x40] sm:$0xff]   ;;  %v8928_v60 = vld [vmem:[%s10732_s2 + $0x48] sm:$0xff]   ;;  %v8929_v10 = vld [vmem:[%s10732_s2 + $0x50] sm:$0xff]  }
  0x27   : > { %7711 = vmatprep.subr.bf16.mxu0 %v8927_v59  ;;  %v9316_v61 = vld [vmem:[%s10733_s3] ss:$0 sm:$0xff]  ;;  %v8930_v11 = vld [vmem:[%s10732_s2 + $0x58] sm:$0xff]   ;;  %v8932_v47 = vld [vmem:[%s10732_s2 + $0x68] sm:$0xff]  }
  0x28   : > { %7712 = vmatpush3.bf16.msra.mxu0 %v8927_v59  ;;  %v8931_v26 = vld [vmem:[%s10732_s2 + $0x60] sm:$0xff]  }
  0x29   : > { %7713 = vmatprep.subr.bf16.mxu0 %v8928_v60 }
  0x2c   : > { %7580 = vmatmul.mubr.msk.bf16.gmra.mrb[12].mxu0 %vm472_vm1, %v9155_v33 }
  0x2d   : > { %7583 = vmatprep.mubr.msk.bf16.mxu0 %vm472_vm1, %v9157_v34  ;;  %7714 = vmatpush3.bf16.msra.mxu0 %v8928_v60 }
  0x2e   : > { %7715 = vmatprep.subr.bf16.mxu0 %v8929_v10 }
  0x31   : > { %7716 = vmatpush3.bf16.msra.mxu0 %v8929_v10 }
  0x32   : > { %7717 = vmatprep.subr.bf16.mxu0 %v8930_v11 }
  0x34   : > { %7584 = vmatmul.mubr.msk.bf16.gmra.mrb[16].mxu0 %vm472_vm1, %v9167_v39 }
  0x35   : > { %7587 = vmatprep.mubr.msk.bf16.mxu0 %vm472_vm1, %v9169_v40  ;;  %7718 = vmatpush3.bf16.msra.mxu0 %v8930_v11 }
  0x36   : > { %7719 = vmatprep.subr.bf16.mxu0 %v8931_v26 }
  0x39   : > { %7720 = vmatpush3.bf16.msra.mxu0 %v8931_v26 }
  0x3a   : > { %7721 = vmatprep.subr.bf16.mxu0 %v8932_v47 }
  0x3c   : > { %7588 = vmatmul.mubr.msk.bf16.gmra.mrb[20].mxu0 %vm472_vm1, %v9179_v45 }
  0x3d   : > { %7591 = vmatprep.mubr.msk.bf16.mxu0 %vm472_vm1, %v9181_v46  ;;  %7722 = vmatpush3.bf16.msra.mxu0 %v8932_v47 }
  0x44   : > { %7592 = vmatmul.mubr.msk.bf16.gmra.mrb[24].mxu0 %vm472_vm1, %v9191_v51 }
  0x45   : > { %7595 = vmatprep.mubr.msk.bf16.mxu0 %vm472_vm1, %v9193_v52 }
  0x4c   : > { %7596 = vmatmul.mubr.msk.bf16.gmra.mrb[28].mxu0 %vm472_vm1, %v9203_v57 }
  0x4d   : > { %7599 = vmatprep.mubr.msk.bf16.mxu0 %vm472_vm1, %v9205_v58 }
  0x54   : > { %7600 = vmatmul.mubr.msk.bf16.gmra.mrb[32].mxu0 %vm472_vm1, %v9215_v63 }
  0x55   : > { %7603 = vmatprep.mubr.msk.bf16.mxu0 %vm472_vm1, %v9217_v0 }
  0x5c   : > { %7604 = vmatmul.mubr.msk.bf16.gmra.mrb[36].mxu0 %vm472_vm1, %v9227_v5 }
  0x5d   : > { %7607 = vmatprep.mubr.msk.bf16.mxu0 %vm472_vm1, %v9229_v6 }
  0x64   : > { %7608 = vmatmul.mubr.msk.bf16.gmra.mrb[40].mxu0 %vm472_vm1, %v9239_v14 }
  0x65   : > { %7611 = vmatprep.mubr.msk.bf16.mxu0 %vm472_vm1, %v9241_v15 }
  0x6c   : > { %7612 = vmatmul.mubr.msk.bf16.gmra.mrb[44].mxu0 %vm472_vm1, %v9251_v22 }
  0x6d   : > { %7615 = vmatprep.mubr.msk.bf16.mxu0 %vm472_vm1, %v9256_v24 }
  0x74   : > { %7616 = vmatmul.mubr.msk.bf16.gmra.mrb[48].mxu0 %vm472_vm1, %v9269_v32 }
  0x75   : > { %7619 = vmatprep.mubr.msk.bf16.mxu0 %vm472_vm1, %v9271_v35 }
  0x7c   : > { %7620 = vmatmul.mubr.msk.bf16.gmra.mrb[52].mxu0 %vm472_vm1, %v9281_v42 }
  0x7d   : > { %7623 = vmatprep.mubr.msk.bf16.mxu0 %vm472_vm1, %v9283_v43 }
  0x84   : > { %7624 = vmatmul.mubr.msk.bf16.gmra.mrb[56].mxu0 %vm472_vm1, %v9293_v50 }
  0x85   : > { %7627 = vmatprep.mubr.msk.bf16.mxu0 %vm472_vm1, %v9295_v53 }
  0x8c   : > { %7628 = vmatmul.mubr.msk.bf16.gmra.mrb[60].mxu0 %vm472_vm1, %v9303_v56 }
  0xe7   : > { %v7569_v62 = vpop.f32.mrb[0].mxu0 }
  0xe8   : > { %v616_v1 = vadd.f32 %v7569_v62, %v9316_v61  ;;  %v607_v2 = vpop.f32.mrb[1].mxu0  ;;  %v8933_v62 = vld [vmem:[%s10732_s2 + $0x70] sm:$0xff]  }
  0xe9   : > { %v7570_v3 = vpop.f32.mrb[2].mxu0  ;;  %v608_v4 = vadd.f32 %v9316_v61, %v607_v2  ;;  %7723 = vmatprep.subr.bf16.mxu0 %v8933_v62 }
  0xea   : > { %v619_v7 = vadd.f32 %v7570_v3, %v9316_v61  ;;  %v610_v9 = vpop.f32.mrb[3].mxu0  ;;  %v864_v17 = vmax.f32 %v616_v1, 0.0  ;;  %7724 = vmatpush3.bf16.msra.mxu0 %v8933_v62 }
  0xeb   : > { %v611_v16 = vadd.f32 %v9316_v61, %v610_v9  ;;  %v862_v20 = vmax.f32 %v608_v4, 0.0 }
  0xec   : > { %v865_v18 = vmax.f32 %v619_v7, 0.0 }
  0xed   : > { %v863_v23 = vmax.f32 %v611_v16, 0.0  ;;  %v8934_v16 = vld [vmem:[%s10732_s2 + $0x78] sm:$0xff]  }
  0xee   : > { %v927_v25 = vpack.c.bf16 %v865_v18, %v864_v17  ;;  %7725 = vmatprep.subr.bf16.mxu0 %v8934_v16 }
  0xef   : > { %v7573_v29 = vpop.f32.mrb[4].mxu0  ;;  %v926_v30 = vpack.c.bf16 %v863_v23, %v862_v20  ;;  %7726 = vmatpush3.bf16.msra.mxu0 %v8934_v16 }
  0xf0   : > { %v632_v31 = vadd.f32 %v7573_v29, %v9316_v61  ;;  %v623_v36 = vpop.f32.mrb[5].mxu0 }
  0xf1   : > { %v624_v37 = vadd.f32 %v9316_v61, %v623_v36  ;;  %v7574_v38 = vpop.f32.mrb[6].mxu0  ;;  %7647 = vmatprep.mubr.bf16.mxu1 %v926_v30 }
  0xf2   : > { %v635_v41 = vadd.f32 %v7574_v38, %v9316_v61  ;;  %v626_v44 = vpop.f32.mrb[7].mxu0  ;;  %7648 = vmatmul.mubr.bf16.vlgmr.msra.gmra.mrb[0].mxu1 %v927_v25  ;;  %v868_v49 = vmax.f32 %v632_v31, 0.0 }
  0xf3   : > { %v627_v48 = vadd.f32 %v9316_v61, %v626_v44  ;;  %v866_v55 = vmax.f32 %v624_v37, 0.0 }
  0xf4   : > { %v869_v54 = vmax.f32 %v635_v41, 0.0 }
  0xf5   : > { %v867_v59 = vmax.f32 %v627_v48, 0.0 }
  0xf6   : > { %v929_v60 = vpack.c.bf16 %v869_v54, %v868_v49 }
  0xf7   : > { %v7577_v1 = vpop.f32.mrb[8].mxu0  ;;  %v928_v2 = vpack.c.bf16 %v867_v59, %v866_v55 }
  0xf8   : > { %v648_v3 = vadd.f32 %v7577_v1, %v9316_v61  ;;  %v639_v4 = vpop.f32.mrb[9].mxu0 }
  0xf9   : > { %v640_v7 = vadd.f32 %v9316_v61, %v639_v4  ;;  %v7578_v9 = vpop.f32.mrb[10].mxu0  ;;  %7651 = vmatprep.mubr.bf16.mxu1 %v928_v2 }
  0xfa   : > { %v651_v10 = vadd.f32 %v7578_v9, %v9316_v61  ;;  %v642_v11 = vpop.f32.mrb[11].mxu0  ;;  %7652 = vmatmul.mubr.bf16.gmra.mrb[4].mxu1 %v929_v60  ;;  %v872_v18 = vmax.f32 %v648_v3, 0.0 }
  0xfb   : > { %v643_v17 = vadd.f32 %v9316_v61, %v642_v11  ;;  %v870_v23 = vmax.f32 %v640_v7, 0.0 }
  0xfc   : > { %v873_v20 = vmax.f32 %v651_v10, 0.0 }
  0xfd   : > { %v871_v25 = vmax.f32 %v643_v17, 0.0 }
  0xfe   : > { %v931_v26 = vpack.c.bf16 %v873_v20, %v872_v18 }
  0xff   : > { %v7581_v29 = vpop.f32.mrb[12].mxu0  ;;  %v930_v30 = vpack.c.bf16 %v871_v25, %v870_v23 }
 0x100   : > { %v664_v31 = vadd.f32 %v7581_v29, %v9316_v61  ;;  %v655_v36 = vpop.f32.mrb[13].mxu0 }
 0x101   : > { %v656_v37 = vadd.f32 %v9316_v61, %v655_v36  ;;  %v7582_v38 = vpop.f32.mrb[14].mxu0  ;;  %7655 = vmatprep.mubr.bf16.mxu1 %v930_v30 }
 0x102   : > { %v667_v41 = vadd.f32 %v7582_v38, %v9316_v61  ;;  %v658_v44 = vpop.f32.mrb[15].mxu0  ;;  %7656 = vmatmul.mubr.bf16.gmra.mrb[8].mxu1 %v931_v26  ;;  %v876_v48 = vmax.f32 %v664_v31, 0.0 }
 0x103   : > { %v659_v47 = vadd.f32 %v9316_v61, %v658_v44  ;;  %v874_v54 = vmax.f32 %v656_v37, 0.0 }
 0x104   : > { %v877_v49 = vmax.f32 %v667_v41, 0.0 }
 0x105   : > { %v875_v55 = vmax.f32 %v659_v47, 0.0 }
 0x106   : > { %v933_v59 = vpack.c.bf16 %v877_v49, %v876_v48 }
 0x107   : > { %v7585_v60 = vpop.f32.mrb[16].mxu0  ;;  %v932_v62 = vpack.c.bf16 %v875_v55, %v874_v54 }
 0x108   : > { %v680_v1 = vadd.f32 %v7585_v60, %v9316_v61  ;;  %v671_v2 = vpop.f32.mrb[17].mxu0 }
 0x109   : > { %v672_v3 = vadd.f32 %v9316_v61, %v671_v2  ;;  %v7586_v4 = vpop.f32.mrb[18].mxu0  ;;  %7659 = vmatprep.mubr.bf16.mxu1 %v932_v62 }
 0x10a   : > { %v683_v7 = vadd.f32 %v7586_v4, %v9316_v61  ;;  %v674_v9 = vpop.f32.mrb[19].mxu0  ;;  %7660 = vmatmul.mubr.bf16.gmra.mrb[12].mxu1 %v933_v59  ;;  %v880_v11 = vmax.f32 %v680_v1, 0.0 }
 0x10b   : > { %v675_v10 = vadd.f32 %v9316_v61, %v674_v9  ;;  %v878_v17 = vmax.f32 %v672_v3, 0.0 }
 0x10c   : > { %v881_v16 = vmax.f32 %v683_v7, 0.0 }
 0x10d   : > { %v879_v18 = vmax.f32 %v675_v10, 0.0 }
 0x10e   : > { %v935_v20 = vpack.c.bf16 %v881_v16, %v880_v11 }
 0x10f   : > { %v7589_v23 = vpop.f32.mrb[20].mxu0  ;;  %v934_v25 = vpack.c.bf16 %v879_v18, %v878_v17 }
 0x110   : > { %v696_v26 = vadd.f32 %v7589_v23, %v9316_v61  ;;  %v687_v29 = vpop.f32.mrb[21].mxu0 }
 0x111   : > { %v688_v30 = vadd.f32 %v9316_v61, %v687_v29  ;;  %v7590_v31 = vpop.f32.mrb[22].mxu0  ;;  %7663 = vmatprep.mubr.bf16.mxu1 %v934_v25 }
 0x112   : > { %v699_v36 = vadd.f32 %v7590_v31, %v9316_v61  ;;  %v690_v37 = vpop.f32.mrb[23].mxu0  ;;  %7664 = vmatmul.mubr.bf16.gmra.mrb[16].mxu1 %v935_v20  ;;  %v884_v41 = vmax.f32 %v696_v26, 0.0 }
 0x113   : > { %v691_v38 = vadd.f32 %v9316_v61, %v690_v37  ;;  %v882_v47 = vmax.f32 %v688_v30, 0.0 }
 0x114   : > { %v885_v44 = vmax.f32 %v699_v36, 0.0 }
 0x115   : > { %v883_v48 = vmax.f32 %v691_v38, 0.0 }
 0x116   : > { %v937_v49 = vpack.c.bf16 %v885_v44, %v884_v41 }
 0x117   : > { %v7593_v54 = vpop.f32.mrb[24].mxu0  ;;  %v936_v55 = vpack.c.bf16 %v883_v48, %v882_v47 }
 0x118   : > { %v712_v59 = vadd.f32 %v7593_v54, %v9316_v61  ;;  %v703_v60 = vpop.f32.mrb[25].mxu0 }
 0x119   : > { %v704_v62 = vadd.f32 %v9316_v61, %v703_v60  ;;  %v7594_v1 = vpop.f32.mrb[26].mxu0  ;;  %7667 = vmatprep.mubr.bf16.mxu1 %v936_v55 }
 0x11a   : > { %v715_v2 = vadd.f32 %v7594_v1, %v9316_v61  ;;  %v706_v3 = vpop.f32.mrb[27].mxu0  ;;  %7668 = vmatmul.mubr.bf16.gmra.mrb[20].mxu1 %v937_v49  ;;  %v888_v7 = vmax.f32 %v712_v59, 0.0 }
 0x11b   : > { %v707_v4 = vadd.f32 %v9316_v61, %v706_v3  ;;  %v886_v10 = vmax.f32 %v704_v62, 0.0 }
 0x11c   : > { %v889_v9 = vmax.f32 %v715_v2, 0.0 }
 0x11d   : > { %v887_v11 = vmax.f32 %v707_v4, 0.0 }
 0x11e   : > { %v939_v16 = vpack.c.bf16 %v889_v9, %v888_v7 }
 0x11f   : > { %v7597_v17 = vpop.f32.mrb[28].mxu0  ;;  %v938_v18 = vpack.c.bf16 %v887_v11, %v886_v10 }
 0x120   : > { %v728_v20 = vadd.f32 %v7597_v17, %v9316_v61  ;;  %v719_v23 = vpop.f32.mrb[29].mxu0 }
 0x121   : > { %v720_v25 = vadd.f32 %v9316_v61, %v719_v23  ;;  %v7598_v26 = vpop.f32.mrb[30].mxu0  ;;  %7671 = vmatprep.mubr.bf16.mxu1 %v938_v18 }
 0x122   : > { %v731_v29 = vadd.f32 %v7598_v26, %v9316_v61  ;;  %v722_v30 = vpop.f32.mrb[31].mxu0  ;;  %7672 = vmatmul.mubr.bf16.gmra.mrb[24].mxu1 %v939_v16  ;;  %v892_v36 = vmax.f32 %v728_v20, 0.0 }
 0x123   : > { %v723_v31 = vadd.f32 %v9316_v61, %v722_v30  ;;  %v890_v38 = vmax.f32 %v720_v25, 0.0 }
 0x124   : > { %v893_v37 = vmax.f32 %v731_v29, 0.0 }
 0x125   : > { %v891_v41 = vmax.f32 %v723_v31, 0.0 }
 0x126   : > { %v941_v44 = vpack.c.bf16 %v893_v37, %v892_v36 }
 0x127   : > { %v7601_v47 = vpop.f32.mrb[32].mxu0  ;;  %v940_v48 = vpack.c.bf16 %v891_v41, %v890_v38 }
 0x128   : > { %v744_v49 = vadd.f32 %v7601_v47, %v9316_v61  ;;  %v735_v54 = vpop.f32.mrb[33].mxu0 }
 0x129   : > { %v736_v55 = vadd.f32 %v9316_v61, %v735_v54  ;;  %v7602_v59 = vpop.f32.mrb[34].mxu0  ;;  %7675 = vmatprep.mubr.bf16.mxu1 %v940_v48 }
 0x12a   : > { %v747_v60 = vadd.f32 %v7602_v59, %v9316_v61  ;;  %v738_v62 = vpop.f32.mrb[35].mxu0  ;;  %7676 = vmatmul.mubr.bf16.gmra.mrb[28].mxu1 %v941_v44  ;;  %v896_v2 = vmax.f32 %v744_v49, 0.0 }
 0x12b   : > { %v739_v1 = vadd.f32 %v9316_v61, %v738_v62  ;;  %v894_v4 = vmax.f32 %v736_v55, 0.0 }
 0x12c   : > { %v897_v3 = vmax.f32 %v747_v60, 0.0 }
 0x12d   : > { %v895_v7 = vmax.f32 %v739_v1, 0.0 }
 0x12e   : > { %v943_v9 = vpack.c.bf16 %v897_v3, %v896_v2 }
 0x12f   : > { %v7605_v10 = vpop.f32.mrb[36].mxu0  ;;  %v942_v11 = vpack.c.bf16 %v895_v7, %v894_v4 }
 0x130   : > { %v760_v16 = vadd.f32 %v7605_v10, %v9316_v61  ;;  %v751_v17 = vpop.f32.mrb[37].mxu0 }
 0x131   : > { %v752_v18 = vadd.f32 %v9316_v61, %v751_v17  ;;  %v7606_v20 = vpop.f32.mrb[38].mxu0  ;;  %7679 = vmatprep.mubr.bf16.mxu1 %v942_v11 }
 0x132   : > { %v763_v23 = vadd.f32 %v7606_v20, %v9316_v61  ;;  %v754_v25 = vpop.f32.mrb[39].mxu0  ;;  %7680 = vmatmul.mubr.bf16.gmra.mrb[32].mxu1 %v943_v9  ;;  %v900_v29 = vmax.f32 %v760_v16, 0.0 }
 0x133   : > { %v755_v26 = vadd.f32 %v9316_v61, %v754_v25  ;;  %v898_v31 = vmax.f32 %v752_v18, 0.0 }
 0x134   : > { %v901_v30 = vmax.f32 %v763_v23, 0.0 }
 0x135   : > { %v899_v36 = vmax.f32 %v755_v26, 0.0 }
 0x136   : > { %v945_v37 = vpack.c.bf16 %v901_v30, %v900_v29 }
 0x137   : > { %v7609_v38 = vpop.f32.mrb[40].mxu0  ;;  %v944_v41 = vpack.c.bf16 %v899_v36, %v898_v31 }
 0x138   : > { %v776_v44 = vadd.f32 %v7609_v38, %v9316_v61  ;;  %v767_v47 = vpop.f32.mrb[41].mxu0 }
 0x139   : > { %v768_v48 = vadd.f32 %v9316_v61, %v767_v47  ;;  %v7610_v49 = vpop.f32.mrb[42].mxu0  ;;  %7683 = vmatprep.mubr.bf16.mxu1 %v944_v41 }
 0x13a   : > { %v779_v54 = vadd.f32 %v7610_v49, %v9316_v61  ;;  %v770_v55 = vpop.f32.mrb[43].mxu0  ;;  %7684 = vmatmul.mubr.bf16.gmra.mrb[36].mxu1 %v945_v37  ;;  %v904_v60 = vmax.f32 %v776_v44, 0.0 }
 0x13b   : > { %v771_v59 = vadd.f32 %v9316_v61, %v770_v55  ;;  %v902_v1 = vmax.f32 %v768_v48, 0.0 }
 0x13c   : > { %v905_v62 = vmax.f32 %v779_v54, 0.0 }
 0x13d   : > { %v903_v2 = vmax.f32 %v771_v59, 0.0 }
 0x13e   : > { %v947_v3 = vpack.c.bf16 %v905_v62, %v904_v60 }
 0x13f   : > { %v7613_v4 = vpop.f32.mrb[44].mxu0  ;;  %v946_v7 = vpack.c.bf16 %v903_v2, %v902_v1 }
 0x140   : > { %v792_v9 = vadd.f32 %v7613_v4, %v9316_v61  ;;  %v783_v10 = vpop.f32.mrb[45].mxu0 }
 0x141   : > { %v784_v11 = vadd.f32 %v9316_v61, %v783_v10  ;;  %v7614_v16 = vpop.f32.mrb[46].mxu0  ;;  %7687 = vmatprep.mubr.bf16.mxu1 %v946_v7 }
 0x142   : > { %v795_v17 = vadd.f32 %v7614_v16, %v9316_v61  ;;  %v786_v18 = vpop.f32.mrb[47].mxu0  ;;  %7688 = vmatmul.mubr.bf16.gmra.mrb[40].mxu1 %v947_v3  ;;  %v908_v23 = vmax.f32 %v792_v9, 0.0 }
 0x143   : > { %v787_v20 = vadd.f32 %v9316_v61, %v786_v18  ;;  %v906_v26 = vmax.f32 %v784_v11, 0.0 }
 0x144   : > { %v909_v25 = vmax.f32 %v795_v17, 0.0 }
 0x145   : > { %v907_v29 = vmax.f32 %v787_v20, 0.0 }
 0x146   : > { %v949_v30 = vpack.c.bf16 %v909_v25, %v908_v23 }
 0x147   : > { %v7617_v31 = vpop.f32.mrb[48].mxu0  ;;  %v948_v36 = vpack.c.bf16 %v907_v29, %v906_v26 }
 0x148   : > { %v808_v37 = vadd.f32 %v7617_v31, %v9316_v61  ;;  %v799_v38 = vpop.f32.mrb[49].mxu0 }
 0x149   : > { %v800_v41 = vadd.f32 %v9316_v61, %v799_v38  ;;  %v7618_v44 = vpop.f32.mrb[50].mxu0  ;;  %7691 = vmatprep.mubr.bf16.mxu1 %v948_v36 }
 0x14a   : > { %v811_v47 = vadd.f32 %v7618_v44, %v9316_v61  ;;  %v802_v48 = vpop.f32.mrb[51].mxu0  ;;  %7692 = vmatmul.mubr.bf16.gmra.mrb[44].mxu1 %v949_v30  ;;  %v912_v54 = vmax.f32 %v808_v37, 0.0 }
 0x14b   : > { %v803_v49 = vadd.f32 %v9316_v61, %v802_v48  ;;  %v910_v59 = vmax.f32 %v800_v41, 0.0 }
 0x14c   : > { %v913_v55 = vmax.f32 %v811_v47, 0.0 }
 0x14d   : > { %v911_v60 = vmax.f32 %v803_v49, 0.0 }
 0x14e   : > { %v951_v62 = vpack.c.bf16 %v913_v55, %v912_v54 }
 0x14f   : > { %v7621_v1 = vpop.f32.mrb[52].mxu0  ;;  %v950_v2 = vpack.c.bf16 %v911_v60, %v910_v59 }
 0x150   : > { %v824_v3 = vadd.f32 %v7621_v1, %v9316_v61  ;;  %v815_v4 = vpop.f32.mrb[53].mxu0 }
 0x151   : > { %v816_v7 = vadd.f32 %v9316_v61, %v815_v4  ;;  %v7622_v9 = vpop.f32.mrb[54].mxu0  ;;  %7695 = vmatprep.mubr.bf16.mxu1 %v950_v2 }
 0x152   : > { %v827_v10 = vadd.f32 %v7622_v9, %v9316_v61  ;;  %v818_v11 = vpop.f32.mrb[55].mxu0  ;;  %7696 = vmatmul.mubr.bf16.gmra.mrb[48].mxu1 %v951_v62  ;;  %v916_v17 = vmax.f32 %v824_v3, 0.0 }
 0x153   : > { %v819_v16 = vadd.f32 %v9316_v61, %v818_v11  ;;  %v914_v20 = vmax.f32 %v816_v7, 0.0 }
 0x154   : > { %v917_v18 = vmax.f32 %v827_v10, 0.0 }
 0x155   : > { %v915_v23 = vmax.f32 %v819_v16, 0.0 }
 0x156   : > { %v953_v25 = vpack.c.bf16 %v917_v18, %v916_v17 }
 0x157   : > { %v7625_v26 = vpop.f32.mrb[56].mxu0  ;;  %v952_v29 = vpack.c.bf16 %v915_v23, %v914_v20  ;;  %v8935_v23 = vld [vmem:[%s10732_s2 + $0x80] sm:$0xff]  }
 0x158   : > { %v840_v30 = vadd.f32 %v7625_v26, %v9316_v61  ;;  %v831_v31 = vpop.f32.mrb[57].mxu0  ;;  %7791 = vmatprep.subr.bf16.mxu1 %v8935_v23 }
 0x159   : > { %v832_v36 = vadd.f32 %v9316_v61, %v831_v31  ;;  %v7626_v37 = vpop.f32.mrb[58].mxu0  ;;  %7699 = vmatprep.mubr.bf16.mxu1 %v952_v29  ;;  %7792 = vmatpush3.bf16.msra.mxu1 %v8935_v23 }
 0x15a   : > { %v843_v38 = vadd.f32 %v7626_v37, %v9316_v61  ;;  %v834_v41 = vpop.f32.mrb[59].mxu0  ;;  %7700 = vmatmul.mubr.bf16.gmra.mrb[52].mxu1 %v953_v25  ;;  %v920_v47 = vmax.f32 %v840_v30, 0.0  ;;  %v8936_v25 = vld [vmem:[%s10732_s2 + $0x88] sm:$0xff]  }
 0x15b   : > { %v835_v44 = vadd.f32 %v9316_v61, %v834_v41  ;;  %v918_v49 = vmax.f32 %v832_v36, 0.0  ;;  %7793 = vmatprep.subr.bf16.mxu1 %v8936_v25  ;;  %v8937_v41 = vld [vmem:[%s10732_s2 + $0x90] sm:$0xff]  }
 0x15c   : > { %v921_v48 = vmax.f32 %v843_v38, 0.0 }
 0x15d   : > { %v919_v54 = vmax.f32 %v835_v44, 0.0  ;;  %7794 = vmatpush3.bf16.msra.mxu1 %v8936_v25  ;;  %v8938_v44 = vld [vmem:[%s10732_s2 + $0x98] sm:$0xff]  }
 0x15e   : > { %v955_v55 = vpack.c.bf16 %v921_v48, %v920_v47  ;;  %7795 = vmatprep.subr.bf16.mxu1 %v8937_v41 }
 0x15f   : > { %v7629_v59 = vpop.f32.mrb[60].mxu0  ;;  %v954_v60 = vpack.c.bf16 %v919_v54, %v918_v49 }
 0x160   : > { %v856_v62 = vadd.f32 %v7629_v59, %v9316_v61  ;;  %v847_v1 = vpop.f32.mrb[61].mxu0 }
 0x161   : > { %v848_v2 = vadd.f32 %v9316_v61, %v847_v1  ;;  %v7630_v3 = vpop.f32.mrb[62].mxu0  ;;  %7703 = vmatprep.mubr.bf16.mxu1 %v954_v60  ;;  %7796 = vmatpush3.bf16.msra.mxu1 %v8937_v41  ;;  %v8939_v60 = vld [vmem:[%s10732_s2 + $0xa0] sm:$0xff]  }
 0x162   : > { %v859_v4 = vadd.f32 %v7630_v3, %v9316_v61  ;;  %v850_v7 = vpop.f32.mrb[63].mxu0  ;;  %7704 = vmatmul.mubr.bf16.gmra.mrb[56].mxu1 %v955_v55  ;;  %v924_v10 = vmax.f32 %v856_v62, 0.0  ;;  %7797 = vmatprep.subr.bf16.mxu1 %v8938_v44 }
 0x163   : > { %v851_v9 = vadd.f32 %v9316_v61, %v850_v7  ;;  %v922_v16 = vmax.f32 %v848_v2, 0.0  ;;  %v9409_v61 = vld [vmem:[%s10733_s3 + $0x1] ss:$0 sm:$0xff] }
 0x164   : > { %v925_v11 = vmax.f32 %v859_v4, 0.0 }
 0x165   : > { %v923_v17 = vmax.f32 %v851_v9, 0.0  ;;  %7798 = vmatpush3.bf16.msra.mxu1 %v8938_v44 }
 0x166   : > { %v957_v18 = vpack.c.bf16 %v925_v11, %v924_v10  ;;  %7799 = vmatprep.subr.bf16.mxu1 %v8939_v60  ;;  %v8940_v11 = vld [vmem:[%s10732_s2 + $0xa8] sm:$0xff]  }
 0x167   : > { %v956_v20 = vpack.c.bf16 %v923_v17, %v922_v16 }
 0x169   : > { %7707 = vmatprep.mubr.bf16.mxu1 %v956_v20  ;;  %7800 = vmatpush3.bf16.msra.mxu1 %v8939_v60 }
 0x16a   : > { %7708 = vmatmul.mubr.bf16.gmra.mrb[60].mxu1 %v957_v18  ;;  %7801 = vmatprep.subr.bf16.mxu1 %v8940_v11 }
 0x16d   : > { %7802 = vmatpush3.bf16.msra.mxu1 %v8940_v11 }
 0x1c5   : > { %v7649_v26 = vpop.f32.mrb[0].mxu1 }
 0x1c6   : > { %v1070_v29 = vadd.f32 %v7649_v26, %v9409_v61  ;;  %v1061_v30 = vpop.f32.mrb[1].mxu1  ;;  %v8941_v26 = vld [vmem:[%s10732_s2 + $0xb0] sm:$0xff]  }
 0x1c7   : > { %v1062_v31 = vadd.f32 %v9409_v61, %v1061_v30  ;;  %v7650_v36 = vpop.f32.mrb[2].mxu1  ;;  %7803 = vmatprep.subr.bf16.mxu1 %v8941_v26 }
 0x1c8   : > { %v1073_v37 = vadd.f32 %v7650_v36, %v9409_v61  ;;  %v1064_v38 = vpop.f32.mrb[3].mxu1  ;;  %v1318_v48 = vmax.f32 %v1070_v29, 0.0  ;;  %7804 = vmatpush3.bf16.msra.mxu1 %v8941_v26 }
 0x1c9   : > { %v1065_v47 = vadd.f32 %v9409_v61, %v1064_v38  ;;  %v1316_v54 = vmax.f32 %v1062_v31, 0.0 }
 0x1ca   : > { %v1319_v49 = vmax.f32 %v1073_v37, 0.0 }
 0x1cb   : > { %v1317_v55 = vmax.f32 %v1065_v47, 0.0  ;;  %v8942_v47 = vld [vmem:[%s10732_s2 + $0xb8] sm:$0xff]  }
 0x1cc   : > { %v1381_v59 = vpack.c.bf16 %v1319_v49, %v1318_v48  ;;  %7805 = vmatprep.subr.bf16.mxu1 %v8942_v47 }
 0x1cd   : > { %v7653_v62 = vpop.f32.mrb[4].mxu1  ;;  %v1380_v1 = vpack.c.bf16 %v1317_v55, %v1316_v54  ;;  %7806 = vmatpush3.bf16.msra.mxu1 %v8942_v47 }
 0x1ce   : > { %v1086_v2 = vadd.f32 %v7653_v62, %v9409_v61  ;;  %v1077_v3 = vpop.f32.mrb[5].mxu1 }
 0x1cf   : > { %v1078_v4 = vadd.f32 %v9409_v61, %v1077_v3  ;;  %v7654_v7 = vpop.f32.mrb[6].mxu1  ;;  %7727 = vmatprep.mubr.bf16.mxu0 %v1380_v1 }
 0x1d0   : > { %v1089_v9 = vadd.f32 %v7654_v7, %v9409_v61  ;;  %v1080_v10 = vpop.f32.mrb[7].mxu1  ;;  %7728 = vmatmul.mubr.bf16.vlgmr.msra.gmra.mrb[64].mxu0 %v1381_v59  ;;  %v1322_v17 = vmax.f32 %v1086_v2, 0.0 }
 0x1d1   : > { %v1081_v16 = vadd.f32 %v9409_v61, %v1080_v10  ;;  %v1320_v20 = vmax.f32 %v1078_v4, 0.0 }
 0x1d2   : > { %v1323_v18 = vmax.f32 %v1089_v9, 0.0 }
 0x1d3   : > { %v1321_v23 = vmax.f32 %v1081_v16, 0.0 }
 0x1d4   : > { %v1383_v25 = vpack.c.bf16 %v1323_v18, %v1322_v17 }
 0x1d5   : > { %v7657_v29 = vpop.f32.mrb[8].mxu1  ;;  %v1382_v30 = vpack.c.bf16 %v1321_v23, %v1320_v20 }
 0x1d6   : > { %v1102_v31 = vadd.f32 %v7657_v29, %v9409_v61  ;;  %v1093_v36 = vpop.f32.mrb[9].mxu1 }
 0x1d7   : > { %v1094_v37 = vadd.f32 %v9409_v61, %v1093_v36  ;;  %v7658_v38 = vpop.f32.mrb[10].mxu1  ;;  %7731 = vmatprep.mubr.bf16.mxu0 %v1382_v30 }
 0x1d8   : > { %v1105_v41 = vadd.f32 %v7658_v38, %v9409_v61  ;;  %v1096_v44 = vpop.f32.mrb[11].mxu1  ;;  %7732 = vmatmul.mubr.bf16.gmra.mrb[68].mxu0 %v1383_v25  ;;  %v1326_v49 = vmax.f32 %v1102_v31, 0.0 }
 0x1d9   : > { %v1097_v48 = vadd.f32 %v9409_v61, %v1096_v44  ;;  %v1324_v55 = vmax.f32 %v1094_v37, 0.0 }
 0x1da   : > { %v1327_v54 = vmax.f32 %v1105_v41, 0.0 }
 0x1db   : > { %v1325_v59 = vmax.f32 %v1097_v48, 0.0 }
 0x1dc   : > { %v1385_v60 = vpack.c.bf16 %v1327_v54, %v1326_v49 }
 0x1dd   : > { %v7661_v62 = vpop.f32.mrb[12].mxu1  ;;  %v1384_v1 = vpack.c.bf16 %v1325_v59, %v1324_v55 }
 0x1de   : > { %v1118_v2 = vadd.f32 %v7661_v62, %v9409_v61  ;;  %v1109_v3 = vpop.f32.mrb[13].mxu1 }
 0x1df   : > { %v1110_v4 = vadd.f32 %v9409_v61, %v1109_v3  ;;  %v7662_v7 = vpop.f32.mrb[14].mxu1  ;;  %7735 = vmatprep.mubr.bf16.mxu0 %v1384_v1 }
 0x1e0   : > { %v1121_v9 = vadd.f32 %v7662_v7, %v9409_v61  ;;  %v1112_v10 = vpop.f32.mrb[15].mxu1  ;;  %7736 = vmatmul.mubr.bf16.gmra.mrb[72].mxu0 %v1385_v60  ;;  %v1330_v16 = vmax.f32 %v1118_v2, 0.0 }
 0x1e1   : > { %v1113_v11 = vadd.f32 %v9409_v61, %v1112_v10  ;;  %v1328_v18 = vmax.f32 %v1110_v4, 0.0 }
 0x1e2   : > { %v1331_v17 = vmax.f32 %v1121_v9, 0.0 }
 0x1e3   : > { %v1329_v20 = vmax.f32 %v1113_v11, 0.0 }
 0x1e4   : > { %v1387_v23 = vpack.c.bf16 %v1331_v17, %v1330_v16 }
 0x1e5   : > { %v7665_v25 = vpop.f32.mrb[16].mxu1  ;;  %v1386_v26 = vpack.c.bf16 %v1329_v20, %v1328_v18 }
 0x1e6   : > { %v1134_v29 = vadd.f32 %v7665_v25, %v9409_v61  ;;  %v1125_v30 = vpop.f32.mrb[17].mxu1 }
 0x1e7   : > { %v1126_v31 = vadd.f32 %v9409_v61, %v1125_v30  ;;  %v7666_v36 = vpop.f32.mrb[18].mxu1  ;;  %7739 = vmatprep.mubr.bf16.mxu0 %v1386_v26 }
 0x1e8   : > { %v1137_v37 = vadd.f32 %v7666_v36, %v9409_v61  ;;  %v1128_v38 = vpop.f32.mrb[19].mxu1  ;;  %7740 = vmatmul.mubr.bf16.gmra.mrb[76].mxu0 %v1387_v23  ;;  %v1334_v44 = vmax.f32 %v1134_v29, 0.0 }
 0x1e9   : > { %v1129_v41 = vadd.f32 %v9409_v61, %v1128_v38  ;;  %v1332_v48 = vmax.f32 %v1126_v31, 0.0 }
 0x1ea   : > { %v1335_v47 = vmax.f32 %v1137_v37, 0.0 }
 0x1eb   : > { %v1333_v49 = vmax.f32 %v1129_v41, 0.0 }
 0x1ec   : > { %v1389_v54 = vpack.c.bf16 %v1335_v47, %v1334_v44 }
 0x1ed   : > { %v7669_v55 = vpop.f32.mrb[20].mxu1  ;;  %v1388_v59 = vpack.c.bf16 %v1333_v49, %v1332_v48 }
 0x1ee   : > { %v1150_v60 = vadd.f32 %v7669_v55, %v9409_v61  ;;  %v1141_v62 = vpop.f32.mrb[21].mxu1 }
 0x1ef   : > { %v1142_v1 = vadd.f32 %v9409_v61, %v1141_v62  ;;  %v7670_v2 = vpop.f32.mrb[22].mxu1  ;;  %7743 = vmatprep.mubr.bf16.mxu0 %v1388_v59 }
 0x1f0   : > { %v1153_v3 = vadd.f32 %v7670_v2, %v9409_v61  ;;  %v1144_v4 = vpop.f32.mrb[23].mxu1  ;;  %7744 = vmatmul.mubr.bf16.gmra.mrb[80].mxu0 %v1389_v54  ;;  %v1338_v9 = vmax.f32 %v1150_v60, 0.0 }
 0x1f1   : > { %v1145_v7 = vadd.f32 %v9409_v61, %v1144_v4  ;;  %v1336_v11 = vmax.f32 %v1142_v1, 0.0 }
 0x1f2   : > { %v1339_v10 = vmax.f32 %v1153_v3, 0.0 }
 0x1f3   : > { %v1337_v16 = vmax.f32 %v1145_v7, 0.0 }
 0x1f4   : > { %v1391_v17 = vpack.c.bf16 %v1339_v10, %v1338_v9 }
 0x1f5   : > { %v7673_v18 = vpop.f32.mrb[24].mxu1  ;;  %v1390_v20 = vpack.c.bf16 %v1337_v16, %v1336_v11 }
 0x1f6   : > { %v1166_v23 = vadd.f32 %v7673_v18, %v9409_v61  ;;  %v1157_v25 = vpop.f32.mrb[25].mxu1 }
 0x1f7   : > { %v1158_v26 = vadd.f32 %v9409_v61, %v1157_v25  ;;  %v7674_v29 = vpop.f32.mrb[26].mxu1  ;;  %7747 = vmatprep.mubr.bf16.mxu0 %v1390_v20 }
 0x1f8   : > { %v1169_v30 = vadd.f32 %v7674_v29, %v9409_v61  ;;  %v1160_v31 = vpop.f32.mrb[27].mxu1  ;;  %7748 = vmatmul.mubr.bf16.gmra.mrb[84].mxu0 %v1391_v17  ;;  %v1342_v37 = vmax.f32 %v1166_v23, 0.0 }
 0x1f9   : > { %v1161_v36 = vadd.f32 %v9409_v61, %v1160_v31  ;;  %v1340_v41 = vmax.f32 %v1158_v26, 0.0 }
 0x1fa   : > { %v1343_v38 = vmax.f32 %v1169_v30, 0.0 }
 0x1fb   : > { %v1341_v44 = vmax.f32 %v1161_v36, 0.0 }
 0x1fc   : > { %v1393_v47 = vpack.c.bf16 %v1343_v38, %v1342_v37 }
 0x1fd   : > { %v7677_v48 = vpop.f32.mrb[28].mxu1  ;;  %v1392_v49 = vpack.c.bf16 %v1341_v44, %v1340_v41 }
 0x1fe   : > { %v1182_v54 = vadd.f32 %v7677_v48, %v9409_v61  ;;  %v1173_v55 = vpop.f32.mrb[29].mxu1 }
 0x1ff   : > { %v1174_v59 = vadd.f32 %v9409_v61, %v1173_v55  ;;  %v7678_v60 = vpop.f32.mrb[30].mxu1  ;;  %7751 = vmatprep.mubr.bf16.mxu0 %v1392_v49 }
 0x200   : > { %v1185_v62 = vadd.f32 %v7678_v60, %v9409_v61  ;;  %v1176_v1 = vpop.f32.mrb[31].mxu1  ;;  %7752 = vmatmul.mubr.bf16.gmra.mrb[88].mxu0 %v1393_v47  ;;  %v1346_v3 = vmax.f32 %v1182_v54, 0.0 }
 0x201   : > { %v1177_v2 = vadd.f32 %v9409_v61, %v1176_v1  ;;  %v1344_v7 = vmax.f32 %v1174_v59, 0.0 }
 0x202   : > { %v1347_v4 = vmax.f32 %v1185_v62, 0.0 }
 0x203   : > { %v1345_v9 = vmax.f32 %v1177_v2, 0.0 }
 0x204   : > { %v1395_v10 = vpack.c.bf16 %v1347_v4, %v1346_v3 }
 0x205   : > { %v7681_v11 = vpop.f32.mrb[32].mxu1  ;;  %v1394_v16 = vpack.c.bf16 %v1345_v9, %v1344_v7 }
 0x206   : > { %v1198_v17 = vadd.f32 %v7681_v11, %v9409_v61  ;;  %v1189_v18 = vpop.f32.mrb[33].mxu1 }
 0x207   : > { %v1190_v20 = vadd.f32 %v9409_v61, %v1189_v18  ;;  %v7682_v23 = vpop.f32.mrb[34].mxu1  ;;  %7755 = vmatprep.mubr.bf16.mxu0 %v1394_v16 }
 0x208   : > { %v1201_v25 = vadd.f32 %v7682_v23, %v9409_v61  ;;  %v1192_v26 = vpop.f32.mrb[35].mxu1  ;;  %7756 = vmatmul.mubr.bf16.gmra.mrb[92].mxu0 %v1395_v10  ;;  %v1350_v30 = vmax.f32 %v1198_v17, 0.0 }
 0x209   : > { %v1193_v29 = vadd.f32 %v9409_v61, %v1192_v26  ;;  %v1348_v36 = vmax.f32 %v1190_v20, 0.0 }
 0x20a   : > { %v1351_v31 = vmax.f32 %v1201_v25, 0.0 }
 0x20b   : > { %v1349_v37 = vmax.f32 %v1193_v29, 0.0 }
 0x20c   : > { %v1397_v38 = vpack.c.bf16 %v1351_v31, %v1350_v30 }
 0x20d   : > { %v7685_v41 = vpop.f32.mrb[36].mxu1  ;;  %v1396_v44 = vpack.c.bf16 %v1349_v37, %v1348_v36 }
 0x20e   : > { %v1214_v47 = vadd.f32 %v7685_v41, %v9409_v61  ;;  %v1205_v48 = vpop.f32.mrb[37].mxu1 }
 0x20f   : > { %v1206_v49 = vadd.f32 %v9409_v61, %v1205_v48  ;;  %v7686_v54 = vpop.f32.mrb[38].mxu1  ;;  %7759 = vmatprep.mubr.bf16.mxu0 %v1396_v44 }
 0x210   : > { %v1217_v55 = vadd.f32 %v7686_v54, %v9409_v61  ;;  %v1208_v59 = vpop.f32.mrb[39].mxu1  ;;  %7760 = vmatmul.mubr.bf16.gmra.mrb[96].mxu0 %v1397_v38  ;;  %v1354_v62 = vmax.f32 %v1214_v47, 0.0 }
 0x211   : > { %v1209_v60 = vadd.f32 %v9409_v61, %v1208_v59  ;;  %v1352_v2 = vmax.f32 %v1206_v49, 0.0 }
 0x212   : > { %v1355_v1 = vmax.f32 %v1217_v55, 0.0 }
 0x213   : > { %v1353_v3 = vmax.f32 %v1209_v60, 0.0 }
 0x214   : > { %v1399_v4 = vpack.c.bf16 %v1355_v1, %v1354_v62 }
 0x215   : > { %v7689_v7 = vpop.f32.mrb[40].mxu1  ;;  %v1398_v9 = vpack.c.bf16 %v1353_v3, %v1352_v2 }
 0x216   : > { %v1230_v10 = vadd.f32 %v7689_v7, %v9409_v61  ;;  %v1221_v11 = vpop.f32.mrb[41].mxu1 }
 0x217   : > { %v1222_v16 = vadd.f32 %v9409_v61, %v1221_v11  ;;  %v7690_v17 = vpop.f32.mrb[42].mxu1  ;;  %7763 = vmatprep.mubr.bf16.mxu0 %v1398_v9 }
 0x218   : > { %v1233_v18 = vadd.f32 %v7690_v17, %v9409_v61  ;;  %v1224_v20 = vpop.f32.mrb[43].mxu1  ;;  %7764 = vmatmul.mubr.bf16.gmra.mrb[100].mxu0 %v1399_v4  ;;  %v1358_v25 = vmax.f32 %v1230_v10, 0.0 }
 0x219   : > { %v1225_v23 = vadd.f32 %v9409_v61, %v1224_v20  ;;  %v1356_v29 = vmax.f32 %v1222_v16, 0.0 }
 0x21a   : > { %v1359_v26 = vmax.f32 %v1233_v18, 0.0 }
 0x21b   : > { %v1357_v30 = vmax.f32 %v1225_v23, 0.0 }
 0x21c   : > { %v1401_v31 = vpack.c.bf16 %v1359_v26, %v1358_v25 }
 0x21d   : > { %v7693_v36 = vpop.f32.mrb[44].mxu1  ;;  %v1400_v37 = vpack.c.bf16 %v1357_v30, %v1356_v29 }
 0x21e   : > { %v1246_v38 = vadd.f32 %v7693_v36, %v9409_v61  ;;  %v1237_v41 = vpop.f32.mrb[45].mxu1 }
 0x21f   : > { %v1238_v44 = vadd.f32 %v9409_v61, %v1237_v41  ;;  %v7694_v47 = vpop.f32.mrb[46].mxu1  ;;  %7767 = vmatprep.mubr.bf16.mxu0 %v1400_v37 }
 0x220   : > { %v1249_v48 = vadd.f32 %v7694_v47, %v9409_v61  ;;  %v1240_v49 = vpop.f32.mrb[47].mxu1  ;;  %7768 = vmatmul.mubr.bf16.gmra.mrb[104].mxu0 %v1401_v31  ;;  %v1362_v55 = vmax.f32 %v1246_v38, 0.0 }
 0x221   : > { %v1241_v54 = vadd.f32 %v9409_v61, %v1240_v49  ;;  %v1360_v60 = vmax.f32 %v1238_v44, 0.0 }
 0x222   : > { %v1363_v59 = vmax.f32 %v1249_v48, 0.0 }
 0x223   : > { %v1361_v62 = vmax.f32 %v1241_v54, 0.0 }
 0x224   : > { %v1403_v1 = vpack.c.bf16 %v1363_v59, %v1362_v55 }
 0x225   : > { %v7697_v2 = vpop.f32.mrb[48].mxu1  ;;  %v1402_v3 = vpack.c.bf16 %v1361_v62, %v1360_v60 }
 0x226   : > { %v1262_v4 = vadd.f32 %v7697_v2, %v9409_v61  ;;  %v1253_v7 = vpop.f32.mrb[49].mxu1 }
 0x227   : > { %v1254_v9 = vadd.f32 %v9409_v61, %v1253_v7  ;;  %v7698_v10 = vpop.f32.mrb[50].mxu1  ;;  %7771 = vmatprep.mubr.bf16.mxu0 %v1402_v3 }
 0x228   : > { %v1265_v11 = vadd.f32 %v7698_v10, %v9409_v61  ;;  %v1256_v16 = vpop.f32.mrb[51].mxu1  ;;  %7772 = vmatmul.mubr.bf16.gmra.mrb[108].mxu0 %v1403_v1  ;;  %v1366_v18 = vmax.f32 %v1262_v4, 0.0 }
 0x229   : > { %v1257_v17 = vadd.f32 %v9409_v61, %v1256_v16  ;;  %v1364_v23 = vmax.f32 %v1254_v9, 0.0 }
 0x22a   : > { %v1367_v20 = vmax.f32 %v1265_v11, 0.0 }
 0x22b   : > { %v1365_v25 = vmax.f32 %v1257_v17, 0.0 }
 0x22c   : > { %v1405_v26 = vpack.c.bf16 %v1367_v20, %v1366_v18 }
 0x22d   : > { %v7701_v29 = vpop.f32.mrb[52].mxu1  ;;  %v1404_v30 = vpack.c.bf16 %v1365_v25, %v1364_v23 }
 0x22e   : > { %v1278_v31 = vadd.f32 %v7701_v29, %v9409_v61  ;;  %v1269_v36 = vpop.f32.mrb[53].mxu1 }
 0x22f   : > { %v1270_v37 = vadd.f32 %v9409_v61, %v1269_v36  ;;  %v7702_v38 = vpop.f32.mrb[54].mxu1  ;;  %7775 = vmatprep.mubr.bf16.mxu0 %v1404_v30 }
 0x230   : > { %v1281_v41 = vadd.f32 %v7702_v38, %v9409_v61  ;;  %v1272_v44 = vpop.f32.mrb[55].mxu1  ;;  %7776 = vmatmul.mubr.bf16.gmra.mrb[112].mxu0 %v1405_v26  ;;  %v1370_v48 = vmax.f32 %v1278_v31, 0.0 }
 0x231   : > { %v1273_v47 = vadd.f32 %v9409_v61, %v1272_v44  ;;  %v1368_v54 = vmax.f32 %v1270_v37, 0.0 }
 0x232   : > { %v1371_v49 = vmax.f32 %v1281_v41, 0.0 }
 0x233   : > { %v1369_v55 = vmax.f32 %v1273_v47, 0.0 }
 0x234   : > { %v1407_v59 = vpack.c.bf16 %v1371_v49, %v1370_v48 }
 0x235   : > { %v7705_v60 = vpop.f32.mrb[56].mxu1  ;;  %v1406_v62 = vpack.c.bf16 %v1369_v55, %v1368_v54  ;;  %v8943_v55 = vld [vmem:[%s10732_s2 + $0xc0] sm:$0xff]  }
 0x236   : > { %v1294_v1 = vadd.f32 %v7705_v60, %v9409_v61  ;;  %v1285_v2 = vpop.f32.mrb[57].mxu1  ;;  %7871 = vmatprep.subr.bf16.mxu0 %v8943_v55 }
 0x237   : > { %v1286_v3 = vadd.f32 %v9409_v61, %v1285_v2  ;;  %v7706_v4 = vpop.f32.mrb[58].mxu1  ;;  %7779 = vmatprep.mubr.bf16.mxu0 %v1406_v62  ;;  %7872 = vmatpush3.bf16.msra.mxu0 %v8943_v55 }
 0x238   : > { %v1297_v7 = vadd.f32 %v7706_v4, %v9409_v61  ;;  %v1288_v9 = vpop.f32.mrb[59].mxu1  ;;  %7780 = vmatmul.mubr.bf16.gmra.mrb[116].mxu0 %v1407_v59  ;;  %v1374_v11 = vmax.f32 %v1294_v1, 0.0  ;;  %v8944_v59 = vld [vmem:[%s10732_s2 + $0xc8] sm:$0xff]  }
 0x239   : > { %v1289_v10 = vadd.f32 %v9409_v61, %v1288_v9  ;;  %v1372_v17 = vmax.f32 %v1286_v3, 0.0  ;;  %7873 = vmatprep.subr.bf16.mxu0 %v8944_v59  ;;  %v8945_v9 = vld [vmem:[%s10732_s2 + $0xd0] sm:$0xff]  }
 0x23a   : > { %v1375_v16 = vmax.f32 %v1297_v7, 0.0 }
 0x23b   : > { %v1373_v18 = vmax.f32 %v1289_v10, 0.0  ;;  %7874 = vmatpush3.bf16.msra.mxu0 %v8944_v59  ;;  %v8946_v10 = vld [vmem:[%s10732_s2 + $0xd8] sm:$0xff]  }
 0x23c   : > { %v1409_v20 = vpack.c.bf16 %v1375_v16, %v1374_v11  ;;  %7875 = vmatprep.subr.bf16.mxu0 %v8945_v9 }
 0x23d   : > { %v7709_v23 = vpop.f32.mrb[60].mxu1  ;;  %v1408_v25 = vpack.c.bf16 %v1373_v18, %v1372_v17 }
 0x23e   : > { %v1310_v26 = vadd.f32 %v7709_v23, %v9409_v61  ;;  %v1301_v29 = vpop.f32.mrb[61].mxu1 }
 0x23f   : > { %v1302_v30 = vadd.f32 %v9409_v61, %v1301_v29  ;;  %v7710_v31 = vpop.f32.mrb[62].mxu1  ;;  %7783 = vmatprep.mubr.bf16.mxu0 %v1408_v25  ;;  %7876 = vmatpush3.bf16.msra.mxu0 %v8945_v9  ;;  %v8947_v25 = vld [vmem:[%s10732_s2 + $0xe0] sm:$0xff]  }
 0x240   : > { %v1313_v36 = vadd.f32 %v7710_v31, %v9409_v61  ;;  %v1304_v37 = vpop.f32.mrb[63].mxu1  ;;  %7784 = vmatmul.mubr.bf16.gmra.mrb[120].mxu0 %v1409_v20  ;;  %v1378_v41 = vmax.f32 %v1310_v26, 0.0  ;;  %7877 = vmatprep.subr.bf16.mxu0 %v8946_v10 }
 0x241   : > { %v1305_v38 = vadd.f32 %v9409_v61, %v1304_v37  ;;  %v1376_v47 = vmax.f32 %v1302_v30, 0.0  ;;  %v9502_v61 = vld [vmem:[%s10733_s3 + $0x2] ss:$0 sm:$0xff] }
 0x242   : > { %v1379_v44 = vmax.f32 %v1313_v36, 0.0 }
 0x243   : > { %v1377_v48 = vmax.f32 %v1305_v38, 0.0  ;;  %7878 = vmatpush3.bf16.msra.mxu0 %v8946_v10 }
 0x244   : > { %v1411_v49 = vpack.c.bf16 %v1379_v44, %v1378_v41  ;;  %7879 = vmatprep.subr.bf16.mxu0 %v8947_v25  ;;  %v8948_v44 = vld [vmem:[%s10732_s2 + $0xe8] sm:$0xff]  }
 0x245   : > { %v1410_v54 = vpack.c.bf16 %v1377_v48, %v1376_v47 }
 0x247   : > { %7787 = vmatprep.mubr.bf16.mxu0 %v1410_v54  ;;  %7880 = vmatpush3.bf16.msra.mxu0 %v8947_v25 }
 0x248   : > { %7788 = vmatmul.mubr.bf16.gmra.mrb[124].mxu0 %v1411_v49  ;;  %7881 = vmatprep.subr.bf16.mxu0 %v8948_v44 }
 0x24b   : > { %7882 = vmatpush3.bf16.msra.mxu0 %v8948_v44 }
 0x2a3   : > { %v7729_v60 = vpop.f32.mrb[64].mxu0 }
 0x2a4   : > { %v1525_v62 = vadd.f32 %v7729_v60, %v9502_v61  ;;  %v1516_v1 = vpop.f32.mrb[65].mxu0  ;;  %v8949_v60 = vld [vmem:[%s10732_s2 + $0xf0] sm:$0xff]  }
 0x2a5   : > { %v1517_v2 = vadd.f32 %v9502_v61, %v1516_v1  ;;  %v7730_v3 = vpop.f32.mrb[66].mxu0  ;;  %7883 = vmatprep.subr.bf16.mxu0 %v8949_v60 }
 0x2a6   : > { %v1528_v4 = vadd.f32 %v7730_v3, %v9502_v61  ;;  %v1519_v7 = vpop.f32.mrb[67].mxu0  ;;  %v1773_v16 = vmax.f32 %v1525_v62, 0.0  ;;  %7884 = vmatpush3.bf16.msra.mxu0 %v8949_v60 }
 0x2a7   : > { %v1520_v11 = vadd.f32 %v9502_v61, %v1519_v7  ;;  %v1771_v18 = vmax.f32 %v1517_v2, 0.0 }
 0x2a8   : > { %v1774_v17 = vmax.f32 %v1528_v4, 0.0 }
 0x2a9   : > { %v1772_v20 = vmax.f32 %v1520_v11, 0.0  ;;  %v8950_v11 = vld [vmem:[%s10732_s2 + $0xf8] sm:$0xff]  }
 0x2aa   : > { %v1836_v23 = vpack.c.bf16 %v1774_v17, %v1773_v16  ;;  %7885 = vmatprep.subr.bf16.mxu0 %v8950_v11 }
 0x2ab   : > { %v7733_v26 = vpop.f32.mrb[68].mxu0  ;;  %v1835_v29 = vpack.c.bf16 %v1772_v20, %v1771_v18  ;;  %7886 = vmatpush3.bf16.msra.mxu0 %v8950_v11 }
 0x2ac   : > { %v1541_v30 = vadd.f32 %v7733_v26, %v9502_v61  ;;  %v1532_v31 = vpop.f32.mrb[69].mxu0 }
 0x2ad   : > { %v1533_v36 = vadd.f32 %v9502_v61, %v1532_v31  ;;  %v7734_v37 = vpop.f32.mrb[70].mxu0  ;;  %7807 = vmatprep.mubr.bf16.mxu1 %v1835_v29 }
 0x2ae   : > { %v1544_v38 = vadd.f32 %v7734_v37, %v9502_v61  ;;  %v1535_v41 = vpop.f32.mrb[71].mxu0  ;;  %7808 = vmatmul.mubr.bf16.vlgmr.msra.gmra.mrb[64].mxu1 %v1836_v23  ;;  %v1777_v48 = vmax.f32 %v1541_v30, 0.0 }
 0x2af   : > { %v1536_v47 = vadd.f32 %v9502_v61, %v1535_v41  ;;  %v1775_v54 = vmax.f32 %v1533_v36, 0.0 }
 0x2b0   : > { %v1778_v49 = vmax.f32 %v1544_v38, 0.0 }
 0x2b1   : > { %v1776_v55 = vmax.f32 %v1536_v47, 0.0 }
 0x2b2   : > { %v1838_v59 = vpack.c.bf16 %v1778_v49, %v1777_v48 }
 0x2b3   : > { %v7737_v62 = vpop.f32.mrb[72].mxu0  ;;  %v1837_v1 = vpack.c.bf16 %v1776_v55, %v1775_v54 }
 0x2b4   : > { %v1557_v2 = vadd.f32 %v7737_v62, %v9502_v61  ;;  %v1548_v3 = vpop.f32.mrb[73].mxu0 }
 0x2b5   : > { %v1549_v4 = vadd.f32 %v9502_v61, %v1548_v3  ;;  %v7738_v7 = vpop.f32.mrb[74].mxu0  ;;  %7811 = vmatprep.mubr.bf16.mxu1 %v1837_v1 }
 0x2b6   : > { %v1560_v9 = vadd.f32 %v7738_v7, %v9502_v61  ;;  %v1551_v10 = vpop.f32.mrb[75].mxu0  ;;  %7812 = vmatmul.mubr.bf16.gmra.mrb[68].mxu1 %v1838_v59  ;;  %v1781_v17 = vmax.f32 %v1557_v2, 0.0 }
 0x2b7   : > { %v1552_v16 = vadd.f32 %v9502_v61, %v1551_v10  ;;  %v1779_v20 = vmax.f32 %v1549_v4, 0.0 }
 0x2b8   : > { %v1782_v18 = vmax.f32 %v1560_v9, 0.0 }
 0x2b9   : > { %v1780_v23 = vmax.f32 %v1552_v16, 0.0 }
 0x2ba   : > { %v1840_v25 = vpack.c.bf16 %v1782_v18, %v1781_v17 }
 0x2bb   : > { %v7741_v26 = vpop.f32.mrb[76].mxu0  ;;  %v1839_v29 = vpack.c.bf16 %v1780_v23, %v1779_v20 }
 0x2bc   : > { %v1573_v30 = vadd.f32 %v7741_v26, %v9502_v61  ;;  %v1564_v31 = vpop.f32.mrb[77].mxu0 }
 0x2bd   : > { %v1565_v36 = vadd.f32 %v9502_v61, %v1564_v31  ;;  %v7742_v37 = vpop.f32.mrb[78].mxu0  ;;  %7815 = vmatprep.mubr.bf16.mxu1 %v1839_v29 }
 0x2be   : > { %v1576_v38 = vadd.f32 %v7742_v37, %v9502_v61  ;;  %v1567_v41 = vpop.f32.mrb[79].mxu0  ;;  %7816 = vmatmul.mubr.bf16.gmra.mrb[72].mxu1 %v1840_v25  ;;  %v1785_v47 = vmax.f32 %v1573_v30, 0.0 }
 0x2bf   : > { %v1568_v44 = vadd.f32 %v9502_v61, %v1567_v41  ;;  %v1783_v49 = vmax.f32 %v1565_v36, 0.0 }
 0x2c0   : > { %v1786_v48 = vmax.f32 %v1576_v38, 0.0 }
 0x2c1   : > { %v1784_v54 = vmax.f32 %v1568_v44, 0.0 }
 0x2c2   : > { %v1842_v55 = vpack.c.bf16 %v1786_v48, %v1785_v47 }
 0x2c3   : > { %v7745_v59 = vpop.f32.mrb[80].mxu0  ;;  %v1841_v60 = vpack.c.bf16 %v1784_v54, %v1783_v49 }
 0x2c4   : > { %v1589_v62 = vadd.f32 %v7745_v59, %v9502_v61  ;;  %v1580_v1 = vpop.f32.mrb[81].mxu0 }
 0x2c5   : > { %v1581_v2 = vadd.f32 %v9502_v61, %v1580_v1  ;;  %v7746_v3 = vpop.f32.mrb[82].mxu0  ;;  %7819 = vmatprep.mubr.bf16.mxu1 %v1841_v60 }
 0x2c6   : > { %v1592_v4 = vadd.f32 %v7746_v3, %v9502_v61  ;;  %v1583_v7 = vpop.f32.mrb[83].mxu0  ;;  %7820 = vmatmul.mubr.bf16.gmra.mrb[76].mxu1 %v1842_v55  ;;  %v1789_v10 = vmax.f32 %v1589_v62, 0.0 }
 0x2c7   : > { %v1584_v9 = vadd.f32 %v9502_v61, %v1583_v7  ;;  %v1787_v16 = vmax.f32 %v1581_v2, 0.0 }
 0x2c8   : > { %v1790_v11 = vmax.f32 %v1592_v4, 0.0 }
 0x2c9   : > { %v1788_v17 = vmax.f32 %v1584_v9, 0.0 }
 0x2ca   : > { %v1844_v18 = vpack.c.bf16 %v1790_v11, %v1789_v10 }
 0x2cb   : > { %v7749_v20 = vpop.f32.mrb[84].mxu0  ;;  %v1843_v23 = vpack.c.bf16 %v1788_v17, %v1787_v16 }
 0x2cc   : > { %v1605_v25 = vadd.f32 %v7749_v20, %v9502_v61  ;;  %v1596_v26 = vpop.f32.mrb[85].mxu0 }
 0x2cd   : > { %v1597_v29 = vadd.f32 %v9502_v61, %v1596_v26  ;;  %v7750_v30 = vpop.f32.mrb[86].mxu0  ;;  %7823 = vmatprep.mubr.bf16.mxu1 %v1843_v23 }
 0x2ce   : > { %v1608_v31 = vadd.f32 %v7750_v30, %v9502_v61  ;;  %v1599_v36 = vpop.f32.mrb[87].mxu0  ;;  %7824 = vmatmul.mubr.bf16.gmra.mrb[80].mxu1 %v1844_v18  ;;  %v1793_v38 = vmax.f32 %v1605_v25, 0.0 }
 0x2cf   : > { %v1600_v37 = vadd.f32 %v9502_v61, %v1599_v36  ;;  %v1791_v44 = vmax.f32 %v1597_v29, 0.0 }
 0x2d0   : > { %v1794_v41 = vmax.f32 %v1608_v31, 0.0 }
 0x2d1   : > { %v1792_v47 = vmax.f32 %v1600_v37, 0.0 }
 0x2d2   : > { %v1846_v48 = vpack.c.bf16 %v1794_v41, %v1793_v38 }
 0x2d3   : > { %v7753_v49 = vpop.f32.mrb[88].mxu0  ;;  %v1845_v54 = vpack.c.bf16 %v1792_v47, %v1791_v44 }
 0x2d4   : > { %v1621_v55 = vadd.f32 %v7753_v49, %v9502_v61  ;;  %v1612_v59 = vpop.f32.mrb[89].mxu0 }
 0x2d5   : > { %v1613_v60 = vadd.f32 %v9502_v61, %v1612_v59  ;;  %v7754_v62 = vpop.f32.mrb[90].mxu0  ;;  %7827 = vmatprep.mubr.bf16.mxu1 %v1845_v54 }
 0x2d6   : > { %v1624_v1 = vadd.f32 %v7754_v62, %v9502_v61  ;;  %v1615_v2 = vpop.f32.mrb[91].mxu0  ;;  %7828 = vmatmul.mubr.bf16.gmra.mrb[84].mxu1 %v1846_v48  ;;  %v1797_v4 = vmax.f32 %v1621_v55, 0.0 }
 0x2d7   : > { %v1616_v3 = vadd.f32 %v9502_v61, %v1615_v2  ;;  %v1795_v9 = vmax.f32 %v1613_v60, 0.0 }
 0x2d8   : > { %v1798_v7 = vmax.f32 %v1624_v1, 0.0 }
 0x2d9   : > { %v1796_v10 = vmax.f32 %v1616_v3, 0.0 }
 0x2da   : > { %v1848_v11 = vpack.c.bf16 %v1798_v7, %v1797_v4 }
 0x2db   : > { %v7757_v16 = vpop.f32.mrb[92].mxu0  ;;  %v1847_v17 = vpack.c.bf16 %v1796_v10, %v1795_v9 }
 0x2dc   : > { %v1637_v18 = vadd.f32 %v7757_v16, %v9502_v61  ;;  %v1628_v20 = vpop.f32.mrb[93].mxu0 }
 0x2dd   : > { %v1629_v23 = vadd.f32 %v9502_v61, %v1628_v20  ;;  %v7758_v25 = vpop.f32.mrb[94].mxu0  ;;  %7831 = vmatprep.mubr.bf16.mxu1 %v1847_v17 }
 0x2de   : > { %v1640_v26 = vadd.f32 %v7758_v25, %v9502_v61  ;;  %v1631_v29 = vpop.f32.mrb[95].mxu0  ;;  %7832 = vmatmul.mubr.bf16.gmra.mrb[88].mxu1 %v1848_v11  ;;  %v1801_v31 = vmax.f32 %v1637_v18, 0.0 }
 0x2df   : > { %v1632_v30 = vadd.f32 %v9502_v61, %v1631_v29  ;;  %v1799_v37 = vmax.f32 %v1629_v23, 0.0 }
 0x2e0   : > { %v1802_v36 = vmax.f32 %v1640_v26, 0.0 }
 0x2e1   : > { %v1800_v38 = vmax.f32 %v1632_v30, 0.0 }
 0x2e2   : > { %v1850_v41 = vpack.c.bf16 %v1802_v36, %v1801_v31 }
 0x2e3   : > { %v7761_v44 = vpop.f32.mrb[96].mxu0  ;;  %v1849_v47 = vpack.c.bf16 %v1800_v38, %v1799_v37 }
 0x2e4   : > { %v1653_v48 = vadd.f32 %v7761_v44, %v9502_v61  ;;  %v1644_v49 = vpop.f32.mrb[97].mxu0 }
 0x2e5   : > { %v1645_v54 = vadd.f32 %v9502_v61, %v1644_v49  ;;  %v7762_v55 = vpop.f32.mrb[98].mxu0  ;;  %7835 = vmatprep.mubr.bf16.mxu1 %v1849_v47 }
 0x2e6   : > { %v1656_v59 = vadd.f32 %v7762_v55, %v9502_v61  ;;  %v1647_v60 = vpop.f32.mrb[99].mxu0  ;;  %7836 = vmatmul.mubr.bf16.gmra.mrb[92].mxu1 %v1850_v41  ;;  %v1805_v1 = vmax.f32 %v1653_v48, 0.0 }
 0x2e7   : > { %v1648_v62 = vadd.f32 %v9502_v61, %v1647_v60  ;;  %v1803_v3 = vmax.f32 %v1645_v54, 0.0 }
 0x2e8   : > { %v1806_v2 = vmax.f32 %v1656_v59, 0.0 }
 0x2e9   : > { %v1804_v4 = vmax.f32 %v1648_v62, 0.0 }
 0x2ea   : > { %v1852_v7 = vpack.c.bf16 %v1806_v2, %v1805_v1 }
 0x2eb   : > { %v7765_v9 = vpop.f32.mrb[100].mxu0  ;;  %v1851_v10 = vpack.c.bf16 %v1804_v4, %v1803_v3 }
 0x2ec   : > { %v1669_v11 = vadd.f32 %v7765_v9, %v9502_v61  ;;  %v1660_v16 = vpop.f32.mrb[101].mxu0 }
 0x2ed   : > { %v1661_v17 = vadd.f32 %v9502_v61, %v1660_v16  ;;  %v7766_v18 = vpop.f32.mrb[102].mxu0  ;;  %7839 = vmatprep.mubr.bf16.mxu1 %v1851_v10 }
 0x2ee   : > { %v1672_v20 = vadd.f32 %v7766_v18, %v9502_v61  ;;  %v1663_v23 = vpop.f32.mrb[103].mxu0  ;;  %7840 = vmatmul.mubr.bf16.gmra.mrb[96].mxu1 %v1852_v7  ;;  %v1809_v26 = vmax.f32 %v1669_v11, 0.0 }
 0x2ef   : > { %v1664_v25 = vadd.f32 %v9502_v61, %v1663_v23  ;;  %v1807_v30 = vmax.f32 %v1661_v17, 0.0 }
 0x2f0   : > { %v1810_v29 = vmax.f32 %v1672_v20, 0.0 }
 0x2f1   : > { %v1808_v31 = vmax.f32 %v1664_v25, 0.0 }
 0x2f2   : > { %v1854_v36 = vpack.c.bf16 %v1810_v29, %v1809_v26 }
 0x2f3   : > { %v7769_v37 = vpop.f32.mrb[104].mxu0  ;;  %v1853_v38 = vpack.c.bf16 %v1808_v31, %v1807_v30 }
 0x2f4   : > { %v1685_v41 = vadd.f32 %v7769_v37, %v9502_v61  ;;  %v1676_v44 = vpop.f32.mrb[105].mxu0 }
 0x2f5   : > { %v1677_v47 = vadd.f32 %v9502_v61, %v1676_v44  ;;  %v7770_v48 = vpop.f32.mrb[106].mxu0  ;;  %7843 = vmatprep.mubr.bf16.mxu1 %v1853_v38 }
 0x2f6   : > { %v1688_v49 = vadd.f32 %v7770_v48, %v9502_v61  ;;  %v1679_v54 = vpop.f32.mrb[107].mxu0  ;;  %7844 = vmatmul.mubr.bf16.gmra.mrb[100].mxu1 %v1854_v36  ;;  %v1813_v59 = vmax.f32 %v1685_v41, 0.0 }
 0x2f7   : > { %v1680_v55 = vadd.f32 %v9502_v61, %v1679_v54  ;;  %v1811_v62 = vmax.f32 %v1677_v47, 0.0 }
 0x2f8   : > { %v1814_v60 = vmax.f32 %v1688_v49, 0.0 }
 0x2f9   : > { %v1812_v1 = vmax.f32 %v1680_v55, 0.0 }
 0x2fa   : > { %v1856_v2 = vpack.c.bf16 %v1814_v60, %v1813_v59 }
 0x2fb   : > { %v7773_v3 = vpop.f32.mrb[108].mxu0  ;;  %v1855_v4 = vpack.c.bf16 %v1812_v1, %v1811_v62 }
 0x2fc   : > { %v1701_v7 = vadd.f32 %v7773_v3, %v9502_v61  ;;  %v1692_v9 = vpop.f32.mrb[109].mxu0 }
 0x2fd   : > { %v1693_v10 = vadd.f32 %v9502_v61, %v1692_v9  ;;  %v7774_v11 = vpop.f32.mrb[110].mxu0  ;;  %7847 = vmatprep.mubr.bf16.mxu1 %v1855_v4 }
 0x2fe   : > { %v1704_v16 = vadd.f32 %v7774_v11, %v9502_v61  ;;  %v1695_v17 = vpop.f32.mrb[111].mxu0  ;;  %7848 = vmatmul.mubr.bf16.gmra.mrb[104].mxu1 %v1856_v2  ;;  %v1817_v20 = vmax.f32 %v1701_v7, 0.0 }
 0x2ff   : > { %v1696_v18 = vadd.f32 %v9502_v61, %v1695_v17  ;;  %v1815_v25 = vmax.f32 %v1693_v10, 0.0 }
 0x300   : > { %v1818_v23 = vmax.f32 %v1704_v16, 0.0 }
 0x301   : > { %v1816_v26 = vmax.f32 %v1696_v18, 0.0 }
 0x302   : > { %v1858_v29 = vpack.c.bf16 %v1818_v23, %v1817_v20 }
 0x303   : > { %v7777_v30 = vpop.f32.mrb[112].mxu0  ;;  %v1857_v31 = vpack.c.bf16 %v1816_v26, %v1815_v25 }
 0x304   : > { %v1717_v36 = vadd.f32 %v7777_v30, %v9502_v61  ;;  %v1708_v37 = vpop.f32.mrb[113].mxu0 }
 0x305   : > { %v1709_v38 = vadd.f32 %v9502_v61, %v1708_v37  ;;  %v7778_v41 = vpop.f32.mrb[114].mxu0  ;;  %7851 = vmatprep.mubr.bf16.mxu1 %v1857_v31 }
 0x306   : > { %v1720_v44 = vadd.f32 %v7778_v41, %v9502_v61  ;;  %v1711_v47 = vpop.f32.mrb[115].mxu0  ;;  %7852 = vmatmul.mubr.bf16.gmra.mrb[108].mxu1 %v1858_v29  ;;  %v1821_v49 = vmax.f32 %v1717_v36, 0.0 }
 0x307   : > { %v1712_v48 = vadd.f32 %v9502_v61, %v1711_v47  ;;  %v1819_v55 = vmax.f32 %v1709_v38, 0.0 }
 0x308   : > { %v1822_v54 = vmax.f32 %v1720_v44, 0.0 }
 0x309   : > { %v1820_v59 = vmax.f32 %v1712_v48, 0.0 }
 0x30a   : > { %v1860_v60 = vpack.c.bf16 %v1822_v54, %v1821_v49 }
 0x30b   : > { %v7781_v62 = vpop.f32.mrb[116].mxu0  ;;  %v1859_v1 = vpack.c.bf16 %v1820_v59, %v1819_v55 }
 0x30c   : > { %v1733_v2 = vadd.f32 %v7781_v62, %v9502_v61  ;;  %v1724_v3 = vpop.f32.mrb[117].mxu0 }
 0x30d   : > { %v1725_v4 = vadd.f32 %v9502_v61, %v1724_v3  ;;  %v7782_v7 = vpop.f32.mrb[118].mxu0  ;;  %7855 = vmatprep.mubr.bf16.mxu1 %v1859_v1 }
 0x30e   : > { %v1736_v9 = vadd.f32 %v7782_v7, %v9502_v61  ;;  %v1727_v10 = vpop.f32.mrb[119].mxu0  ;;  %7856 = vmatmul.mubr.bf16.gmra.mrb[112].mxu1 %v1860_v60  ;;  %v1825_v16 = vmax.f32 %v1733_v2, 0.0 }
 0x30f   : > { %v1728_v11 = vadd.f32 %v9502_v61, %v1727_v10  ;;  %v1823_v18 = vmax.f32 %v1725_v4, 0.0 }
 0x310   : > { %v1826_v17 = vmax.f32 %v1736_v9, 0.0 }
 0x311   : > { %v1824_v20 = vmax.f32 %v1728_v11, 0.0 }
 0x312   : > { %v1862_v23 = vpack.c.bf16 %v1826_v17, %v1825_v16 }
 0x313   : > { %v7785_v25 = vpop.f32.mrb[120].mxu0  ;;  %v1861_v26 = vpack.c.bf16 %v1824_v20, %v1823_v18  ;;  %v8951_v20 = vld [vmem:[%s10732_s2 + $0x100] sm:$0xff]  }
 0x314   : > { %v1749_v29 = vadd.f32 %v7785_v25, %v9502_v61  ;;  %v1740_v30 = vpop.f32.mrb[121].mxu0  ;;  %7951 = vmatprep.subr.bf16.mxu1 %v8951_v20 }
 0x315   : > { %v1741_v31 = vadd.f32 %v9502_v61, %v1740_v30  ;;  %v7786_v36 = vpop.f32.mrb[122].mxu0  ;;  %7859 = vmatprep.mubr.bf16.mxu1 %v1861_v26  ;;  %7952 = vmatpush3.bf16.msra.mxu1 %v8951_v20 }
 0x316   : > { %v1752_v37 = vadd.f32 %v7786_v36, %v9502_v61  ;;  %v1743_v38 = vpop.f32.mrb[123].mxu0  ;;  %7860 = vmatmul.mubr.bf16.gmra.mrb[116].mxu1 %v1862_v23  ;;  %v1829_v44 = vmax.f32 %v1749_v29, 0.0  ;;  %v8952_v23 = vld [vmem:[%s10732_s2 + $0x108] sm:$0xff]  }
 0x317   : > { %v1744_v41 = vadd.f32 %v9502_v61, %v1743_v38  ;;  %v1827_v48 = vmax.f32 %v1741_v31, 0.0  ;;  %7953 = vmatprep.subr.bf16.mxu1 %v8952_v23  ;;  %v8953_v38 = vld [vmem:[%s10732_s2 + $0x110] sm:$0xff]  }
 0x318   : > { %v1830_v47 = vmax.f32 %v1752_v37, 0.0 }
 0x319   : > { %v1828_v49 = vmax.f32 %v1744_v41, 0.0  ;;  %7954 = vmatpush3.bf16.msra.mxu1 %v8952_v23  ;;  %v8954_v41 = vld [vmem:[%s10732_s2 + $0x118] sm:$0xff]  }
 0x31a   : > { %v1864_v54 = vpack.c.bf16 %v1830_v47, %v1829_v44  ;;  %7955 = vmatprep.subr.bf16.mxu1 %v8953_v38 }
 0x31b   : > { %v7789_v55 = vpop.f32.mrb[124].mxu0  ;;  %v1863_v59 = vpack.c.bf16 %v1828_v49, %v1827_v48 }
 0x31c   : > { %v1765_v60 = vadd.f32 %v7789_v55, %v9502_v61  ;;  %v1756_v62 = vpop.f32.mrb[125].mxu0 }
 0x31d   : > { %v1757_v1 = vadd.f32 %v9502_v61, %v1756_v62  ;;  %v7790_v2 = vpop.f32.mrb[126].mxu0  ;;  %7863 = vmatprep.mubr.bf16.mxu1 %v1863_v59  ;;  %7956 = vmatpush3.bf16.msra.mxu1 %v8953_v38  ;;  %v8955_v59 = vld [vmem:[%s10732_s2 + $0x120] sm:$0xff]  }
 0x31e   : > { %v1768_v3 = vadd.f32 %v7790_v2, %v9502_v61  ;;  %v1759_v4 = vpop.f32.mrb[127].mxu0  ;;  %7864 = vmatmul.mubr.bf16.gmra.mrb[120].mxu1 %v1864_v54  ;;  %v1833_v9 = vmax.f32 %v1765_v60, 0.0  ;;  %7957 = vmatprep.subr.bf16.mxu1 %v8954_v41 }
 0x31f   : > { %v1760_v7 = vadd.f32 %v9502_v61, %v1759_v4  ;;  %v1831_v11 = vmax.f32 %v1757_v1, 0.0  ;;  %v9595_v61 = vld [vmem:[%s10733_s3 + $0x3] ss:$0 sm:$0xff] }
 0x320   : > { %v1834_v10 = vmax.f32 %v1768_v3, 0.0 }
 0x321   : > { %v1832_v16 = vmax.f32 %v1760_v7, 0.0  ;;  %7958 = vmatpush3.bf16.msra.mxu1 %v8954_v41 }
 0x322   : > { %v1866_v17 = vpack.c.bf16 %v1834_v10, %v1833_v9  ;;  %7959 = vmatprep.subr.bf16.mxu1 %v8955_v59  ;;  %v8956_v10 = vld [vmem:[%s10732_s2 + $0x128] sm:$0xff]  }
 0x323   : > { %v1865_v18 = vpack.c.bf16 %v1832_v16, %v1831_v11 }
 0x325   : > { %7867 = vmatprep.mubr.bf16.mxu1 %v1865_v18  ;;  %7960 = vmatpush3.bf16.msra.mxu1 %v8955_v59 }
 0x326   : > { %7868 = vmatmul.mubr.bf16.gmra.mrb[124].mxu1 %v1866_v17  ;;  %7961 = vmatprep.subr.bf16.mxu1 %v8956_v10 }
 0x329   : > { %7962 = vmatpush3.bf16.msra.mxu1 %v8956_v10 }
 0x381   : > { %v7809_v25 = vpop.f32.mrb[64].mxu1 }
 0x382   : > { %v1980_v26 = vadd.f32 %v7809_v25, %v9595_v61  ;;  %v1971_v29 = vpop.f32.mrb[65].mxu1  ;;  %v8957_v25 = vld [vmem:[%s10732_s2 + $0x130] sm:$0xff]  }
 0x383   : > { %v1972_v30 = vadd.f32 %v9595_v61, %v1971_v29  ;;  %v7810_v31 = vpop.f32.mrb[66].mxu1  ;;  %7963 = vmatprep.subr.bf16.mxu1 %v8957_v25 }
 0x384   : > { %v1983_v36 = vadd.f32 %v7810_v31, %v9595_v61  ;;  %v1974_v37 = vpop.f32.mrb[67].mxu1  ;;  %v2228_v47 = vmax.f32 %v1980_v26, 0.0  ;;  %7964 = vmatpush3.bf16.msra.mxu1 %v8957_v25 }
 0x385   : > { %v1975_v44 = vadd.f32 %v9595_v61, %v1974_v37  ;;  %v2226_v49 = vmax.f32 %v1972_v30, 0.0 }
 0x386   : > { %v2229_v48 = vmax.f32 %v1983_v36, 0.0 }
 0x387   : > { %v2227_v54 = vmax.f32 %v1975_v44, 0.0  ;;  %v8958_v44 = vld [vmem:[%s10732_s2 + $0x138] sm:$0xff]  }
 0x388   : > { %v2291_v55 = vpack.c.bf16 %v2229_v48, %v2228_v47  ;;  %7965 = vmatprep.subr.bf16.mxu1 %v8958_v44 }
 0x389   : > { %v2290_v60 = vpack.c.bf16 %v2227_v54, %v2226_v49  ;;  %v7813_v62 = vpop.f32.mrb[68].mxu1  ;;  %7966 = vmatpush3.bf16.msra.mxu1 %v8958_v44 }
 0x38a   : > { %v1996_v1 = vadd.f32 %v7813_v62, %v9595_v61  ;;  %v1987_v2 = vpop.f32.mrb[69].mxu1 }
 0x38b   : > { %v1988_v3 = vadd.f32 %v9595_v61, %v1987_v2  ;;  %v7814_v4 = vpop.f32.mrb[70].mxu1  ;;  %7887 = vmatprep.mubr.bf16.mxu0 %v2290_v60 }
 0x38c   : > { %v1999_v7 = vadd.f32 %v7814_v4, %v9595_v61  ;;  %v1990_v9 = vpop.f32.mrb[71].mxu1  ;;  %7888 = vmatmul.mubr.bf16.vlgmr.msra.gmra.mrb[128].mxu0 %v2291_v55  ;;  %v2232_v16 = vmax.f32 %v1996_v1, 0.0 }
 0x38d   : > { %v1991_v11 = vadd.f32 %v9595_v61, %v1990_v9  ;;  %v2230_v18 = vmax.f32 %v1988_v3, 0.0 }
 0x38e   : > { %v2233_v17 = vmax.f32 %v1999_v7, 0.0 }
 0x38f   : > { %v2231_v20 = vmax.f32 %v1991_v11, 0.0 }
 0x390   : > { %v2293_v23 = vpack.c.bf16 %v2233_v17, %v2232_v16 }
 0x391   : > { %v2292_v26 = vpack.c.bf16 %v2231_v20, %v2230_v18  ;;  %v7817_v29 = vpop.f32.mrb[72].mxu1 }
 0x392   : > { %v2012_v30 = vadd.f32 %v7817_v29, %v9595_v61  ;;  %v2003_v31 = vpop.f32.mrb[73].mxu1 }
 0x393   : > { %v2004_v36 = vadd.f32 %v9595_v61, %v2003_v31  ;;  %v7818_v37 = vpop.f32.mrb[74].mxu1  ;;  %7891 = vmatprep.mubr.bf16.mxu0 %v2292_v26 }
 0x394   : > { %v2015_v38 = vadd.f32 %v7818_v37, %v9595_v61  ;;  %v2006_v41 = vpop.f32.mrb[75].mxu1  ;;  %7892 = vmatmul.mubr.bf16.gmra.mrb[132].mxu0 %v2293_v23  ;;  %v2236_v48 = vmax.f32 %v2012_v30, 0.0 }
 0x395   : > { %v2007_v47 = vadd.f32 %v9595_v61, %v2006_v41  ;;  %v2234_v54 = vmax.f32 %v2004_v36, 0.0 }
 0x396   : > { %v2237_v49 = vmax.f32 %v2015_v38, 0.0 }
 0x397   : > { %v2235_v55 = vmax.f32 %v2007_v47, 0.0 }
 0x398   : > { %v2295_v59 = vpack.c.bf16 %v2237_v49, %v2236_v48 }
 0x399   : > { %v2294_v60 = vpack.c.bf16 %v2235_v55, %v2234_v54  ;;  %v7821_v62 = vpop.f32.mrb[76].mxu1 }
 0x39a   : > { %v2028_v1 = vadd.f32 %v7821_v62, %v9595_v61  ;;  %v2019_v2 = vpop.f32.mrb[77].mxu1 }
 0x39b   : > { %v2020_v3 = vadd.f32 %v9595_v61, %v2019_v2  ;;  %v7822_v4 = vpop.f32.mrb[78].mxu1  ;;  %7895 = vmatprep.mubr.bf16.mxu0 %v2294_v60 }
 0x39c   : > { %v2031_v7 = vadd.f32 %v7822_v4, %v9595_v61  ;;  %v2022_v9 = vpop.f32.mrb[79].mxu1  ;;  %7896 = vmatmul.mubr.bf16.gmra.mrb[136].mxu0 %v2295_v59  ;;  %v2240_v11 = vmax.f32 %v2028_v1, 0.0 }
 0x39d   : > { %v2023_v10 = vadd.f32 %v9595_v61, %v2022_v9  ;;  %v2238_v17 = vmax.f32 %v2020_v3, 0.0 }
 0x39e   : > { %v2241_v16 = vmax.f32 %v2031_v7, 0.0 }
 0x39f   : > { %v2239_v18 = vmax.f32 %v2023_v10, 0.0 }
 0x3a0   : > { %v2297_v20 = vpack.c.bf16 %v2241_v16, %v2240_v11 }
 0x3a1   : > { %v2296_v23 = vpack.c.bf16 %v2239_v18, %v2238_v17  ;;  %v7825_v25 = vpop.f32.mrb[80].mxu1 }
 0x3a2   : > { %v2044_v26 = vadd.f32 %v7825_v25, %v9595_v61  ;;  %v2035_v29 = vpop.f32.mrb[81].mxu1 }
 0x3a3   : > { %v2036_v30 = vadd.f32 %v9595_v61, %v2035_v29  ;;  %v7826_v31 = vpop.f32.mrb[82].mxu1  ;;  %7899 = vmatprep.mubr.bf16.mxu0 %v2296_v23 }
 0x3a4   : > { %v2047_v36 = vadd.f32 %v7826_v31, %v9595_v61  ;;  %v2038_v37 = vpop.f32.mrb[83].mxu1  ;;  %7900 = vmatmul.mubr.bf16.gmra.mrb[140].mxu0 %v2297_v20  ;;  %v2244_v41 = vmax.f32 %v2044_v26, 0.0 }
 0x3a5   : > { %v2039_v38 = vadd.f32 %v9595_v61, %v2038_v37  ;;  %v2242_v47 = vmax.f32 %v2036_v30, 0.0 }
 0x3a6   : > { %v2245_v44 = vmax.f32 %v2047_v36, 0.0 }
 0x3a7   : > { %v2243_v48 = vmax.f32 %v2039_v38, 0.0 }
 0x3a8   : > { %v2299_v49 = vpack.c.bf16 %v2245_v44, %v2244_v41 }
 0x3a9   : > { %v2298_v54 = vpack.c.bf16 %v2243_v48, %v2242_v47  ;;  %v7829_v55 = vpop.f32.mrb[84].mxu1 }
 0x3aa   : > { %v2060_v59 = vadd.f32 %v7829_v55, %v9595_v61  ;;  %v2051_v60 = vpop.f32.mrb[85].mxu1 }
 0x3ab   : > { %v2052_v62 = vadd.f32 %v9595_v61, %v2051_v60  ;;  %v7830_v1 = vpop.f32.mrb[86].mxu1  ;;  %7903 = vmatprep.mubr.bf16.mxu0 %v2298_v54 }
 0x3ac   : > { %v2063_v2 = vadd.f32 %v7830_v1, %v9595_v61  ;;  %v2054_v3 = vpop.f32.mrb[87].mxu1  ;;  %7904 = vmatmul.mubr.bf16.gmra.mrb[144].mxu0 %v2299_v49  ;;  %v2248_v7 = vmax.f32 %v2060_v59, 0.0 }
 0x3ad   : > { %v2055_v4 = vadd.f32 %v9595_v61, %v2054_v3  ;;  %v2246_v10 = vmax.f32 %v2052_v62, 0.0 }
 0x3ae   : > { %v2249_v9 = vmax.f32 %v2063_v2, 0.0 }
 0x3af   : > { %v2247_v11 = vmax.f32 %v2055_v4, 0.0 }
 0x3b0   : > { %v2301_v16 = vpack.c.bf16 %v2249_v9, %v2248_v7 }
 0x3b1   : > { %v2300_v17 = vpack.c.bf16 %v2247_v11, %v2246_v10  ;;  %v7833_v18 = vpop.f32.mrb[88].mxu1 }
 0x3b2   : > { %v2076_v20 = vadd.f32 %v7833_v18, %v9595_v61  ;;  %v2067_v23 = vpop.f32.mrb[89].mxu1 }
 0x3b3   : > { %v2068_v25 = vadd.f32 %v9595_v61, %v2067_v23  ;;  %v7834_v26 = vpop.f32.mrb[90].mxu1  ;;  %7907 = vmatprep.mubr.bf16.mxu0 %v2300_v17 }
 0x3b4   : > { %v2079_v29 = vadd.f32 %v7834_v26, %v9595_v61  ;;  %v2070_v30 = vpop.f32.mrb[91].mxu1  ;;  %7908 = vmatmul.mubr.bf16.gmra.mrb[148].mxu0 %v2301_v16  ;;  %v2252_v36 = vmax.f32 %v2076_v20, 0.0 }
 0x3b5   : > { %v2071_v31 = vadd.f32 %v9595_v61, %v2070_v30  ;;  %v2250_v38 = vmax.f32 %v2068_v25, 0.0 }
 0x3b6   : > { %v2253_v37 = vmax.f32 %v2079_v29, 0.0 }
 0x3b7   : > { %v2251_v41 = vmax.f32 %v2071_v31, 0.0 }
 0x3b8   : > { %v2303_v44 = vpack.c.bf16 %v2253_v37, %v2252_v36 }
 0x3b9   : > { %v2302_v47 = vpack.c.bf16 %v2251_v41, %v2250_v38  ;;  %v7837_v48 = vpop.f32.mrb[92].mxu1 }
 0x3ba   : > { %v2092_v49 = vadd.f32 %v7837_v48, %v9595_v61  ;;  %v2083_v54 = vpop.f32.mrb[93].mxu1 }
 0x3bb   : > { %v2084_v55 = vadd.f32 %v9595_v61, %v2083_v54  ;;  %v7838_v59 = vpop.f32.mrb[94].mxu1  ;;  %7911 = vmatprep.mubr.bf16.mxu0 %v2302_v47 }
 0x3bc   : > { %v2095_v60 = vadd.f32 %v7838_v59, %v9595_v61  ;;  %v2086_v62 = vpop.f32.mrb[95].mxu1  ;;  %7912 = vmatmul.mubr.bf16.gmra.mrb[152].mxu0 %v2303_v44  ;;  %v2256_v2 = vmax.f32 %v2092_v49, 0.0 }
 0x3bd   : > { %v2087_v1 = vadd.f32 %v9595_v61, %v2086_v62  ;;  %v2254_v4 = vmax.f32 %v2084_v55, 0.0 }
 0x3be   : > { %v2257_v3 = vmax.f32 %v2095_v60, 0.0 }
 0x3bf   : > { %v2255_v7 = vmax.f32 %v2087_v1, 0.0 }
 0x3c0   : > { %v2305_v9 = vpack.c.bf16 %v2257_v3, %v2256_v2 }
 0x3c1   : > { %v2304_v10 = vpack.c.bf16 %v2255_v7, %v2254_v4  ;;  %v7841_v11 = vpop.f32.mrb[96].mxu1 }
 0x3c2   : > { %v2108_v16 = vadd.f32 %v7841_v11, %v9595_v61  ;;  %v2099_v17 = vpop.f32.mrb[97].mxu1 }
 0x3c3   : > { %v2100_v18 = vadd.f32 %v9595_v61, %v2099_v17  ;;  %v7842_v20 = vpop.f32.mrb[98].mxu1  ;;  %7915 = vmatprep.mubr.bf16.mxu0 %v2304_v10 }
 0x3c4   : > { %v2111_v23 = vadd.f32 %v7842_v20, %v9595_v61  ;;  %v2102_v25 = vpop.f32.mrb[99].mxu1  ;;  %7916 = vmatmul.mubr.bf16.gmra.mrb[156].mxu0 %v2305_v9  ;;  %v2260_v29 = vmax.f32 %v2108_v16, 0.0 }
 0x3c5   : > { %v2103_v26 = vadd.f32 %v9595_v61, %v2102_v25  ;;  %v2258_v31 = vmax.f32 %v2100_v18, 0.0 }
 0x3c6   : > { %v2261_v30 = vmax.f32 %v2111_v23, 0.0 }
 0x3c7   : > { %v2259_v36 = vmax.f32 %v2103_v26, 0.0 }
 0x3c8   : > { %v2307_v37 = vpack.c.bf16 %v2261_v30, %v2260_v29 }
 0x3c9   : > { %v2306_v38 = vpack.c.bf16 %v2259_v36, %v2258_v31  ;;  %v7845_v41 = vpop.f32.mrb[100].mxu1 }
 0x3ca   : > { %v2124_v44 = vadd.f32 %v7845_v41, %v9595_v61  ;;  %v2115_v47 = vpop.f32.mrb[101].mxu1 }
 0x3cb   : > { %v2116_v48 = vadd.f32 %v9595_v61, %v2115_v47  ;;  %v7846_v49 = vpop.f32.mrb[102].mxu1  ;;  %7919 = vmatprep.mubr.bf16.mxu0 %v2306_v38 }
 0x3cc   : > { %v2127_v54 = vadd.f32 %v7846_v49, %v9595_v61  ;;  %v2118_v55 = vpop.f32.mrb[103].mxu1  ;;  %7920 = vmatmul.mubr.bf16.gmra.mrb[160].mxu0 %v2307_v37  ;;  %v2264_v60 = vmax.f32 %v2124_v44, 0.0 }
 0x3cd   : > { %v2119_v59 = vadd.f32 %v9595_v61, %v2118_v55  ;;  %v2262_v1 = vmax.f32 %v2116_v48, 0.0 }
 0x3ce   : > { %v2265_v62 = vmax.f32 %v2127_v54, 0.0 }
 0x3cf   : > { %v2263_v2 = vmax.f32 %v2119_v59, 0.0 }
 0x3d0   : > { %v2309_v3 = vpack.c.bf16 %v2265_v62, %v2264_v60 }
 0x3d1   : > { %v2308_v4 = vpack.c.bf16 %v2263_v2, %v2262_v1  ;;  %v7849_v7 = vpop.f32.mrb[104].mxu1 }
 0x3d2   : > { %v2140_v9 = vadd.f32 %v7849_v7, %v9595_v61  ;;  %v2131_v10 = vpop.f32.mrb[105].mxu1 }
 0x3d3   : > { %v2132_v11 = vadd.f32 %v9595_v61, %v2131_v10  ;;  %v7850_v16 = vpop.f32.mrb[106].mxu1  ;;  %7923 = vmatprep.mubr.bf16.mxu0 %v2308_v4 }
 0x3d4   : > { %v2143_v17 = vadd.f32 %v7850_v16, %v9595_v61  ;;  %v2134_v18 = vpop.f32.mrb[107].mxu1  ;;  %7924 = vmatmul.mubr.bf16.gmra.mrb[164].mxu0 %v2309_v3  ;;  %v2268_v23 = vmax.f32 %v2140_v9, 0.0 }
 0x3d5   : > { %v2135_v20 = vadd.f32 %v9595_v61, %v2134_v18  ;;  %v2266_v26 = vmax.f32 %v2132_v11, 0.0 }
 0x3d6   : > { %v2269_v25 = vmax.f32 %v2143_v17, 0.0 }
 0x3d7   : > { %v2267_v29 = vmax.f32 %v2135_v20, 0.0 }
 0x3d8   : > { %v2311_v30 = vpack.c.bf16 %v2269_v25, %v2268_v23 }
 0x3d9   : > { %v2310_v31 = vpack.c.bf16 %v2267_v29, %v2266_v26  ;;  %v7853_v36 = vpop.f32.mrb[108].mxu1 }
 0x3da   : > { %v2156_v37 = vadd.f32 %v7853_v36, %v9595_v61  ;;  %v2147_v38 = vpop.f32.mrb[109].mxu1 }
 0x3db   : > { %v2148_v41 = vadd.f32 %v9595_v61, %v2147_v38  ;;  %v7854_v44 = vpop.f32.mrb[110].mxu1  ;;  %7927 = vmatprep.mubr.bf16.mxu0 %v2310_v31 }
 0x3dc   : > { %v2159_v47 = vadd.f32 %v7854_v44, %v9595_v61  ;;  %v2150_v48 = vpop.f32.mrb[111].mxu1  ;;  %7928 = vmatmul.mubr.bf16.gmra.mrb[168].mxu0 %v2311_v30  ;;  %v2272_v54 = vmax.f32 %v2156_v37, 0.0 }
 0x3dd   : > { %v2151_v49 = vadd.f32 %v9595_v61, %v2150_v48  ;;  %v2270_v59 = vmax.f32 %v2148_v41, 0.0 }
 0x3de   : > { %v2273_v55 = vmax.f32 %v2159_v47, 0.0 }
 0x3df   : > { %v2271_v60 = vmax.f32 %v2151_v49, 0.0  ;;  %v8959_v49 = vld [vmem:[%s10731_s1 + $0x8] sm:$0x3f]  }
 0x3e0   : > { %v2313_v62 = vpack.c.bf16 %v2273_v55, %v2272_v54  ;;  %8908 = vmatprep.subr.msk.bf16.mxu1 %vm569_vm0, %v8959_v49 }
 0x3e1   : > { %v2312_v1 = vpack.c.bf16 %v2271_v60, %v2270_v59  ;;  %v7857_v2 = vpop.f32.mrb[112].mxu1 }
 0x3e2   : > { %v2172_v3 = vadd.f32 %v7857_v2, %v9595_v61  ;;  %v2163_v4 = vpop.f32.mrb[113].mxu1 }
 0x3e3   : > { %v2164_v7 = vadd.f32 %v9595_v61, %v2163_v4  ;;  %v7858_v9 = vpop.f32.mrb[114].mxu1  ;;  %7931 = vmatprep.mubr.bf16.mxu0 %v2312_v1 }
 0x3e4   : > { %v2175_v10 = vadd.f32 %v7858_v9, %v9595_v61  ;;  %v2166_v11 = vpop.f32.mrb[115].mxu1  ;;  %7932 = vmatmul.mubr.bf16.gmra.mrb[172].mxu0 %v2313_v62  ;;  %v2276_v17 = vmax.f32 %v2172_v3, 0.0 }
 0x3e5   : > { %v2167_v16 = vadd.f32 %v9595_v61, %v2166_v11  ;;  %v2274_v20 = vmax.f32 %v2164_v7, 0.0 }
 0x3e6   : > { %v2277_v18 = vmax.f32 %v2175_v10, 0.0 }
 0x3e7   : > { %v2275_v23 = vmax.f32 %v2167_v16, 0.0 }
 0x3e8   : > { %v2315_v25 = vpack.c.bf16 %v2277_v18, %v2276_v17 }
 0x3e9   : > { %v2314_v26 = vpack.c.bf16 %v2275_v23, %v2274_v20  ;;  %v7861_v29 = vpop.f32.mrb[116].mxu1 }
 0x3ea   : > { %v2188_v30 = vadd.f32 %v7861_v29, %v9595_v61  ;;  %v2179_v31 = vpop.f32.mrb[117].mxu1 }
 0x3eb   : > { %v2180_v36 = vadd.f32 %v9595_v61, %v2179_v31  ;;  %v7862_v37 = vpop.f32.mrb[118].mxu1  ;;  %7935 = vmatprep.mubr.bf16.mxu0 %v2314_v26 }
 0x3ec   : > { %v2191_v38 = vadd.f32 %v7862_v37, %v9595_v61  ;;  %v2182_v41 = vpop.f32.mrb[119].mxu1  ;;  %7936 = vmatmul.mubr.bf16.gmra.mrb[176].mxu0 %v2315_v25  ;;  %v2280_v47 = vmax.f32 %v2188_v30, 0.0 }
 0x3ed   : > { %v2183_v44 = vadd.f32 %v9595_v61, %v2182_v41  ;;  %v2278_v54 = vmax.f32 %v2180_v36, 0.0 }
 0x3ee   : > { %v2281_v48 = vmax.f32 %v2191_v38, 0.0 }
 0x3ef   : > { %v2279_v55 = vmax.f32 %v2183_v44, 0.0 }
 0x3f0   : > { %v2317_v59 = vpack.c.bf16 %v2281_v48, %v2280_v47 }
 0x3f1   : > { %v2316_v60 = vpack.c.bf16 %v2279_v55, %v2278_v54  ;;  %v7865_v62 = vpop.f32.mrb[120].mxu1 }
 0x3f2   : > { %v2204_v1 = vadd.f32 %v7865_v62, %v9595_v61  ;;  %v2195_v2 = vpop.f32.mrb[121].mxu1 }
 0x3f3   : > { %v2196_v3 = vadd.f32 %v9595_v61, %v2195_v2  ;;  %v7866_v4 = vpop.f32.mrb[122].mxu1  ;;  %7939 = vmatprep.mubr.bf16.mxu0 %v2316_v60 }
 0x3f4   : > { %v2207_v7 = vadd.f32 %v7866_v4, %v9595_v61  ;;  %v2198_v9 = vpop.f32.mrb[123].mxu1  ;;  %7940 = vmatmul.mubr.bf16.gmra.mrb[180].mxu0 %v2317_v59  ;;  %v2284_v11 = vmax.f32 %v2204_v1, 0.0  ;;  %v9686_v59 = vld [vmem:[%s10733_s3 + $0x4] ss:$0 sm:$0xff] }
 0x3f5   : > { %v2199_v10 = vadd.f32 %v9595_v61, %v2198_v9  ;;  %v2282_v17 = vmax.f32 %v2196_v3, 0.0 }
 0x3f6   : > { %v2285_v16 = vmax.f32 %v2207_v7, 0.0 }
 0x3f7   : > { %v2283_v18 = vmax.f32 %v2199_v10, 0.0 }
 0x3f8   : > { %v2319_v20 = vpack.c.bf16 %v2285_v16, %v2284_v11 }
 0x3f9   : > { %v2318_v23 = vpack.c.bf16 %v2283_v18, %v2282_v17  ;;  %v7869_v25 = vpop.f32.mrb[124].mxu1 }
 0x3fa   : > { %v2220_v26 = vadd.f32 %v7869_v25, %v9595_v61  ;;  %v2211_v29 = vpop.f32.mrb[125].mxu1 }
 0x3fb   : > { %v2212_v30 = vadd.f32 %v9595_v61, %v2211_v29  ;;  %v7870_v31 = vpop.f32.mrb[126].mxu1  ;;  %7943 = vmatprep.mubr.bf16.mxu0 %v2318_v23 }
 0x3fc   : > { %v2223_v36 = vadd.f32 %v7870_v31, %v9595_v61  ;;  %v2214_v37 = vpop.f32.mrb[127].mxu1  ;;  %7944 = vmatmul.mubr.bf16.gmra.mrb[184].mxu0 %v2319_v20  ;;  %v2288_v41 = vmax.f32 %v2220_v26, 0.0  ;;  %v3145_v26 = vsel %vm569_vm0, %v8959_v49, 0 }
 0x3fd   : > { %v2215_v38 = vadd.f32 %v9595_v61, %v2214_v37  ;;  %v2286_v47 = vmax.f32 %v2212_v30, 0.0 }
 0x3fe   : > { %v2289_v44 = vmax.f32 %v2223_v36, 0.0 }
 0x3ff   : > { %v2287_v48 = vmax.f32 %v2215_v38, 0.0 }
 0x400   : > { %v2321_v54 = vpack.c.bf16 %v2289_v44, %v2288_v41 }
 0x401   : > { %v2320_v55 = vpack.c.bf16 %v2287_v48, %v2286_v47 }
 0x403   : > { %7947 = vmatprep.mubr.bf16.mxu0 %v2320_v55 }
 0x404   : > { %7948 = vmatmul.mubr.bf16.gmra.mrb[188].mxu0 %v2321_v54 }
 0x45f   : > { %v7889_v60 = vpop.f32.mrb[128].mxu0 }
 0x460   : > { %v2435_v62 = vadd.f32 %v7889_v60, %v9686_v59  ;;  %v2426_v1 = vpop.f32.mrb[129].mxu0 }
 0x461   : > { %v2427_v2 = vadd.f32 %v9686_v59, %v2426_v1  ;;  %v7890_v61 = vpop.f32.mrb[130].mxu0 }
 0x462   : > { %v2438_v3 = vadd.f32 %v7890_v61, %v9686_v59  ;;  %v2429_v4 = vpop.f32.mrb[131].mxu0  ;;  %v2683_v9 = vmax.f32 %v2435_v62, 0.0 }
 0x463   : > { %v2430_v7 = vadd.f32 %v9686_v59, %v2429_v4  ;;  %v2681_v11 = vmax.f32 %v2427_v2, 0.0 }
 0x464   : > { %v2684_v10 = vmax.f32 %v2438_v3, 0.0 }
 0x465   : > { %v2682_v16 = vmax.f32 %v2430_v7, 0.0 }
 0x466   : > { %v2746_v17 = vpack.c.bf16 %v2684_v10, %v2683_v9 }
 0x467   : > { %v7893_v18 = vpop.f32.mrb[132].mxu0  ;;  %v2745_v20 = vpack.c.bf16 %v2682_v16, %v2681_v11 }
 0x468   : > { %v2451_v23 = vadd.f32 %v7893_v18, %v9686_v59  ;;  %v2442_v25 = vpop.f32.mrb[133].mxu0 }
 0x469   : > { %v2443_v29 = vadd.f32 %v9686_v59, %v2442_v25  ;;  %v7894_v30 = vpop.f32.mrb[134].mxu0  ;;  %7967 = vmatprep.mubr.bf16.mxu1 %v2745_v20 }
 0x46a   : > { %v2454_v31 = vadd.f32 %v7894_v30, %v9686_v59  ;;  %v2445_v36 = vpop.f32.mrb[135].mxu0  ;;  %7968 = vmatmul.mubr.bf16.vlgmr.msra.gmra.mrb[128].mxu1 %v2746_v17  ;;  %v2687_v38 = vmax.f32 %v2451_v23, 0.0 }
 0x46b   : > { %v2446_v37 = vadd.f32 %v9686_v59, %v2445_v36  ;;  %8032 = vmatpush3.bf16.msra.mxu1 %v3145_v26  ;;  %v2685_v44 = vmax.f32 %v2443_v29, 0.0 }
 0x46c   : > { %v2688_v41 = vmax.f32 %v2454_v31, 0.0 }
 0x46d   : > { %v2686_v47 = vmax.f32 %v2446_v37, 0.0 }
 0x46e   : > { %v2748_v48 = vpack.c.bf16 %v2688_v41, %v2687_v38 }
 0x46f   : > { %v2747_v54 = vpack.c.bf16 %v2686_v47, %v2685_v44  ;;  %v7897_v55 = vpop.f32.mrb[136].mxu0 }
 0x470   : > { %v2467_v49 = vadd.f32 %v7897_v55, %v9686_v59  ;;  %v2458_v60 = vpop.f32.mrb[137].mxu0 }
 0x471   : > { %v2459_v62 = vadd.f32 %v9686_v59, %v2458_v60  ;;  %v7898_v1 = vpop.f32.mrb[138].mxu0  ;;  %7971 = vmatprep.mubr.bf16.mxu1 %v2747_v54 }
 0x472   : > { %v2470_v2 = vadd.f32 %v7898_v1, %v9686_v59  ;;  %v2461_v61 = vpop.f32.mrb[139].mxu0  ;;  %7972 = vmatmul.mubr.bf16.gmra.mrb[132].mxu1 %v2748_v48  ;;  %v2691_v4 = vmax.f32 %v2467_v49, 0.0 }
 0x473   : > { %v2462_v3 = vadd.f32 %v9686_v59, %v2461_v61  ;;  %v2689_v9 = vmax.f32 %v2459_v62, 0.0 }
 0x474   : > { %v2692_v7 = vmax.f32 %v2470_v2, 0.0 }
 0x475   : > { %v2690_v10 = vmax.f32 %v2462_v3, 0.0 }
 0x476   : > { %v2750_v11 = vpack.c.bf16 %v2692_v7, %v2691_v4 }
 0x477   : > { %v2749_v16 = vpack.c.bf16 %v2690_v10, %v2689_v9  ;;  %v7901_v17 = vpop.f32.mrb[140].mxu0 }
 0x478   : > { %v2483_v18 = vadd.f32 %v7901_v17, %v9686_v59  ;;  %v2474_v20 = vpop.f32.mrb[141].mxu0 }
 0x479   : > { %v2475_v23 = vadd.f32 %v9686_v59, %v2474_v20  ;;  %v7902_v25 = vpop.f32.mrb[142].mxu0  ;;  %7975 = vmatprep.mubr.bf16.mxu1 %v2749_v16 }
 0x47a   : > { %v2486_v26 = vadd.f32 %v7902_v25, %v9686_v59  ;;  %v2477_v29 = vpop.f32.mrb[143].mxu0  ;;  %7976 = vmatmul.mubr.bf16.gmra.mrb[136].mxu1 %v2750_v11  ;;  %v2695_v31 = vmax.f32 %v2483_v18, 0.0 }
 0x47b   : > { %v2478_v30 = vadd.f32 %v9686_v59, %v2477_v29  ;;  %v2693_v37 = vmax.f32 %v2475_v23, 0.0 }
 0x47c   : > { %v2696_v36 = vmax.f32 %v2486_v26, 0.0 }
 0x47d   : > { %v2694_v38 = vmax.f32 %v2478_v30, 0.0 }
 0x47e   : > { %v2752_v41 = vpack.c.bf16 %v2696_v36, %v2695_v31 }
 0x47f   : > { %v2751_v44 = vpack.c.bf16 %v2694_v38, %v2693_v37  ;;  %v7905_v47 = vpop.f32.mrb[144].mxu0 }
 0x480   : > { %v2499_v48 = vadd.f32 %v7905_v47, %v9686_v59  ;;  %v2490_v54 = vpop.f32.mrb[145].mxu0 }
 0x481   : > { %v2491_v55 = vadd.f32 %v9686_v59, %v2490_v54  ;;  %v7906_v49 = vpop.f32.mrb[146].mxu0  ;;  %7979 = vmatprep.mubr.bf16.mxu1 %v2751_v44 }
 0x482   : > { %v2502_v60 = vadd.f32 %v7906_v49, %v9686_v59  ;;  %v2493_v62 = vpop.f32.mrb[147].mxu0  ;;  %7980 = vmatmul.mubr.bf16.gmra.mrb[140].mxu1 %v2752_v41  ;;  %v2699_v2 = vmax.f32 %v2499_v48, 0.0 }
 0x483   : > { %v2494_v1 = vadd.f32 %v9686_v59, %v2493_v62  ;;  %v2697_v3 = vmax.f32 %v2491_v55, 0.0 }
 0x484   : > { %v2700_v61 = vmax.f32 %v2502_v60, 0.0 }
 0x485   : > { %v2698_v4 = vmax.f32 %v2494_v1, 0.0 }
 0x486   : > { %v2754_v7 = vpack.c.bf16 %v2700_v61, %v2699_v2 }
 0x487   : > { %v2753_v9 = vpack.c.bf16 %v2698_v4, %v2697_v3  ;;  %v7909_v10 = vpop.f32.mrb[148].mxu0 }
 0x488   : > { %v2515_v11 = vadd.f32 %v7909_v10, %v9686_v59  ;;  %v2506_v16 = vpop.f32.mrb[149].mxu0 }
 0x489   : > { %v2507_v17 = vadd.f32 %v9686_v59, %v2506_v16  ;;  %v7910_v18 = vpop.f32.mrb[150].mxu0  ;;  %7983 = vmatprep.mubr.bf16.mxu1 %v2753_v9 }
 0x48a   : > { %v2518_v20 = vadd.f32 %v7910_v18, %v9686_v59  ;;  %v2509_v23 = vpop.f32.mrb[151].mxu0  ;;  %7984 = vmatmul.mubr.bf16.gmra.mrb[144].mxu1 %v2754_v7  ;;  %v2703_v26 = vmax.f32 %v2515_v11, 0.0 }
 0x48b   : > { %v2510_v25 = vadd.f32 %v9686_v59, %v2509_v23  ;;  %v2701_v30 = vmax.f32 %v2507_v17, 0.0 }
 0x48c   : > { %v2704_v29 = vmax.f32 %v2518_v20, 0.0 }
 0x48d   : > { %v2702_v31 = vmax.f32 %v2510_v25, 0.0 }
 0x48e   : > { %v2756_v36 = vpack.c.bf16 %v2704_v29, %v2703_v26 }
 0x48f   : > { %v2755_v37 = vpack.c.bf16 %v2702_v31, %v2701_v30  ;;  %v7913_v38 = vpop.f32.mrb[152].mxu0 }
 0x490   : > { %v2531_v41 = vadd.f32 %v7913_v38, %v9686_v59  ;;  %v2522_v44 = vpop.f32.mrb[153].mxu0 }
 0x491   : > { %v2523_v47 = vadd.f32 %v9686_v59, %v2522_v44  ;;  %v7914_v48 = vpop.f32.mrb[154].mxu0  ;;  %7987 = vmatprep.mubr.bf16.mxu1 %v2755_v37 }
 0x492   : > { %v2534_v54 = vadd.f32 %v7914_v48, %v9686_v59  ;;  %v2525_v55 = vpop.f32.mrb[155].mxu0  ;;  %7988 = vmatmul.mubr.bf16.gmra.mrb[148].mxu1 %v2756_v36  ;;  %v2707_v60 = vmax.f32 %v2531_v41, 0.0 }
 0x493   : > { %v2526_v49 = vadd.f32 %v9686_v59, %v2525_v55  ;;  %v2705_v1 = vmax.f32 %v2523_v47, 0.0 }
 0x494   : > { %v2708_v62 = vmax.f32 %v2534_v54, 0.0 }
 0x495   : > { %v2706_v2 = vmax.f32 %v2526_v49, 0.0 }
 0x496   : > { %v2758_v61 = vpack.c.bf16 %v2708_v62, %v2707_v60 }
 0x497   : > { %v2757_v3 = vpack.c.bf16 %v2706_v2, %v2705_v1  ;;  %v7917_v4 = vpop.f32.mrb[156].mxu0 }
 0x498   : > { %v2547_v7 = vadd.f32 %v7917_v4, %v9686_v59  ;;  %v2538_v9 = vpop.f32.mrb[157].mxu0 }
 0x499   : > { %v2539_v10 = vadd.f32 %v9686_v59, %v2538_v9  ;;  %v7918_v11 = vpop.f32.mrb[158].mxu0  ;;  %7991 = vmatprep.mubr.bf16.mxu1 %v2757_v3 }
 0x49a   : > { %v2550_v16 = vadd.f32 %v7918_v11, %v9686_v59  ;;  %v2541_v17 = vpop.f32.mrb[159].mxu0  ;;  %7992 = vmatmul.mubr.bf16.gmra.mrb[152].mxu1 %v2758_v61  ;;  %v2711_v20 = vmax.f32 %v2547_v7, 0.0 }
 0x49b   : > { %v2542_v18 = vadd.f32 %v9686_v59, %v2541_v17  ;;  %v2709_v25 = vmax.f32 %v2539_v10, 0.0 }
 0x49c   : > { %v2712_v23 = vmax.f32 %v2550_v16, 0.0 }
 0x49d   : > { %v2710_v26 = vmax.f32 %v2542_v18, 0.0 }
 0x49e   : > { %v2760_v29 = vpack.c.bf16 %v2712_v23, %v2711_v20 }
 0x49f   : > { %v2759_v30 = vpack.c.bf16 %v2710_v26, %v2709_v25  ;;  %v7921_v31 = vpop.f32.mrb[160].mxu0 }
 0x4a0   : > { %v2563_v36 = vadd.f32 %v7921_v31, %v9686_v59  ;;  %v2554_v37 = vpop.f32.mrb[161].mxu0 }
 0x4a1   : > { %v2555_v38 = vadd.f32 %v9686_v59, %v2554_v37  ;;  %v7922_v41 = vpop.f32.mrb[162].mxu0  ;;  %7995 = vmatprep.mubr.bf16.mxu1 %v2759_v30 }
 0x4a2   : > { %v2566_v44 = vadd.f32 %v7922_v41, %v9686_v59  ;;  %v2557_v47 = vpop.f32.mrb[163].mxu0  ;;  %7996 = vmatmul.mubr.bf16.gmra.mrb[156].mxu1 %v2760_v29  ;;  %v2715_v54 = vmax.f32 %v2563_v36, 0.0 }
 0x4a3   : > { %v2558_v48 = vadd.f32 %v9686_v59, %v2557_v47  ;;  %v2713_v49 = vmax.f32 %v2555_v38, 0.0 }
 0x4a4   : > { %v2716_v55 = vmax.f32 %v2566_v44, 0.0 }
 0x4a5   : > { %v2714_v60 = vmax.f32 %v2558_v48, 0.0 }
 0x4a6   : > { %v2762_v62 = vpack.c.bf16 %v2716_v55, %v2715_v54 }
 0x4a7   : > { %v2761_v1 = vpack.c.bf16 %v2714_v60, %v2713_v49  ;;  %v7925_v2 = vpop.f32.mrb[164].mxu0 }
 0x4a8   : > { %v2579_v61 = vadd.f32 %v7925_v2, %v9686_v59  ;;  %v2570_v3 = vpop.f32.mrb[165].mxu0 }
 0x4a9   : > { %v2571_v4 = vadd.f32 %v9686_v59, %v2570_v3  ;;  %v7926_v7 = vpop.f32.mrb[166].mxu0  ;;  %7999 = vmatprep.mubr.bf16.mxu1 %v2761_v1 }
 0x4aa   : > { %v2582_v9 = vadd.f32 %v7926_v7, %v9686_v59  ;;  %v2573_v10 = vpop.f32.mrb[167].mxu0  ;;  %8000 = vmatmul.mubr.bf16.gmra.mrb[160].mxu1 %v2762_v62  ;;  %v2719_v16 = vmax.f32 %v2579_v61, 0.0 }
 0x4ab   : > { %v2574_v11 = vadd.f32 %v9686_v59, %v2573_v10  ;;  %v2717_v18 = vmax.f32 %v2571_v4, 0.0 }
 0x4ac   : > { %v2720_v17 = vmax.f32 %v2582_v9, 0.0 }
 0x4ad   : > { %v2718_v20 = vmax.f32 %v2574_v11, 0.0 }
 0x4ae   : > { %v2764_v23 = vpack.c.bf16 %v2720_v17, %v2719_v16 }
 0x4af   : > { %v2763_v25 = vpack.c.bf16 %v2718_v20, %v2717_v18  ;;  %v7929_v26 = vpop.f32.mrb[168].mxu0 }
 0x4b0   : > { %v2595_v29 = vadd.f32 %v7929_v26, %v9686_v59  ;;  %v2586_v30 = vpop.f32.mrb[169].mxu0 }
 0x4b1   : > { %v2587_v31 = vadd.f32 %v9686_v59, %v2586_v30  ;;  %v7930_v36 = vpop.f32.mrb[170].mxu0  ;;  %8003 = vmatprep.mubr.bf16.mxu1 %v2763_v25 }
 0x4b2   : > { %v2598_v37 = vadd.f32 %v7930_v36, %v9686_v59  ;;  %v2589_v38 = vpop.f32.mrb[171].mxu0  ;;  %8004 = vmatmul.mubr.bf16.gmra.mrb[164].mxu1 %v2764_v23  ;;  %v2723_v44 = vmax.f32 %v2595_v29, 0.0  ;;  %v8960_v36 = vld [vmem:[%s10732_s2 + $0x140] sm:$0xff]  }
 0x4b3   : > { %v2590_v41 = vadd.f32 %v9686_v59, %v2589_v38  ;;  %v2721_v48 = vmax.f32 %v2587_v31, 0.0  ;;  %8097 = vmatprep.subr.bf16.mxu0 %v8960_v36 }
 0x4b4   : > { %v2724_v47 = vmax.f32 %v2598_v37, 0.0  ;;  %8098 = vmatpush3.bf16.msra.mxu0 %v8960_v36 }
 0x4b5   : > { %v2722_v54 = vmax.f32 %v2590_v41, 0.0 }
 0x4b6   : > { %v2766_v55 = vpack.c.bf16 %v2724_v47, %v2723_v44 }
 0x4b7   : > { %v2765_v49 = vpack.c.bf16 %v2722_v54, %v2721_v48  ;;  %v7933_v60 = vpop.f32.mrb[172].mxu0 }
 0x4b8   : > { %v2611_v62 = vadd.f32 %v7933_v60, %v9686_v59  ;;  %v2602_v1 = vpop.f32.mrb[173].mxu0 }
 0x4b9   : > { %v2603_v2 = vadd.f32 %v9686_v59, %v2602_v1  ;;  %v7934_v61 = vpop.f32.mrb[174].mxu0  ;;  %8007 = vmatprep.mubr.bf16.mxu1 %v2765_v49 }
 0x4ba   : > { %v2614_v3 = vadd.f32 %v7934_v61, %v9686_v59  ;;  %v2605_v4 = vpop.f32.mrb[175].mxu0  ;;  %8008 = vmatmul.mubr.bf16.gmra.mrb[168].mxu1 %v2766_v55  ;;  %v2727_v9 = vmax.f32 %v2611_v62, 0.0 }
 0x4bb   : > { %v2606_v7 = vadd.f32 %v9686_v59, %v2605_v4  ;;  %v2725_v11 = vmax.f32 %v2603_v2, 0.0 }
 0x4bc   : > { %v2728_v10 = vmax.f32 %v2614_v3, 0.0 }
 0x4bd   : > { %v2726_v16 = vmax.f32 %v2606_v7, 0.0 }
 0x4be   : > { %v2768_v17 = vpack.c.bf16 %v2728_v10, %v2727_v9 }
 0x4bf   : > { %v2767_v18 = vpack.c.bf16 %v2726_v16, %v2725_v11  ;;  %v7937_v20 = vpop.f32.mrb[176].mxu0 }
 0x4c0   : > { %v2627_v23 = vadd.f32 %v7937_v20, %v9686_v59  ;;  %v2618_v25 = vpop.f32.mrb[177].mxu0 }
 0x4c1   : > { %v2619_v26 = vadd.f32 %v9686_v59, %v2618_v25  ;;  %v7938_v29 = vpop.f32.mrb[178].mxu0  ;;  %8011 = vmatprep.mubr.bf16.mxu1 %v2767_v18 }
 0x4c2   : > { %v2630_v30 = vadd.f32 %v7938_v29, %v9686_v59  ;;  %v2621_v31 = vpop.f32.mrb[179].mxu0  ;;  %8012 = vmatmul.mubr.bf16.gmra.mrb[172].mxu1 %v2768_v17  ;;  %v2731_v38 = vmax.f32 %v2627_v23, 0.0 }
 0x4c3   : > { %v2622_v37 = vadd.f32 %v9686_v59, %v2621_v31  ;;  %v2729_v44 = vmax.f32 %v2619_v26, 0.0 }
 0x4c4   : > { %v2732_v41 = vmax.f32 %v2630_v30, 0.0  ;;  %v8961_v30 = vld [vmem:[%s10732_s2 + $0x148] sm:$0xff]  }
 0x4c5   : > { %v2730_v47 = vmax.f32 %v2622_v37, 0.0  ;;  %8099 = vmatprep.subr.bf16.mxu0 %v8961_v30 }
 0x4c6   : > { %v2770_v48 = vpack.c.bf16 %v2732_v41, %v2731_v38  ;;  %8100 = vmatpush3.bf16.msra.mxu0 %v8961_v30 }
 0x4c7   : > { %v2769_v54 = vpack.c.bf16 %v2730_v47, %v2729_v44  ;;  %v7941_v55 = vpop.f32.mrb[180].mxu0 }
 0x4c8   : > { %v2643_v49 = vadd.f32 %v7941_v55, %v9686_v59  ;;  %v2634_v60 = vpop.f32.mrb[181].mxu0 }
 0x4c9   : > { %v2635_v62 = vadd.f32 %v9686_v59, %v2634_v60  ;;  %v7942_v1 = vpop.f32.mrb[182].mxu0  ;;  %8015 = vmatprep.mubr.bf16.mxu1 %v2769_v54 }
 0x4ca   : > { %v2646_v2 = vadd.f32 %v7942_v1, %v9686_v59  ;;  %v2637_v61 = vpop.f32.mrb[183].mxu0  ;;  %8016 = vmatmul.mubr.bf16.gmra.mrb[176].mxu1 %v2770_v48  ;;  %v2735_v4 = vmax.f32 %v2643_v49, 0.0 }
 0x4cb   : > { %v2638_v3 = vadd.f32 %v9686_v59, %v2637_v61  ;;  %v2733_v9 = vmax.f32 %v2635_v62, 0.0 }
 0x4cc   : > { %v2736_v7 = vmax.f32 %v2646_v2, 0.0 }
 0x4cd   : > { %v2734_v10 = vmax.f32 %v2638_v3, 0.0 }
 0x4ce   : > { %v2772_v11 = vpack.c.bf16 %v2736_v7, %v2735_v4 }
 0x4cf   : > { %v2771_v16 = vpack.c.bf16 %v2734_v10, %v2733_v9  ;;  %v7945_v17 = vpop.f32.mrb[184].mxu0 }
 0x4d0   : > { %v2659_v18 = vadd.f32 %v7945_v17, %v9686_v59  ;;  %v2650_v20 = vpop.f32.mrb[185].mxu0  ;;  %v8965_v17 = vld [vmem:[%s10732_s2 + $0x168] sm:$0xff]  }
 0x4d1   : > { %v2651_v23 = vadd.f32 %v9686_v59, %v2650_v20  ;;  %v7946_v25 = vpop.f32.mrb[186].mxu0  ;;  %8019 = vmatprep.mubr.bf16.mxu1 %v2771_v16  ;;  %v8963_v16 = vld [vmem:[%s10732_s2 + $0x158] sm:$0xff]  }
 0x4d2   : > { %v2662_v26 = vadd.f32 %v7946_v25, %v9686_v59  ;;  %v2653_v29 = vpop.f32.mrb[187].mxu0  ;;  %8020 = vmatmul.mubr.bf16.gmra.mrb[180].mxu1 %v2772_v11  ;;  %v2739_v36 = vmax.f32 %v2659_v18, 0.0  ;;  %v8962_v11 = vld [vmem:[%s10732_s2 + $0x150] sm:$0xff]   ;;  %v8967_v20 = vld [vmem:[%s10732_s2 + $0x178] sm:$0xff]   ;;  %v9847_v25 = vld [vmem:[%s10733_s3 + $0x5] ss:$0 sm:$0xff] }
 0x4d3   : > { %v2654_v31 = vadd.f32 %v9686_v59, %v2653_v29  ;;  %v2737_v38 = vmax.f32 %v2651_v23, 0.0  ;;  %8101 = vmatprep.subr.bf16.mxu0 %v8962_v11  ;;  %v8966_v18 = vld [vmem:[%s10732_s2 + $0x170] sm:$0xff]   ;;  %v8968_v23 = vld [vmem:[%s10732_s2 + $0x180] sm:$0xff]  }
 0x4d4   : > { %v2740_v37 = vmax.f32 %v2662_v26, 0.0  ;;  %8102 = vmatpush3.bf16.msra.mxu0 %v8962_v11 }
 0x4d5   : > { %v2738_v41 = vmax.f32 %v2654_v31, 0.0  ;;  %8103 = vmatprep.subr.bf16.mxu0 %v8963_v16 }
 0x4d6   : > { %v2774_v44 = vpack.c.bf16 %v2740_v37, %v2739_v36 }
 0x4d7   : > { %v2773_v47 = vpack.c.bf16 %v2738_v41, %v2737_v38  ;;  %v7949_v48 = vpop.f32.mrb[188].mxu0 }
 0x4d8   : > { %v2675_v54 = vadd.f32 %v7949_v48, %v9686_v59  ;;  %v2666_v55 = vpop.f32.mrb[189].mxu0  ;;  %8104 = vmatpush3.bf16.msra.mxu0 %v8963_v16  ;;  %v8970_v16 = vld [vmem:[%s10732_s2 + $0x190] sm:$0xff]  }
 0x4d9   : > { %v2667_v49 = vadd.f32 %v9686_v59, %v2666_v55  ;;  %v7950_v60 = vpop.f32.mrb[190].mxu0  ;;  %8023 = vmatprep.mubr.bf16.mxu1 %v2773_v47 }
 0x4da   : > { %v2678_v62 = vadd.f32 %v7950_v60, %v9686_v59  ;;  %v2669_v1 = vpop.f32.mrb[191].mxu0  ;;  %8024 = vmatmul.mubr.bf16.gmra.mrb[184].mxu1 %v2774_v44  ;;  %v2743_v61 = vmax.f32 %v2675_v54, 0.0 }
 0x4db   : > { %v2670_v2 = vadd.f32 %v9686_v59, %v2669_v1  ;;  %v2741_v4 = vmax.f32 %v2667_v49, 0.0  ;;  %v8964_v59 = vld [vmem:[%s10732_s2 + $0x160] sm:$0xff]  }
 0x4dc   : > { %v2744_v3 = vmax.f32 %v2678_v62, 0.0  ;;  %8105 = vmatprep.subr.bf16.mxu0 %v8964_v59 }
 0x4dd   : > { %v2742_v7 = vmax.f32 %v2670_v2, 0.0  ;;  %8106 = vmatpush3.bf16.msra.mxu0 %v8964_v59  ;;  %v8969_v2 = vld [vmem:[%s10732_s2 + $0x188] sm:$0xff]  }
 0x4de   : > { %v2776_v9 = vpack.c.bf16 %v2744_v3, %v2743_v61  ;;  %8107 = vmatprep.subr.bf16.mxu0 %v8965_v17 }
 0x4df   : > { %v2775_v10 = vpack.c.bf16 %v2742_v7, %v2741_v4 }
 0x4e1   : > { %8027 = vmatprep.mubr.bf16.mxu1 %v2775_v10  ;;  %8108 = vmatpush3.bf16.msra.mxu0 %v8965_v17 }
 0x4e2   : > { %8028 = vmatmul.mubr.bf16.gmra.mrb[188].mxu1 %v2776_v9  ;;  %8109 = vmatprep.subr.bf16.mxu0 %v8966_v18 }
 0x4e3   : > { %8033 = vmatprep.mubr.msk.bf16.mxu1 %vm472_vm1, %v9103_v8 }
 0x4e5   : > { %8110 = vmatpush3.bf16.msra.mxu0 %v8966_v18 }
 0x4e6   : > { %8111 = vmatprep.subr.bf16.mxu0 %v8967_v20 }
 0x4e9   : > { %8112 = vmatpush3.bf16.msra.mxu0 %v8967_v20 }
 0x4ea   : > { %8034 = vmatmul.mubr.msk.bf16.vlgmr.msra.gmra.mrb[128].mxu1 %vm472_vm1, %v9108_v12  ;;  %8177 = vmatprep.subr.bf16.mxu0 %v8968_v23 }
 0x4eb   : > { %8037 = vmatprep.mubr.msk.bf16.mxu1 %vm472_vm1, %v9110_v13 }
 0x4f2   : > { %8038 = vmatmul.mubr.msk.bf16.gmra.mrb[132].mxu1 %vm472_vm1, %v9125_v19 }
 0x4f3   : > { %8041 = vmatprep.mubr.msk.bf16.mxu1 %vm472_vm1, %v9130_v21 }
 0x4fa   : > { %8042 = vmatmul.mubr.msk.bf16.gmra.mrb[136].mxu1 %vm472_vm1, %v9143_v27 }
 0x4fb   : > { %8045 = vmatprep.mubr.msk.bf16.mxu1 %vm472_vm1, %v9145_v28 }
 0x502   : > { %8046 = vmatmul.mubr.msk.bf16.gmra.mrb[140].mxu1 %vm472_vm1, %v9155_v33 }
 0x503   : > { %8049 = vmatprep.mubr.msk.bf16.mxu1 %vm472_vm1, %v9157_v34 }
 0x50a   : > { %8050 = vmatmul.mubr.msk.bf16.gmra.mrb[144].mxu1 %vm472_vm1, %v9167_v39 }
 0x50b   : > { %8053 = vmatprep.mubr.msk.bf16.mxu1 %vm472_vm1, %v9169_v40 }
 0x512   : > { %8054 = vmatmul.mubr.msk.bf16.gmra.mrb[148].mxu1 %vm472_vm1, %v9179_v45 }
 0x513   : > { %8057 = vmatprep.mubr.msk.bf16.mxu1 %vm472_vm1, %v9181_v46 }
 0x51a   : > { %8058 = vmatmul.mubr.msk.bf16.gmra.mrb[152].mxu1 %vm472_vm1, %v9191_v51 }
 0x51b   : > { %8061 = vmatprep.mubr.msk.bf16.mxu1 %vm472_vm1, %v9193_v52 }
 0x522   : > { %8062 = vmatmul.mubr.msk.bf16.gmra.mrb[156].mxu1 %vm472_vm1, %v9203_v57 }
 0x523   : > { %8065 = vmatprep.mubr.msk.bf16.mxu1 %vm472_vm1, %v9205_v58 }
 0x52a   : > { %8066 = vmatmul.mubr.msk.bf16.gmra.mrb[160].mxu1 %vm472_vm1, %v9215_v63 }
 0x52b   : > { %8069 = vmatprep.mubr.msk.bf16.mxu1 %vm472_vm1, %v9217_v0 }
 0x532   : > { %8070 = vmatmul.mubr.msk.bf16.gmra.mrb[164].mxu1 %vm472_vm1, %v9227_v5 }
 0x533   : > { %8073 = vmatprep.mubr.msk.bf16.mxu1 %vm472_vm1, %v9229_v6 }
 0x53a   : > { %8074 = vmatmul.mubr.msk.bf16.gmra.mrb[168].mxu1 %vm472_vm1, %v9239_v14 }
 0x53b   : > { %8077 = vmatprep.mubr.msk.bf16.mxu1 %vm472_vm1, %v9241_v15 }
 0x542   : > { %8078 = vmatmul.mubr.msk.bf16.gmra.mrb[172].mxu1 %vm472_vm1, %v9251_v22 }
 0x543   : > { %8081 = vmatprep.mubr.msk.bf16.mxu1 %vm472_vm1, %v9256_v24 }
 0x54a   : > { %8082 = vmatmul.mubr.msk.bf16.gmra.mrb[176].mxu1 %vm472_vm1, %v9269_v32 }
 0x54b   : > { %8085 = vmatprep.mubr.msk.bf16.mxu1 %vm472_vm1, %v9271_v35 }
 0x552   : > { %8086 = vmatmul.mubr.msk.bf16.gmra.mrb[180].mxu1 %vm472_vm1, %v9281_v42 }
 0x553   : > { %8089 = vmatprep.mubr.msk.bf16.mxu1 %vm472_vm1, %v9283_v43 }
 0x55a   : > { %8090 = vmatmul.mubr.msk.bf16.gmra.mrb[184].mxu1 %vm472_vm1, %v9293_v50 }
 0x55b   : > { %8093 = vmatprep.mubr.msk.bf16.mxu1 %vm472_vm1, %v9295_v53 }
 0x562   : > { %8094 = vmatmul.mubr.msk.bf16.gmra.mrb[188].mxu1 %vm472_vm1, %v9303_v56 }
 0x5bd   : > { %v8035_v26 = vpop.f32.mrb[128].mxu1 }
 0x5be   : > { %v8651_v29 = vadd.f32 %v8035_v26, %v9847_v25  ;;  %v3181_v30 = vpop.f32.mrb[129].mxu1 }
 0x5bf   : > { %v8652_v31 = vadd.f32 %v9847_v25, %v3181_v30  ;;  %v8036_v36 = vpop.f32.mrb[130].mxu1 }
 0x5c0   : > { %v8653_v37 = vadd.f32 %v8036_v36, %v9847_v25  ;;  %v3184_v38 = vpop.f32.mrb[131].mxu1  ;;  %v3502_v44 = vmax.f32 %v8651_v29, 0.0 }
 0x5c1   : > { %v8654_v41 = vadd.f32 %v9847_v25, %v3184_v38  ;;  %v3500_v48 = vmax.f32 %v8652_v31, 0.0 }
 0x5c2   : > { %v3503_v47 = vmax.f32 %v8653_v37, 0.0 }
 0x5c3   : > { %v3501_v54 = vmax.f32 %v8654_v41, 0.0 }
 0x5c4   : > { %v3565_v55 = vpack.c.bf16 %v3503_v47, %v3502_v44 }
 0x5c5   : > { %v3564_v49 = vpack.c.bf16 %v3501_v54, %v3500_v48  ;;  %v8039_v60 = vpop.f32.mrb[132].mxu1  ;;  %v8972_v48 = vld [vmem:[%s10732_s2 + $0x1a0] sm:$0xff]  }
 0x5c6   : > { %v8655_v62 = vadd.f32 %v8039_v60, %v9847_v25  ;;  %v3197_v1 = vpop.f32.mrb[133].mxu1 }
 0x5c7   : > { %v8656_v61 = vadd.f32 %v9847_v25, %v3197_v1  ;;  %v8040_v3 = vpop.f32.mrb[134].mxu1  ;;  %8113 = vmatprep.mubr.bf16.mxu0 %v3564_v49 }
 0x5c8   : > { %v8657_v4 = vadd.f32 %v8040_v3, %v9847_v25  ;;  %v3200_v7 = vpop.f32.mrb[135].mxu1  ;;  %8114 = vmatmul.mubr.bf16.vlgmr.msra.gmra.mrb[192].mxu0 %v3565_v55  ;;  %v3506_v10 = vmax.f32 %v8655_v62, 0.0 }
 0x5c9   : > { %v8658_v9 = vadd.f32 %v9847_v25, %v3200_v7  ;;  %8178 = vmatpush3.bf16.msra.mxu0 %v8968_v23  ;;  %v3504_v59 = vmax.f32 %v8656_v61, 0.0  ;;  %v8971_v23 = vld [vmem:[%s10732_s2 + $0x198] sm:$0xff]   ;;  %v8973_v61 = vld [vmem:[%s10732_s2 + $0x1a8] sm:$0xff]  }
 0x5ca   : > { %v3507_v11 = vmax.f32 %v8657_v4, 0.0  ;;  %8179 = vmatprep.subr.bf16.mxu0 %v8969_v2 }
 0x5cb   : > { %v3505_v17 = vmax.f32 %v8658_v9, 0.0 }
 0x5cc   : > { %v3567_v18 = vpack.c.bf16 %v3507_v11, %v3506_v10 }
 0x5cd   : > { %v3566_v20 = vpack.c.bf16 %v3505_v17, %v3504_v59  ;;  %v8043_v26 = vpop.f32.mrb[136].mxu1  ;;  %8180 = vmatpush3.bf16.msra.mxu0 %v8969_v2  ;;  %v8974_v59 = vld [vmem:[%s10732_s2 + $0x1b0] sm:$0xff]  }
 0x5ce   : > { %v8659_v29 = vadd.f32 %v8043_v26, %v9847_v25  ;;  %v3213_v30 = vpop.f32.mrb[137].mxu1  ;;  %8181 = vmatprep.subr.bf16.mxu0 %v8970_v16 }
 0x5cf   : > { %v8660_v31 = vadd.f32 %v9847_v25, %v3213_v30  ;;  %v8044_v36 = vpop.f32.mrb[138].mxu1  ;;  %8117 = vmatprep.mubr.bf16.mxu0 %v3566_v20 }
 0x5d0   : > { %v8661_v37 = vadd.f32 %v8044_v36, %v9847_v25  ;;  %v3216_v38 = vpop.f32.mrb[139].mxu1  ;;  %8118 = vmatmul.mubr.bf16.gmra.mrb[196].mxu0 %v3567_v18  ;;  %v3510_v44 = vmax.f32 %v8659_v29, 0.0 }
 0x5d1   : > { %v8662_v41 = vadd.f32 %v9847_v25, %v3216_v38  ;;  %8182 = vmatpush3.bf16.msra.mxu0 %v8970_v16  ;;  %v3508_v54 = vmax.f32 %v8660_v31, 0.0  ;;  %v8975_v31 = vld [vmem:[%s10732_s2 + $0x1b8] sm:$0xff]  }
 0x5d2   : > { %v3511_v47 = vmax.f32 %v8661_v37, 0.0  ;;  %8183 = vmatprep.subr.bf16.mxu0 %v8971_v23 }
 0x5d3   : > { %v3509_v55 = vmax.f32 %v8662_v41, 0.0 }
 0x5d4   : > { %v3569_v49 = vpack.c.bf16 %v3511_v47, %v3510_v44 }
 0x5d5   : > { %v3568_v60 = vpack.c.bf16 %v3509_v55, %v3508_v54  ;;  %v8047_v62 = vpop.f32.mrb[140].mxu1  ;;  %8184 = vmatpush3.bf16.msra.mxu0 %v8971_v23 }
 0x5d6   : > { %v8663_v1 = vadd.f32 %v8047_v62, %v9847_v25  ;;  %v3229_v2 = vpop.f32.mrb[141].mxu1  ;;  %8185 = vmatprep.subr.bf16.mxu0 %v8972_v48 }
 0x5d7   : > { %v8664_v3 = vadd.f32 %v9847_v25, %v3229_v2  ;;  %v8048_v4 = vpop.f32.mrb[142].mxu1  ;;  %8121 = vmatprep.mubr.bf16.mxu0 %v3568_v60 }
 0x5d8   : > { %v8665_v7 = vadd.f32 %v8048_v4, %v9847_v25  ;;  %v3232_v9 = vpop.f32.mrb[143].mxu1  ;;  %8122 = vmatmul.mubr.bf16.gmra.mrb[200].mxu0 %v3569_v49  ;;  %v3514_v11 = vmax.f32 %v8663_v1, 0.0 }
 0x5d9   : > { %v8666_v10 = vadd.f32 %v9847_v25, %v3232_v9  ;;  %8186 = vmatpush3.bf16.msra.mxu0 %v8972_v48  ;;  %v3512_v17 = vmax.f32 %v8664_v3, 0.0 }
 0x5da   : > { %v3515_v16 = vmax.f32 %v8665_v7, 0.0  ;;  %8187 = vmatprep.subr.bf16.mxu0 %v8973_v61 }
 0x5db   : > { %v3513_v18 = vmax.f32 %v8666_v10, 0.0 }
 0x5dc   : > { %v3571_v20 = vpack.c.bf16 %v3515_v16, %v3514_v11 }
 0x5dd   : > { %v3570_v26 = vpack.c.bf16 %v3513_v18, %v3512_v17  ;;  %v8051_v29 = vpop.f32.mrb[144].mxu1  ;;  %8188 = vmatpush3.bf16.msra.mxu0 %v8973_v61 }
 0x5de   : > { %v8667_v30 = vadd.f32 %v8051_v29, %v9847_v25  ;;  %v3245_v23 = vpop.f32.mrb[145].mxu1  ;;  %8189 = vmatprep.subr.bf16.mxu0 %v8974_v59 }
 0x5df   : > { %v8668_v36 = vadd.f32 %v9847_v25, %v3245_v23  ;;  %v8052_v37 = vpop.f32.mrb[146].mxu1  ;;  %8125 = vmatprep.mubr.bf16.mxu0 %v3570_v26 }
 0x5e0   : > { %v8669_v38 = vadd.f32 %v8052_v37, %v9847_v25  ;;  %v3248_v41 = vpop.f32.mrb[147].mxu1  ;;  %8126 = vmatmul.mubr.bf16.gmra.mrb[204].mxu0 %v3571_v20  ;;  %v3518_v47 = vmax.f32 %v8667_v30, 0.0 }
 0x5e1   : > { %v8670_v44 = vadd.f32 %v9847_v25, %v3248_v41  ;;  %8190 = vmatpush3.bf16.msra.mxu0 %v8974_v59  ;;  %v3516_v54 = vmax.f32 %v8668_v36, 0.0 }
 0x5e2   : > { %v3519_v48 = vmax.f32 %v8669_v38, 0.0  ;;  %8191 = vmatprep.subr.bf16.mxu0 %v8975_v31 }
 0x5e3   : > { %v3517_v55 = vmax.f32 %v8670_v44, 0.0 }
 0x5e4   : > { %v3573_v49 = vpack.c.bf16 %v3519_v48, %v3518_v47 }
 0x5e5   : > { %v3572_v60 = vpack.c.bf16 %v3517_v55, %v3516_v54  ;;  %v8055_v62 = vpop.f32.mrb[148].mxu1  ;;  %8192 = vmatpush3.bf16.msra.mxu0 %v8975_v31 }
 0x5e6   : > { %v8671_v1 = vadd.f32 %v8055_v62, %v9847_v25  ;;  %v3261_v2 = vpop.f32.mrb[149].mxu1 }
 0x5e7   : > { %v8672_v61 = vadd.f32 %v9847_v25, %v3261_v2  ;;  %v8056_v3 = vpop.f32.mrb[150].mxu1  ;;  %8129 = vmatprep.mubr.bf16.mxu0 %v3572_v60 }
 0x5e8   : > { %v8673_v4 = vadd.f32 %v8056_v3, %v9847_v25  ;;  %v3264_v7 = vpop.f32.mrb[151].mxu1  ;;  %8130 = vmatmul.mubr.bf16.gmra.mrb[208].mxu0 %v3573_v49  ;;  %v3522_v10 = vmax.f32 %v8671_v1, 0.0 }
 0x5e9   : > { %v8674_v9 = vadd.f32 %v9847_v25, %v3264_v7  ;;  %v3520_v16 = vmax.f32 %v8672_v61, 0.0 }
 0x5ea   : > { %v3523_v11 = vmax.f32 %v8673_v4, 0.0 }
 0x5eb   : > { %v3521_v59 = vmax.f32 %v8674_v9, 0.0 }
 0x5ec   : > { %v3575_v17 = vpack.c.bf16 %v3523_v11, %v3522_v10 }
 0x5ed   : > { %v3574_v18 = vpack.c.bf16 %v3521_v59, %v3520_v16  ;;  %v8059_v20 = vpop.f32.mrb[152].mxu1 }
 0x5ee   : > { %v8675_v26 = vadd.f32 %v8059_v20, %v9847_v25  ;;  %v3277_v29 = vpop.f32.mrb[153].mxu1 }
 0x5ef   : > { %v8676_v30 = vadd.f32 %v9847_v25, %v3277_v29  ;;  %v8060_v23 = vpop.f32.mrb[154].mxu1  ;;  %8133 = vmatprep.mubr.bf16.mxu0 %v3574_v18 }
 0x5f0   : > { %v8677_v31 = vadd.f32 %v8060_v23, %v9847_v25  ;;  %v3280_v36 = vpop.f32.mrb[155].mxu1  ;;  %8134 = vmatmul.mubr.bf16.gmra.mrb[212].mxu0 %v3575_v17  ;;  %v3526_v38 = vmax.f32 %v8675_v26, 0.0 }
 0x5f1   : > { %v8678_v37 = vadd.f32 %v9847_v25, %v3280_v36  ;;  %v3524_v44 = vmax.f32 %v8676_v30, 0.0 }
 0x5f2   : > { %v3527_v41 = vmax.f32 %v8677_v31, 0.0 }
 0x5f3   : > { %v3525_v47 = vmax.f32 %v8678_v37, 0.0 }
 0x5f4   : > { %v3577_v48 = vpack.c.bf16 %v3527_v41, %v3526_v38 }
 0x5f5   : > { %v3576_v54 = vpack.c.bf16 %v3525_v47, %v3524_v44  ;;  %v8063_v55 = vpop.f32.mrb[156].mxu1 }
 0x5f6   : > { %v8679_v49 = vadd.f32 %v8063_v55, %v9847_v25  ;;  %v3293_v60 = vpop.f32.mrb[157].mxu1 }
 0x5f7   : > { %v8680_v62 = vadd.f32 %v9847_v25, %v3293_v60  ;;  %v8064_v1 = vpop.f32.mrb[158].mxu1  ;;  %8137 = vmatprep.mubr.bf16.mxu0 %v3576_v54 }
 0x5f8   : > { %v8681_v2 = vadd.f32 %v8064_v1, %v9847_v25  ;;  %v3296_v61 = vpop.f32.mrb[159].mxu1  ;;  %8138 = vmatmul.mubr.bf16.gmra.mrb[216].mxu0 %v3577_v48  ;;  %v3530_v4 = vmax.f32 %v8679_v49, 0.0 }
 0x5f9   : > { %v8682_v3 = vadd.f32 %v9847_v25, %v3296_v61  ;;  %v3528_v9 = vmax.f32 %v8680_v62, 0.0 }
 0x5fa   : > { %v3531_v7 = vmax.f32 %v8681_v2, 0.0 }
 0x5fb   : > { %v3529_v10 = vmax.f32 %v8682_v3, 0.0 }
 0x5fc   : > { %v3579_v11 = vpack.c.bf16 %v3531_v7, %v3530_v4 }
 0x5fd   : > { %v3578_v16 = vpack.c.bf16 %v3529_v10, %v3528_v9  ;;  %v8067_v59 = vpop.f32.mrb[160].mxu1 }
 0x5fe   : > { %v8683_v17 = vadd.f32 %v8067_v59, %v9847_v25  ;;  %v3309_v18 = vpop.f32.mrb[161].mxu1 }
 0x5ff   : > { %v8684_v20 = vadd.f32 %v9847_v25, %v3309_v18  ;;  %v8068_v26 = vpop.f32.mrb[162].mxu1  ;;  %8141 = vmatprep.mubr.bf16.mxu0 %v3578_v16 }
 0x600   : > { %v8685_v29 = vadd.f32 %v8068_v26, %v9847_v25  ;;  %v3312_v30 = vpop.f32.mrb[163].mxu1  ;;  %8142 = vmatmul.mubr.bf16.gmra.mrb[220].mxu0 %v3579_v11  ;;  %v3534_v31 = vmax.f32 %v8683_v17, 0.0 }
 0x601   : > { %v8686_v23 = vadd.f32 %v9847_v25, %v3312_v30  ;;  %v3532_v37 = vmax.f32 %v8684_v20, 0.0 }
 0x602   : > { %v3535_v36 = vmax.f32 %v8685_v29, 0.0 }
 0x603   : > { %v3533_v38 = vmax.f32 %v8686_v23, 0.0 }
 0x604   : > { %v3581_v41 = vpack.c.bf16 %v3535_v36, %v3534_v31 }
 0x605   : > { %v3580_v44 = vpack.c.bf16 %v3533_v38, %v3532_v37  ;;  %v8071_v47 = vpop.f32.mrb[164].mxu1 }
 0x606   : > { %v8687_v48 = vadd.f32 %v8071_v47, %v9847_v25  ;;  %v3325_v54 = vpop.f32.mrb[165].mxu1 }
 0x607   : > { %v8688_v55 = vadd.f32 %v9847_v25, %v3325_v54  ;;  %v8072_v49 = vpop.f32.mrb[166].mxu1  ;;  %8145 = vmatprep.mubr.bf16.mxu0 %v3580_v44 }
 0x608   : > { %v8689_v60 = vadd.f32 %v8072_v49, %v9847_v25  ;;  %v3328_v62 = vpop.f32.mrb[167].mxu1  ;;  %8146 = vmatmul.mubr.bf16.gmra.mrb[224].mxu0 %v3581_v41  ;;  %v3538_v2 = vmax.f32 %v8687_v48, 0.0 }
 0x609   : > { %v8690_v1 = vadd.f32 %v9847_v25, %v3328_v62  ;;  %v3536_v3 = vmax.f32 %v8688_v55, 0.0 }
 0x60a   : > { %v3539_v61 = vmax.f32 %v8689_v60, 0.0 }
 0x60b   : > { %v3537_v4 = vmax.f32 %v8690_v1, 0.0 }
 0x60c   : > { %v3583_v7 = vpack.c.bf16 %v3539_v61, %v3538_v2 }
 0x60d   : > { %v3582_v9 = vpack.c.bf16 %v3537_v4, %v3536_v3  ;;  %v8075_v10 = vpop.f32.mrb[168].mxu1 }
 0x60e   : > { %v8691_v11 = vadd.f32 %v8075_v10, %v9847_v25  ;;  %v3341_v16 = vpop.f32.mrb[169].mxu1 }
 0x60f   : > { %v8692_v59 = vadd.f32 %v9847_v25, %v3341_v16  ;;  %v8076_v17 = vpop.f32.mrb[170].mxu1  ;;  %8149 = vmatprep.mubr.bf16.mxu0 %v3582_v9 }
 0x610   : > { %v8693_v18 = vadd.f32 %v8076_v17, %v9847_v25  ;;  %v3344_v20 = vpop.f32.mrb[171].mxu1  ;;  %8150 = vmatmul.mubr.bf16.gmra.mrb[228].mxu0 %v3583_v7  ;;  %v3542_v29 = vmax.f32 %v8691_v11, 0.0 }
 0x611   : > { %v8694_v26 = vadd.f32 %v9847_v25, %v3344_v20  ;;  %v3540_v23 = vmax.f32 %v8692_v59, 0.0 }
 0x612   : > { %v3543_v30 = vmax.f32 %v8693_v18, 0.0 }
 0x613   : > { %v3541_v31 = vmax.f32 %v8694_v26, 0.0 }
 0x614   : > { %v3585_v36 = vpack.c.bf16 %v3543_v30, %v3542_v29 }
 0x615   : > { %v3584_v37 = vpack.c.bf16 %v3541_v31, %v3540_v23  ;;  %v8079_v38 = vpop.f32.mrb[172].mxu1 }
 0x616   : > { %v8695_v41 = vadd.f32 %v8079_v38, %v9847_v25  ;;  %v3357_v44 = vpop.f32.mrb[173].mxu1 }
 0x617   : > { %v8696_v47 = vadd.f32 %v9847_v25, %v3357_v44  ;;  %v8080_v48 = vpop.f32.mrb[174].mxu1  ;;  %8153 = vmatprep.mubr.bf16.mxu0 %v3584_v37 }
 0x618   : > { %v8697_v54 = vadd.f32 %v8080_v48, %v9847_v25  ;;  %v3360_v55 = vpop.f32.mrb[175].mxu1  ;;  %8154 = vmatmul.mubr.bf16.gmra.mrb[232].mxu0 %v3585_v36  ;;  %v3546_v60 = vmax.f32 %v8695_v41, 0.0 }
 0x619   : > { %v8698_v49 = vadd.f32 %v9847_v25, %v3360_v55  ;;  %v3544_v1 = vmax.f32 %v8696_v47, 0.0 }
 0x61a   : > { %v3547_v62 = vmax.f32 %v8697_v54, 0.0 }
 0x61b   : > { %v3545_v2 = vmax.f32 %v8698_v49, 0.0 }
 0x61c   : > { %v3587_v61 = vpack.c.bf16 %v3547_v62, %v3546_v60 }
 0x61d   : > { %v3586_v3 = vpack.c.bf16 %v3545_v2, %v3544_v1  ;;  %v8083_v4 = vpop.f32.mrb[176].mxu1 }
 0x61e   : > { %v8699_v7 = vadd.f32 %v8083_v4, %v9847_v25  ;;  %v3373_v9 = vpop.f32.mrb[177].mxu1 }
 0x61f   : > { %v8700_v10 = vadd.f32 %v9847_v25, %v3373_v9  ;;  %v8084_v11 = vpop.f32.mrb[178].mxu1  ;;  %8157 = vmatprep.mubr.bf16.mxu0 %v3586_v3 }
 0x620   : > { %v8701_v16 = vadd.f32 %v8084_v11, %v9847_v25  ;;  %v3376_v59 = vpop.f32.mrb[179].mxu1  ;;  %8158 = vmatmul.mubr.bf16.gmra.mrb[236].mxu0 %v3587_v61  ;;  %v3550_v18 = vmax.f32 %v8699_v7, 0.0 }
 0x621   : > { %v8702_v17 = vadd.f32 %v9847_v25, %v3376_v59  ;;  %v3548_v26 = vmax.f32 %v8700_v10, 0.0 }
 0x622   : > { %v3551_v20 = vmax.f32 %v8701_v16, 0.0 }
 0x623   : > { %v3549_v29 = vmax.f32 %v8702_v17, 0.0 }
 0x624   : > { %v3589_v30 = vpack.c.bf16 %v3551_v20, %v3550_v18 }
 0x625   : > { %v3588_v23 = vpack.c.bf16 %v3549_v29, %v3548_v26  ;;  %v8087_v31 = vpop.f32.mrb[180].mxu1 }
 0x626   : > { %v8703_v36 = vadd.f32 %v8087_v31, %v9847_v25  ;;  %v3389_v37 = vpop.f32.mrb[181].mxu1 }
 0x627   : > { %v8704_v38 = vadd.f32 %v9847_v25, %v3389_v37  ;;  %v8088_v41 = vpop.f32.mrb[182].mxu1  ;;  %8161 = vmatprep.mubr.bf16.mxu0 %v3588_v23 }
 0x628   : > { %v8705_v44 = vadd.f32 %v8088_v41, %v9847_v25  ;;  %v3392_v47 = vpop.f32.mrb[183].mxu1  ;;  %8162 = vmatmul.mubr.bf16.gmra.mrb[240].mxu0 %v3589_v30  ;;  %v3554_v54 = vmax.f32 %v8703_v36, 0.0 }
 0x629   : > { %v8706_v48 = vadd.f32 %v9847_v25, %v3392_v47  ;;  %v3552_v49 = vmax.f32 %v8704_v38, 0.0 }
 0x62a   : > { %v3555_v55 = vmax.f32 %v8705_v44, 0.0 }
 0x62b   : > { %v3553_v60 = vmax.f32 %v8706_v48, 0.0 }
 0x62c   : > { %v3591_v62 = vpack.c.bf16 %v3555_v55, %v3554_v54 }
 0x62d   : > { %v3590_v1 = vpack.c.bf16 %v3553_v60, %v3552_v49  ;;  %v8091_v2 = vpop.f32.mrb[184].mxu1  ;;  %v8976_v60 = vld [vmem:[%s10732_s2 + $0x1c0] sm:$0xff]  }
 0x62e   : > { %v8707_v61 = vadd.f32 %v8091_v2, %v9847_v25  ;;  %v3405_v3 = vpop.f32.mrb[185].mxu1  ;;  %8257 = vmatprep.subr.bf16.mxu0 %v8976_v60  ;;  %8635 = vmatprep.subr.bf16.mxu1 %v8976_v60 }
 0x62f   : > { %v8708_v4 = vadd.f32 %v9847_v25, %v3405_v3  ;;  %v8092_v7 = vpop.f32.mrb[186].mxu1  ;;  %8165 = vmatprep.mubr.bf16.mxu0 %v3590_v1  ;;  %8643 = vmatpush3.bf16.msra.mxu1 %v8976_v60 }
 0x630   : > { %v8709_v9 = vadd.f32 %v8092_v7, %v9847_v25  ;;  %v3408_v10 = vpop.f32.mrb[187].mxu1  ;;  %8166 = vmatmul.mubr.bf16.gmra.mrb[244].mxu0 %v3591_v62  ;;  %v3558_v16 = vmax.f32 %v8707_v61, 0.0  ;;  %v8977_v62 = vld [vmem:[%s10732_s2 + $0x1c8] sm:$0xff]  }
 0x631   : > { %v8710_v11 = vadd.f32 %v9847_v25, %v3408_v10  ;;  %v3556_v17 = vmax.f32 %v8708_v4, 0.0  ;;  %8636 = vmatprep.subr.bf16.mxu1 %v8977_v62  ;;  %v8978_v10 = vld [vmem:[%s10732_s2 + $0x1d0] sm:$0xff]  }
 0x632   : > { %v3559_v59 = vmax.f32 %v8709_v9, 0.0 }
 0x633   : > { %v3557_v18 = vmax.f32 %v8710_v11, 0.0  ;;  %8644 = vmatpush3.bf16.msra.mxu1 %v8977_v62 }
 0x634   : > { %v3593_v20 = vpack.c.bf16 %v3559_v59, %v3558_v16  ;;  %8637 = vmatprep.subr.bf16.mxu1 %v8978_v10 }
 0x635   : > { %v3592_v26 = vpack.c.bf16 %v3557_v18, %v3556_v17  ;;  %v8095_v29 = vpop.f32.mrb[188].mxu1  ;;  %v8979_v17 = vld [vmem:[%s10732_s2 + $0x1d8] sm:$0xff]  }
 0x636   : > { %v8711_v30 = vadd.f32 %v8095_v29, %v9847_v25  ;;  %v3421_v23 = vpop.f32.mrb[189].mxu1 }
 0x637   : > { %v8712_v31 = vadd.f32 %v9847_v25, %v3421_v23  ;;  %v8096_v36 = vpop.f32.mrb[190].mxu1  ;;  %8169 = vmatprep.mubr.bf16.mxu0 %v3592_v26  ;;  %8645 = vmatpush3.bf16.msra.mxu1 %v8978_v10 }
 0x638   : > { %v8713_v37 = vadd.f32 %v8096_v36, %v9847_v25  ;;  %v3424_v38 = vpop.f32.mrb[191].mxu1  ;;  %8170 = vmatmul.mubr.bf16.gmra.mrb[248].mxu0 %v3593_v20  ;;  %v3562_v44 = vmax.f32 %v8711_v30, 0.0  ;;  %8638 = vmatprep.subr.bf16.mxu1 %v8979_v17  ;;  %v8980_v36 = vld [vmem:[%s10732_s2 + $0x1e0] sm:$0xff]  }
 0x639   : > { %v8714_v41 = vadd.f32 %v9847_v25, %v3424_v38  ;;  %v3560_v48 = vmax.f32 %v8712_v31, 0.0  ;;  %v9943_v25 = vld [vmem:[%s10733_s3 + $0x6] ss:$0 sm:$0xff] }
 0x63a   : > { %v3563_v47 = vmax.f32 %v8713_v37, 0.0 }
 0x63b   : > { %v3561_v54 = vmax.f32 %v8714_v41, 0.0  ;;  %8646 = vmatpush3.bf16.msra.mxu1 %v8979_v17 }
 0x63c   : > { %v3595_v55 = vpack.c.bf16 %v3563_v47, %v3562_v44  ;;  %8639 = vmatprep.subr.bf16.mxu1 %v8980_v36 }
 0x63d   : > { %v3594_v49 = vpack.c.bf16 %v3561_v54, %v3560_v48 }
 0x63f   : > { %8173 = vmatprep.mubr.bf16.mxu0 %v3594_v49  ;;  %8647 = vmatpush3.bf16.msra.mxu1 %v8980_v36 }
 0x640   : > { %8174 = vmatmul.mubr.bf16.gmra.mrb[252].mxu0 %v3595_v55  ;;  %v8981_v55 = vld [vmem:[%s10732_s2 + $0x1e8] sm:$0xff]  }
 0x641   : > { %8640 = vmatprep.subr.bf16.mxu1 %v8981_v55 }
 0x643   : > { %8648 = vmatpush3.bf16.msra.mxu1 %v8981_v55 }
 0x69b   : > { %v8115_v1 = vpop.f32.mrb[192].mxu0 }
 0x69c   : > { %v3709_v2 = vadd.f32 %v8115_v1, %v9943_v25  ;;  %v3700_v61 = vpop.f32.mrb[193].mxu0 }
 0x69d   : > { %v3701_v3 = vadd.f32 %v9943_v25, %v3700_v61  ;;  %v8116_v4 = vpop.f32.mrb[194].mxu0 }
 0x69e   : > { %v3712_v7 = vadd.f32 %v8116_v4, %v9943_v25  ;;  %v3703_v9 = vpop.f32.mrb[195].mxu0  ;;  %v3957_v16 = vmax.f32 %v3709_v2, 0.0 }
 0x69f   : > { %v3704_v11 = vadd.f32 %v9943_v25, %v3703_v9  ;;  %v3955_v18 = vmax.f32 %v3701_v3, 0.0 }
 0x6a0   : > { %v3958_v59 = vmax.f32 %v3712_v7, 0.0 }
 0x6a1   : > { %v3956_v20 = vmax.f32 %v3704_v11, 0.0 }
 0x6a2   : > { %v4020_v26 = vpack.c.bf16 %v3958_v59, %v3957_v16 }
 0x6a3   : > { %v4019_v29 = vpack.c.bf16 %v3956_v20, %v3955_v18  ;;  %v8119_v30 = vpop.f32.mrb[196].mxu0 }
 0x6a4   : > { %v3725_v23 = vadd.f32 %v8119_v30, %v9943_v25  ;;  %v3716_v31 = vpop.f32.mrb[197].mxu0 }
 0x6a5   : > { %v3717_v37 = vadd.f32 %v9943_v25, %v3716_v31  ;;  %v8120_v38 = vpop.f32.mrb[198].mxu0  ;;  %8193 = vmatprep.mubr.bf16.mxu0 %v4019_v29 }
 0x6a6   : > { %v3728_v41 = vadd.f32 %v8120_v38, %v9943_v25  ;;  %v3719_v44 = vpop.f32.mrb[199].mxu0  ;;  %8194 = vmatmul.mubr.bf16.vlgmr.msra.gmra.mrb[0].mxu0 %v4020_v26  ;;  %v3961_v48 = vmax.f32 %v3725_v23, 0.0  ;;  %v8983_v26 = vld [vmem:[%s10732_s2 + $0x1f8] sm:$0xff]  }
 0x6a7   : > { %v3720_v47 = vadd.f32 %v9943_v25, %v3719_v44  ;;  %8258 = vmatpush3.bf16.msra.mxu0 %v8976_v60  ;;  %v3959_v49 = vmax.f32 %v3717_v37, 0.0  ;;  %v8982_v60 = vld [vmem:[%s10732_s2 + $0x1f0] sm:$0xff]  }
 0x6a8   : > { %v3962_v54 = vmax.f32 %v3728_v41, 0.0  ;;  %8259 = vmatprep.subr.bf16.mxu0 %v8977_v62  ;;  %8641 = vmatprep.subr.bf16.mxu1 %v8982_v60 }
 0x6a9   : > { %v3960_v1 = vmax.f32 %v3720_v47, 0.0  ;;  %8649 = vmatpush3.bf16.msra.mxu1 %v8982_v60 }
 0x6aa   : > { %v4022_v2 = vpack.c.bf16 %v3962_v54, %v3961_v48  ;;  %8642 = vmatprep.subr.bf16.mxu1 %v8983_v26 }
 0x6ab   : > { %v4021_v61 = vpack.c.bf16 %v3960_v1, %v3959_v49  ;;  %v8123_v3 = vpop.f32.mrb[200].mxu0  ;;  %8260 = vmatpush3.bf16.msra.mxu0 %v8977_v62 }
 0x6ac   : > { %v3741_v4 = vadd.f32 %v8123_v3, %v9943_v25  ;;  %v3732_v7 = vpop.f32.mrb[201].mxu0  ;;  %8261 = vmatprep.subr.bf16.mxu0 %v8978_v10 }
 0x6ad   : > { %v3733_v9 = vadd.f32 %v9943_v25, %v3732_v7  ;;  %v8124_v11 = vpop.f32.mrb[202].mxu0  ;;  %8197 = vmatprep.mubr.bf16.mxu0 %v4021_v61  ;;  %8650 = vmatpush3.bf16.msra.mxu1 %v8983_v26 }
 0x6ae   : > { %v3744_v16 = vadd.f32 %v8124_v11, %v9943_v25  ;;  %v3735_v59 = vpop.f32.mrb[203].mxu0  ;;  %8198 = vmatmul.mubr.bf16.gmra.mrb[4].mxu0 %v4022_v2  ;;  %v3965_v18 = vmax.f32 %v3741_v4, 0.0 }
 0x6af   : > { %v3736_v62 = vadd.f32 %v9943_v25, %v3735_v59  ;;  %8262 = vmatpush3.bf16.msra.mxu0 %v8978_v10  ;;  %v3963_v29 = vmax.f32 %v3733_v9, 0.0 }
 0x6b0   : > { %v3966_v20 = vmax.f32 %v3744_v16, 0.0  ;;  %8263 = vmatprep.subr.bf16.mxu0 %v8979_v17 }
 0x6b1   : > { %v3964_v30 = vmax.f32 %v3736_v62, 0.0 }
 0x6b2   : > { %v4024_v23 = vpack.c.bf16 %v3966_v20, %v3965_v18 }
 0x6b3   : > { %v4023_v31 = vpack.c.bf16 %v3964_v30, %v3963_v29  ;;  %v8127_v37 = vpop.f32.mrb[204].mxu0  ;;  %8264 = vmatpush3.bf16.msra.mxu0 %v8979_v17 }
 0x6b4   : > { %v3757_v38 = vadd.f32 %v8127_v37, %v9943_v25  ;;  %v3748_v41 = vpop.f32.mrb[205].mxu0  ;;  %8265 = vmatprep.subr.bf16.mxu0 %v8980_v36 }
 0x6b5   : > { %v3749_v10 = vadd.f32 %v9943_v25, %v3748_v41  ;;  %v8128_v44 = vpop.f32.mrb[206].mxu0  ;;  %8201 = vmatprep.mubr.bf16.mxu0 %v4023_v31 }
 0x6b6   : > { %v3760_v47 = vadd.f32 %v8128_v44, %v9943_v25  ;;  %v3751_v48 = vpop.f32.mrb[207].mxu0  ;;  %8202 = vmatmul.mubr.bf16.gmra.mrb[8].mxu0 %v4024_v23  ;;  %v3969_v49 = vmax.f32 %v3757_v38, 0.0 }
 0x6b7   : > { %v3752_v54 = vadd.f32 %v9943_v25, %v3751_v48  ;;  %8266 = vmatpush3.bf16.msra.mxu0 %v8980_v36  ;;  %v3967_v17 = vmax.f32 %v3749_v10, 0.0 }
 0x6b8   : > { %v3970_v1 = vmax.f32 %v3760_v47, 0.0  ;;  %8267 = vmatprep.subr.bf16.mxu0 %v8981_v55 }
 0x6b9   : > { %v3968_v2 = vmax.f32 %v3752_v54, 0.0 }
 0x6ba   : > { %v4026_v61 = vpack.c.bf16 %v3970_v1, %v3969_v49 }
 0x6bb   : > { %v4025_v3 = vpack.c.bf16 %v3968_v2, %v3967_v17  ;;  %v8131_v4 = vpop.f32.mrb[208].mxu0  ;;  %8268 = vmatpush3.bf16.msra.mxu0 %v8981_v55 }
 0x6bc   : > { %v3773_v7 = vadd.f32 %v8131_v4, %v9943_v25  ;;  %v3764_v9 = vpop.f32.mrb[209].mxu0  ;;  %8269 = vmatprep.subr.bf16.mxu0 %v8982_v60 }
 0x6bd   : > { %v3765_v11 = vadd.f32 %v9943_v25, %v3764_v9  ;;  %v8132_v16 = vpop.f32.mrb[210].mxu0  ;;  %8205 = vmatprep.mubr.bf16.mxu0 %v4025_v3 }
 0x6be   : > { %v3776_v59 = vadd.f32 %v8132_v16, %v9943_v25  ;;  %v3767_v36 = vpop.f32.mrb[211].mxu0  ;;  %8206 = vmatmul.mubr.bf16.gmra.mrb[12].mxu0 %v4026_v61  ;;  %v3973_v18 = vmax.f32 %v3773_v7, 0.0 }
 0x6bf   : > { %v3768_v62 = vadd.f32 %v9943_v25, %v3767_v36  ;;  %8270 = vmatpush3.bf16.msra.mxu0 %v8982_v60  ;;  %v3971_v29 = vmax.f32 %v3765_v11, 0.0 }
 0x6c0   : > { %v3974_v20 = vmax.f32 %v3776_v59, 0.0  ;;  %8271 = vmatprep.subr.bf16.mxu0 %v8983_v26 }
 0x6c1   : > { %v3972_v55 = vmax.f32 %v3768_v62, 0.0 }
 0x6c2   : > { %v4028_v30 = vpack.c.bf16 %v3974_v20, %v3973_v18 }
 0x6c3   : > { %v4027_v23 = vpack.c.bf16 %v3972_v55, %v3971_v29  ;;  %v8135_v31 = vpop.f32.mrb[212].mxu0  ;;  %8272 = vmatpush3.bf16.msra.mxu0 %v8983_v26 }
 0x6c4   : > { %v3789_v37 = vadd.f32 %v8135_v31, %v9943_v25  ;;  %v3780_v38 = vpop.f32.mrb[213].mxu0 }
 0x6c5   : > { %v3781_v41 = vadd.f32 %v9943_v25, %v3780_v38  ;;  %v8136_v10 = vpop.f32.mrb[214].mxu0  ;;  %8209 = vmatprep.mubr.bf16.mxu0 %v4027_v23 }
 0x6c6   : > { %v3792_v44 = vadd.f32 %v8136_v10, %v9943_v25  ;;  %v3783_v47 = vpop.f32.mrb[215].mxu0  ;;  %8210 = vmatmul.mubr.bf16.gmra.mrb[16].mxu0 %v4028_v30  ;;  %v3977_v48 = vmax.f32 %v3789_v37, 0.0 }
 0x6c7   : > { %v3784_v60 = vadd.f32 %v9943_v25, %v3783_v47  ;;  %v3975_v49 = vmax.f32 %v3781_v41, 0.0 }
 0x6c8   : > { %v3978_v54 = vmax.f32 %v3792_v44, 0.0 }
 0x6c9   : > { %v3976_v1 = vmax.f32 %v3784_v60, 0.0 }
 0x6ca   : > { %v4030_v17 = vpack.c.bf16 %v3978_v54, %v3977_v48 }
 0x6cb   : > { %v4029_v2 = vpack.c.bf16 %v3976_v1, %v3975_v49  ;;  %v8139_v26 = vpop.f32.mrb[216].mxu0 }
 0x6cc   : > { %v3805_v61 = vadd.f32 %v8139_v26, %v9943_v25  ;;  %v3796_v3 = vpop.f32.mrb[217].mxu0 }
 0x6cd   : > { %v3797_v4 = vadd.f32 %v9943_v25, %v3796_v3  ;;  %v8140_v7 = vpop.f32.mrb[218].mxu0  ;;  %8213 = vmatprep.mubr.bf16.mxu0 %v4029_v2 }
 0x6ce   : > { %v3808_v9 = vadd.f32 %v8140_v7, %v9943_v25  ;;  %v3799_v11 = vpop.f32.mrb[219].mxu0  ;;  %8214 = vmatmul.mubr.bf16.gmra.mrb[20].mxu0 %v4030_v17  ;;  %v3981_v59 = vmax.f32 %v3805_v61, 0.0 }
 0x6cf   : > { %v3800_v16 = vadd.f32 %v9943_v25, %v3799_v11  ;;  %v3979_v62 = vmax.f32 %v3797_v4, 0.0 }
 0x6d0   : > { %v3982_v36 = vmax.f32 %v3808_v9, 0.0 }
 0x6d1   : > { %v3980_v18 = vmax.f32 %v3800_v16, 0.0 }
 0x6d2   : > { %v4032_v20 = vpack.c.bf16 %v3982_v36, %v3981_v59 }
 0x6d3   : > { %v4031_v29 = vpack.c.bf16 %v3980_v18, %v3979_v62  ;;  %v8143_v55 = vpop.f32.mrb[220].mxu0 }
 0x6d4   : > { %v3821_v30 = vadd.f32 %v8143_v55, %v9943_v25  ;;  %v3812_v23 = vpop.f32.mrb[221].mxu0 }
 0x6d5   : > { %v3813_v31 = vadd.f32 %v9943_v25, %v3812_v23  ;;  %v8144_v37 = vpop.f32.mrb[222].mxu0  ;;  %8217 = vmatprep.mubr.bf16.mxu0 %v4031_v29 }
 0x6d6   : > { %v3824_v38 = vadd.f32 %v8144_v37, %v9943_v25  ;;  %v3815_v41 = vpop.f32.mrb[223].mxu0  ;;  %8218 = vmatmul.mubr.bf16.gmra.mrb[24].mxu0 %v4032_v20  ;;  %v3985_v44 = vmax.f32 %v3821_v30, 0.0 }
 0x6d7   : > { %v3816_v10 = vadd.f32 %v9943_v25, %v3815_v41  ;;  %v3983_v60 = vmax.f32 %v3813_v31, 0.0 }
 0x6d8   : > { %v3986_v47 = vmax.f32 %v3824_v38, 0.0 }
 0x6d9   : > { %v3984_v48 = vmax.f32 %v3816_v10, 0.0 }
 0x6da   : > { %v4034_v54 = vpack.c.bf16 %v3986_v47, %v3985_v44 }
 0x6db   : > { %v4033_v49 = vpack.c.bf16 %v3984_v48, %v3983_v60  ;;  %v8147_v1 = vpop.f32.mrb[224].mxu0 }
 0x6dc   : > { %v3837_v17 = vadd.f32 %v8147_v1, %v9943_v25  ;;  %v3828_v2 = vpop.f32.mrb[225].mxu0 }
 0x6dd   : > { %v3829_v26 = vadd.f32 %v9943_v25, %v3828_v2  ;;  %v8148_v61 = vpop.f32.mrb[226].mxu0  ;;  %8221 = vmatprep.mubr.bf16.mxu0 %v4033_v49 }
 0x6de   : > { %v3840_v3 = vadd.f32 %v8148_v61, %v9943_v25  ;;  %v3831_v4 = vpop.f32.mrb[227].mxu0  ;;  %8222 = vmatmul.mubr.bf16.gmra.mrb[28].mxu0 %v4034_v54  ;;  %v3989_v9 = vmax.f32 %v3837_v17, 0.0 }
 0x6df   : > { %v3832_v7 = vadd.f32 %v9943_v25, %v3831_v4  ;;  %v3987_v16 = vmax.f32 %v3829_v26, 0.0 }
 0x6e0   : > { %v3990_v11 = vmax.f32 %v3840_v3, 0.0 }
 0x6e1   : > { %v3988_v59 = vmax.f32 %v3832_v7, 0.0 }
 0x6e2   : > { %v4036_v36 = vpack.c.bf16 %v3990_v11, %v3989_v9 }
 0x6e3   : > { %v4035_v62 = vpack.c.bf16 %v3988_v59, %v3987_v16  ;;  %v8151_v18 = vpop.f32.mrb[228].mxu0 }
 0x6e4   : > { %v3853_v20 = vadd.f32 %v8151_v18, %v9943_v25  ;;  %v3844_v29 = vpop.f32.mrb[229].mxu0 }
 0x6e5   : > { %v3845_v55 = vadd.f32 %v9943_v25, %v3844_v29  ;;  %v8152_v30 = vpop.f32.mrb[230].mxu0  ;;  %8225 = vmatprep.mubr.bf16.mxu0 %v4035_v62 }
 0x6e6   : > { %v3856_v23 = vadd.f32 %v8152_v30, %v9943_v25  ;;  %v3847_v31 = vpop.f32.mrb[231].mxu0  ;;  %8226 = vmatmul.mubr.bf16.gmra.mrb[32].mxu0 %v4036_v36  ;;  %v3993_v38 = vmax.f32 %v3853_v20, 0.0 }
 0x6e7   : > { %v3848_v37 = vadd.f32 %v9943_v25, %v3847_v31  ;;  %v3991_v10 = vmax.f32 %v3845_v55, 0.0 }
 0x6e8   : > { %v3994_v41 = vmax.f32 %v3856_v23, 0.0 }
 0x6e9   : > { %v3992_v44 = vmax.f32 %v3848_v37, 0.0 }
 0x6ea   : > { %v4038_v47 = vpack.c.bf16 %v3994_v41, %v3993_v38 }
 0x6eb   : > { %v4037_v60 = vpack.c.bf16 %v3992_v44, %v3991_v10  ;;  %v8155_v48 = vpop.f32.mrb[232].mxu0 }
 0x6ec   : > { %v3869_v54 = vadd.f32 %v8155_v48, %v9943_v25  ;;  %v3860_v49 = vpop.f32.mrb[233].mxu0 }
 0x6ed   : > { %v3861_v1 = vadd.f32 %v9943_v25, %v3860_v49  ;;  %v8156_v17 = vpop.f32.mrb[234].mxu0  ;;  %8229 = vmatprep.mubr.bf16.mxu0 %v4037_v60 }
 0x6ee   : > { %v3872_v2 = vadd.f32 %v8156_v17, %v9943_v25  ;;  %v3863_v26 = vpop.f32.mrb[235].mxu0  ;;  %8230 = vmatmul.mubr.bf16.gmra.mrb[36].mxu0 %v4038_v47  ;;  %v3997_v3 = vmax.f32 %v3869_v54, 0.0 }
 0x6ef   : > { %v3864_v61 = vadd.f32 %v9943_v25, %v3863_v26  ;;  %v3995_v7 = vmax.f32 %v3861_v1, 0.0 }
 0x6f0   : > { %v3998_v4 = vmax.f32 %v3872_v2, 0.0 }
 0x6f1   : > { %v3996_v9 = vmax.f32 %v3864_v61, 0.0 }
 0x6f2   : > { %v4040_v11 = vpack.c.bf16 %v3998_v4, %v3997_v3 }
 0x6f3   : > { %v4039_v16 = vpack.c.bf16 %v3996_v9, %v3995_v7  ;;  %v8159_v59 = vpop.f32.mrb[236].mxu0 }
 0x6f4   : > { %v3885_v36 = vadd.f32 %v8159_v59, %v9943_v25  ;;  %v3876_v62 = vpop.f32.mrb[237].mxu0 }
 0x6f5   : > { %v3877_v18 = vadd.f32 %v9943_v25, %v3876_v62  ;;  %v8160_v20 = vpop.f32.mrb[238].mxu0  ;;  %8233 = vmatprep.mubr.bf16.mxu0 %v4039_v16 }
 0x6f6   : > { %v3888_v29 = vadd.f32 %v8160_v20, %v9943_v25  ;;  %v3879_v55 = vpop.f32.mrb[239].mxu0  ;;  %8234 = vmatmul.mubr.bf16.gmra.mrb[40].mxu0 %v4040_v11  ;;  %v4001_v23 = vmax.f32 %v3885_v36, 0.0 }
 0x6f7   : > { %v3880_v30 = vadd.f32 %v9943_v25, %v3879_v55  ;;  %v3999_v37 = vmax.f32 %v3877_v18, 0.0 }
 0x6f8   : > { %v4002_v31 = vmax.f32 %v3888_v29, 0.0 }
 0x6f9   : > { %v4000_v38 = vmax.f32 %v3880_v30, 0.0 }
 0x6fa   : > { %v4042_v41 = vpack.c.bf16 %v4002_v31, %v4001_v23 }
 0x6fb   : > { %v4041_v10 = vpack.c.bf16 %v4000_v38, %v3999_v37  ;;  %v8163_v44 = vpop.f32.mrb[240].mxu0 }
 0x6fc   : > { %v3901_v47 = vadd.f32 %v8163_v44, %v9943_v25  ;;  %v3892_v60 = vpop.f32.mrb[241].mxu0 }
 0x6fd   : > { %v3893_v48 = vadd.f32 %v9943_v25, %v3892_v60  ;;  %v8164_v54 = vpop.f32.mrb[242].mxu0  ;;  %8237 = vmatprep.mubr.bf16.mxu0 %v4041_v10 }
 0x6fe   : > { %v3904_v49 = vadd.f32 %v8164_v54, %v9943_v25  ;;  %v3895_v1 = vpop.f32.mrb[243].mxu0  ;;  %8238 = vmatmul.mubr.bf16.gmra.mrb[44].mxu0 %v4042_v41  ;;  %v4005_v2 = vmax.f32 %v3901_v47, 0.0 }
 0x6ff   : > { %v3896_v17 = vadd.f32 %v9943_v25, %v3895_v1  ;;  %v4003_v61 = vmax.f32 %v3893_v48, 0.0 }
 0x700   : > { %v4006_v26 = vmax.f32 %v3904_v49, 0.0 }
 0x701   : > { %v4004_v3 = vmax.f32 %v3896_v17, 0.0 }
 0x702   : > { %v4044_v4 = vpack.c.bf16 %v4006_v26, %v4005_v2 }
 0x703   : > { %v4043_v7 = vpack.c.bf16 %v4004_v3, %v4003_v61  ;;  %v8167_v9 = vpop.f32.mrb[244].mxu0 }
 0x704   : > { %v3917_v11 = vadd.f32 %v8167_v9, %v9943_v25  ;;  %v3908_v16 = vpop.f32.mrb[245].mxu0 }
 0x705   : > { %v3909_v59 = vadd.f32 %v9943_v25, %v3908_v16  ;;  %v8168_v36 = vpop.f32.mrb[246].mxu0  ;;  %8241 = vmatprep.mubr.bf16.mxu0 %v4043_v7 }
 0x706   : > { %v3920_v62 = vadd.f32 %v8168_v36, %v9943_v25  ;;  %v3911_v18 = vpop.f32.mrb[247].mxu0  ;;  %8242 = vmatmul.mubr.bf16.gmra.mrb[48].mxu0 %v4044_v4  ;;  %v4009_v29 = vmax.f32 %v3917_v11, 0.0 }
 0x707   : > { %v3912_v20 = vadd.f32 %v9943_v25, %v3911_v18  ;;  %v4007_v30 = vmax.f32 %v3909_v59, 0.0 }
 0x708   : > { %v4010_v55 = vmax.f32 %v3920_v62, 0.0 }
 0x709   : > { %v4008_v23 = vmax.f32 %v3912_v20, 0.0 }
 0x70a   : > { %v4046_v31 = vpack.c.bf16 %v4010_v55, %v4009_v29 }
 0x70b   : > { %v4045_v37 = vpack.c.bf16 %v4008_v23, %v4007_v30  ;;  %v8171_v38 = vpop.f32.mrb[248].mxu0  ;;  %v8984_v23 = vld [vmem:[%s10734_s4] sm:$0x3f]  }
 0x70c   : > { %v3933_v41 = vadd.f32 %v8171_v38, %v9943_v25  ;;  %v3924_v10 = vpop.f32.mrb[249].mxu0  ;;  %8909 = vmatprep.subr.msk.bf16.mxu0 %vm569_vm0, %v8984_v23 }
 0x70d   : > { %v3925_v44 = vadd.f32 %v9943_v25, %v3924_v10  ;;  %v8172_v47 = vpop.f32.mrb[250].mxu0  ;;  %8245 = vmatprep.mubr.bf16.mxu0 %v4045_v37 }
 0x70e   : > { %v3936_v60 = vadd.f32 %v8172_v47, %v9943_v25  ;;  %v3927_v48 = vpop.f32.mrb[251].mxu0  ;;  %8246 = vmatmul.mubr.bf16.gmra.mrb[52].mxu0 %v4046_v31  ;;  %v4013_v49 = vmax.f32 %v3933_v41, 0.0  ;;  %v10034_v31 = vld [vmem:[%s10733_s3 + $0x7] ss:$0 sm:$0xff] }
 0x70f   : > { %v3928_v54 = vadd.f32 %v9943_v25, %v3927_v48  ;;  %v4011_v17 = vmax.f32 %v3925_v44, 0.0 }
 0x710   : > { %v4014_v1 = vmax.f32 %v3936_v60, 0.0 }
 0x711   : > { %v4012_v2 = vmax.f32 %v3928_v54, 0.0 }
 0x712   : > { %v4048_v26 = vpack.c.bf16 %v4014_v1, %v4013_v49 }
 0x713   : > { %v4047_v61 = vpack.c.bf16 %v4012_v2, %v4011_v17  ;;  %v8175_v3 = vpop.f32.mrb[252].mxu0 }
 0x714   : > { %v3949_v4 = vadd.f32 %v8175_v3, %v9943_v25  ;;  %v3940_v7 = vpop.f32.mrb[253].mxu0 }
 0x715   : > { %v3941_v9 = vadd.f32 %v9943_v25, %v3940_v7  ;;  %v8176_v11 = vpop.f32.mrb[254].mxu0  ;;  %8249 = vmatprep.mubr.bf16.mxu0 %v4047_v61  ;;  %v8985_v7 = vld [vmem:[%s10735_s5] sm:$0xff]  }
 0x716   : > { %v3952_v16 = vadd.f32 %v8176_v11, %v9943_v25  ;;  %v3943_v59 = vpop.f32.mrb[255].mxu0  ;;  %8250 = vmatmul.mubr.bf16.gmra.mrb[56].mxu0 %v4048_v26  ;;  %v4017_v62 = vmax.f32 %v3949_v4, 0.0  ;;  %v4937_v4 = vsel %vm569_vm0, %v8984_v23, 0 }
 0x717   : > { %v3944_v36 = vadd.f32 %v9943_v25, %v3943_v59  ;;  %v4015_v20 = vmax.f32 %v3941_v9, 0.0 }
 0x718   : > { %v4018_v18 = vmax.f32 %v3952_v16, 0.0 }
 0x719   : > { %v4016_v29 = vmax.f32 %v3944_v36, 0.0 }
 0x71a   : > { %v4050_v55 = vpack.c.bf16 %v4018_v18, %v4017_v62 }
 0x71b   : > { %v4049_v30 = vpack.c.bf16 %v4016_v29, %v4015_v20 }
 0x71d   : > { %8253 = vmatprep.mubr.bf16.mxu0 %v4049_v30 }
 0x71e   : > { %8254 = vmatmul.mubr.bf16.gmra.mrb[60].mxu0 %v4050_v55 }
 0x779   : > { %v8195_v25 = vpop.f32.mrb[0].mxu0 }
 0x77a   : > { %v4164_v37 = vadd.f32 %v8195_v25, %v10034_v31  ;;  %v4155_v38 = vpop.f32.mrb[1].mxu0 }
 0x77b   : > { %v4156_v41 = vadd.f32 %v10034_v31, %v4155_v38  ;;  %v8196_v10 = vpop.f32.mrb[2].mxu0  ;;  %v8986_v38 = vld [vmem:[%s10735_s5 + $0x8] sm:$0xff]  }
 0x77c   : > { %v4167_v44 = vadd.f32 %v8196_v10, %v10034_v31  ;;  %v4158_v47 = vpop.f32.mrb[3].mxu0  ;;  %v4412_v48 = vmax.f32 %v4164_v37, 0.0 }
 0x77d   : > { %v4159_v60 = vadd.f32 %v10034_v31, %v4158_v47  ;;  %v4410_v49 = vmax.f32 %v4156_v41, 0.0 }
 0x77e   : > { %v4413_v54 = vmax.f32 %v4167_v44, 0.0 }
 0x77f   : > { %v4411_v1 = vmax.f32 %v4159_v60, 0.0 }
 0x780   : > { %v10040_v17 = vpack.c.bf16 %v4413_v54, %v4412_v48  ;;  %v8987_v54 = vld [vmem:[%s10735_s5 + $0x10] sm:$0xff]  }
 0x781   : > { %v10042_v2 = vpack.c.bf16 %v4411_v1, %v4410_v49  ;;  %v8199_v26 = vpop.f32.mrb[4].mxu0 }
 0x782   : > { %v4180_v61 = vadd.f32 %v8199_v26, %v10034_v31  ;;  %v4171_v3 = vpop.f32.mrb[5].mxu0 }
 0x783   : > { %v4172_v9 = vadd.f32 %v10034_v31, %v4171_v3  ;;  %v8200_v11 = vpop.f32.mrb[6].mxu0  ;;  %8273 = vmatprep.mubr.bf16.mxu0 %v10042_v2 }
 0x784   : > { %v4183_v16 = vadd.f32 %v8200_v11, %v10034_v31  ;;  %v4174_v59 = vpop.f32.mrb[7].mxu0  ;;  %8274 = vmatmul.mubr.bf16.vlgmr.msra.gmra.mrb[64].mxu0 %v10040_v17  ;;  %v4416_v62 = vmax.f32 %v4180_v61, 0.0 }
 0x785   : > { %v4175_v36 = vadd.f32 %v10034_v31, %v4174_v59  ;;  %8338 = vmatpush3.bf16.msra.mxu0 %v4937_v4  ;;  %8339 = vmatprep.mubr.msk.bf16.mxu0 %vm472_vm1, %v9103_v8  ;;  %v4414_v20 = vmax.f32 %v4172_v9, 0.0 }
 0x786   : > { %v4417_v18 = vmax.f32 %v4183_v16, 0.0  ;;  %8403 = vmatprep.subr.bf16.mxu0 %v8985_v7 }
 0x787   : > { %v4415_v29 = vmax.f32 %v4175_v36, 0.0 }
 0x788   : > { %v10056_v55 = vpack.c.bf16 %v4417_v18, %v4416_v62  ;;  %v8989_v18 = vld [vmem:[%s10735_s5 + $0x20] sm:$0xff]  }
 0x789   : > { %v10058_v30 = vpack.c.bf16 %v4415_v29, %v4414_v20  ;;  %v8203_v23 = vpop.f32.mrb[8].mxu0 }
 0x78a   : > { %v4196_v25 = vadd.f32 %v8203_v23, %v10034_v31  ;;  %v4187_v37 = vpop.f32.mrb[9].mxu0 }
 0x78b   : > { %v4188_v41 = vadd.f32 %v10034_v31, %v4187_v37  ;;  %v8204_v8 = vpop.f32.mrb[10].mxu0  ;;  %8277 = vmatprep.mubr.bf16.mxu1 %v10058_v30 }
 0x78c   : > { %v4199_v10 = vadd.f32 %v8204_v8, %v10034_v31  ;;  %v4190_v44 = vpop.f32.mrb[11].mxu0  ;;  %8278 = vmatmul.mubr.bf16.vlgmr.msra.gmra.mrb[192].mxu1 %v10056_v55  ;;  %8340 = vmatmul.mubr.msk.bf16.vlgmr.msra.gmra.mrb[68].mxu0 %vm472_vm1, %v9108_v12  ;;  %v4420_v60 = vmax.f32 %v4196_v25, 0.0 }
 0x78d   : > { %v4191_v47 = vadd.f32 %v10034_v31, %v4190_v44  ;;  %8404 = vmatpush3.bf16.msra.mxu0 %v8985_v7  ;;  %8343 = vmatprep.mubr.msk.bf16.mxu0 %vm472_vm1, %v9110_v13  ;;  %v4418_v49 = vmax.f32 %v4188_v41, 0.0  ;;  %v8988_v13 = vld [vmem:[%s10735_s5 + $0x18] sm:$0xff]  }
 0x78e   : > { %v4421_v48 = vmax.f32 %v4199_v10, 0.0  ;;  %8405 = vmatprep.subr.bf16.mxu0 %v8986_v38 }
 0x78f   : > { %v4419_v1 = vmax.f32 %v4191_v47, 0.0 }
 0x790   : > { %v10076_v26 = vpack.c.bf16 %v4421_v48, %v4420_v60 }
 0x791   : > { %v10078_v61 = vpack.c.bf16 %v4419_v1, %v4418_v49  ;;  %v8207_v12 = vpop.f32.mrb[12].mxu0  ;;  %8406 = vmatpush3.bf16.msra.mxu0 %v8986_v38 }
 0x792   : > { %v4212_v3 = vadd.f32 %v8207_v12, %v10034_v31  ;;  %v4203_v4 = vpop.f32.mrb[13].mxu0  ;;  %8407 = vmatprep.subr.bf16.mxu0 %v8987_v54 }
 0x793   : > { %v4204_v7 = vadd.f32 %v10034_v31, %v4203_v4  ;;  %v8208_v9 = vpop.f32.mrb[14].mxu0  ;;  %8281 = vmatprep.mubr.bf16.mxu1 %v10078_v61 }
 0x794   : > { %v4215_v11 = vadd.f32 %v8208_v9, %v10034_v31  ;;  %v4206_v16 = vpop.f32.mrb[15].mxu0  ;;  %8282 = vmatmul.mubr.bf16.gmra.mrb[196].mxu1 %v10076_v26  ;;  %8344 = vmatmul.mubr.msk.bf16.gmra.mrb[72].mxu0 %vm472_vm1, %v9125_v19  ;;  %v4424_v36 = vmax.f32 %v4212_v3, 0.0 }
 0x795   : > { %v4207_v59 = vadd.f32 %v10034_v31, %v4206_v16  ;;  %8347 = vmatprep.mubr.msk.bf16.mxu0 %vm472_vm1, %v9130_v21  ;;  %8408 = vmatpush3.bf16.msra.mxu0 %v8987_v54  ;;  %v4422_v20 = vmax.f32 %v4204_v7, 0.0  ;;  %v8990_v21 = vld [vmem:[%s10735_s5 + $0x28] sm:$0xff]   ;;  %v8991_v54 = vld [vmem:[%s10735_s5 + $0x30] sm:$0xff]  }
 0x796   : > { %v4425_v62 = vmax.f32 %v4215_v11, 0.0  ;;  %8409 = vmatprep.subr.bf16.mxu0 %v8988_v13 }
 0x797   : > { %v4423_v29 = vmax.f32 %v4207_v59, 0.0 }
 0x798   : > { %v10096_v23 = vpack.c.bf16 %v4425_v62, %v4424_v36 }
 0x799   : > { %v10098_v25 = vpack.c.bf16 %v4423_v29, %v4422_v20  ;;  %v8211_v19 = vpop.f32.mrb[16].mxu0  ;;  %8410 = vmatpush3.bf16.msra.mxu0 %v8988_v13 }
 0x79a   : > { %v4228_v37 = vadd.f32 %v8211_v19, %v10034_v31  ;;  %v4219_v38 = vpop.f32.mrb[17].mxu0  ;;  %8411 = vmatprep.subr.bf16.mxu0 %v8989_v18 }
 0x79b   : > { %v4220_v41 = vadd.f32 %v10034_v31, %v4219_v38  ;;  %v8212_v8 = vpop.f32.mrb[18].mxu0  ;;  %8285 = vmatprep.mubr.bf16.mxu1 %v10098_v25 }
 0x79c   : > { %v4231_v10 = vadd.f32 %v8212_v8, %v10034_v31  ;;  %v4222_v44 = vpop.f32.mrb[19].mxu0  ;;  %8286 = vmatmul.mubr.bf16.gmra.mrb[200].mxu1 %v10096_v23  ;;  %8348 = vmatmul.mubr.msk.bf16.gmra.mrb[76].mxu0 %vm472_vm1, %v9143_v27  ;;  %v4428_v60 = vmax.f32 %v4228_v37, 0.0 }
 0x79d   : > { %v4223_v47 = vadd.f32 %v10034_v31, %v4222_v44  ;;  %8351 = vmatprep.mubr.msk.bf16.mxu0 %vm472_vm1, %v9145_v28  ;;  %8412 = vmatpush3.bf16.msra.mxu0 %v8989_v18  ;;  %v4426_v49 = vmax.f32 %v4220_v41, 0.0  ;;  %v8992_v28 = vld [vmem:[%s10735_s5 + $0x38] sm:$0xff]  }
 0x79e   : > { %v4429_v48 = vmax.f32 %v4231_v10, 0.0  ;;  %8413 = vmatprep.subr.bf16.mxu0 %v8990_v21 }
 0x79f   : > { %v4427_v1 = vmax.f32 %v4223_v47, 0.0 }
 0x7a0   : > { %v10116_v12 = vpack.c.bf16 %v4429_v48, %v4428_v60 }
 0x7a1   : > { %v10118_v3 = vpack.c.bf16 %v4427_v1, %v4426_v49  ;;  %v8215_v27 = vpop.f32.mrb[20].mxu0  ;;  %8414 = vmatpush3.bf16.msra.mxu0 %v8990_v21 }
 0x7a2   : > { %v4244_v4 = vadd.f32 %v8215_v27, %v10034_v31  ;;  %v4235_v13 = vpop.f32.mrb[21].mxu0  ;;  %8415 = vmatprep.subr.bf16.mxu0 %v8991_v54 }
 0x7a3   : > { %v4236_v7 = vadd.f32 %v10034_v31, %v4235_v13  ;;  %v8216_v9 = vpop.f32.mrb[22].mxu0  ;;  %8289 = vmatprep.mubr.bf16.mxu1 %v10118_v3 }
 0x7a4   : > { %v4247_v11 = vadd.f32 %v8216_v9, %v10034_v31  ;;  %v4238_v16 = vpop.f32.mrb[23].mxu0  ;;  %8290 = vmatmul.mubr.bf16.gmra.mrb[204].mxu1 %v10116_v12  ;;  %8352 = vmatmul.mubr.msk.bf16.gmra.mrb[80].mxu0 %vm472_vm1, %v9155_v33  ;;  %v4432_v36 = vmax.f32 %v4244_v4, 0.0 }
 0x7a5   : > { %v4239_v59 = vadd.f32 %v10034_v31, %v4238_v16  ;;  %8355 = vmatprep.mubr.msk.bf16.mxu0 %vm472_vm1, %v9157_v34  ;;  %8416 = vmatpush3.bf16.msra.mxu0 %v8991_v54  ;;  %v4430_v18 = vmax.f32 %v4236_v7, 0.0 }
 0x7a6   : > { %v4433_v62 = vmax.f32 %v4247_v11, 0.0  ;;  %8417 = vmatprep.subr.bf16.mxu0 %v8992_v28 }
 0x7a7   : > { %v4431_v20 = vmax.f32 %v4239_v59, 0.0 }
 0x7a8   : > { %v10133_v29 = vpack.c.bf16 %v4433_v62, %v4432_v36 }
 0x7a9   : > { %v10135_v19 = vpack.c.bf16 %v4431_v20, %v4430_v18  ;;  %v8219_v37 = vpop.f32.mrb[24].mxu0  ;;  %8418 = vmatpush3.bf16.msra.mxu0 %v8992_v28 }
 0x7aa   : > { %v4260_v38 = vadd.f32 %v8219_v37, %v10034_v31  ;;  %v4251_v33 = vpop.f32.mrb[25].mxu0 }
 0x7ab   : > { %v4252_v21 = vadd.f32 %v10034_v31, %v4251_v33  ;;  %v8220_v41 = vpop.f32.mrb[26].mxu0  ;;  %8293 = vmatprep.mubr.bf16.mxu1 %v10135_v19 }
 0x7ac   : > { %v4263_v34 = vadd.f32 %v8220_v41, %v10034_v31  ;;  %v4254_v8 = vpop.f32.mrb[27].mxu0  ;;  %8294 = vmatmul.mubr.bf16.gmra.mrb[208].mxu1 %v10133_v29  ;;  %8356 = vmatmul.mubr.msk.bf16.gmra.mrb[84].mxu0 %vm472_vm1, %v9167_v39  ;;  %v4436_v44 = vmax.f32 %v4260_v38, 0.0 }
 0x7ad   : > { %v4255_v10 = vadd.f32 %v10034_v31, %v4254_v8  ;;  %8359 = vmatprep.mubr.msk.bf16.mxu0 %vm472_vm1, %v9169_v40  ;;  %v4434_v60 = vmax.f32 %v4252_v21, 0.0 }
 0x7ae   : > { %v4437_v47 = vmax.f32 %v4263_v34, 0.0 }
 0x7af   : > { %v4435_v48 = vmax.f32 %v4255_v10, 0.0 }
 0x7b0   : > { %v10147_v54 = vpack.c.bf16 %v4437_v47, %v4436_v44 }
 0x7b1   : > { %v10149_v49 = vpack.c.bf16 %v4435_v48, %v4434_v60  ;;  %v8223_v1 = vpop.f32.mrb[28].mxu0 }
 0x7b2   : > { %v4276_v27 = vadd.f32 %v8223_v1, %v10034_v31  ;;  %v4267_v4 = vpop.f32.mrb[29].mxu0 }
 0x7b3   : > { %v4268_v13 = vadd.f32 %v10034_v31, %v4267_v4  ;;  %v8224_v39 = vpop.f32.mrb[30].mxu0  ;;  %8297 = vmatprep.mubr.bf16.mxu1 %v10149_v49 }
 0x7b4   : > { %v4279_v28 = vadd.f32 %v8224_v39, %v10034_v31  ;;  %v4270_v40 = vpop.f32.mrb[31].mxu0  ;;  %8298 = vmatmul.mubr.bf16.gmra.mrb[212].mxu1 %v10147_v54  ;;  %8360 = vmatmul.mubr.msk.bf16.gmra.mrb[88].mxu0 %vm472_vm1, %v9179_v45  ;;  %v4440_v9 = vmax.f32 %v4276_v27, 0.0 }
 0x7b5   : > { %v4271_v7 = vadd.f32 %v10034_v31, %v4270_v40  ;;  %8363 = vmatprep.mubr.msk.bf16.mxu0 %vm472_vm1, %v9181_v46  ;;  %v4438_v16 = vmax.f32 %v4268_v13, 0.0 }
 0x7b6   : > { %v4441_v11 = vmax.f32 %v4279_v28, 0.0 }
 0x7b7   : > { %v4439_v59 = vmax.f32 %v4271_v7, 0.0 }
 0x7b8   : > { %v10161_v36 = vpack.c.bf16 %v4441_v11, %v4440_v9 }
 0x7b9   : > { %v10163_v62 = vpack.c.bf16 %v4439_v59, %v4438_v16  ;;  %v8227_v18 = vpop.f32.mrb[32].mxu0 }
 0x7ba   : > { %v4292_v20 = vadd.f32 %v8227_v18, %v10034_v31  ;;  %v4283_v37 = vpop.f32.mrb[33].mxu0 }
 0x7bb   : > { %v4284_v38 = vadd.f32 %v10034_v31, %v4283_v37  ;;  %v8228_v45 = vpop.f32.mrb[34].mxu0  ;;  %8301 = vmatprep.mubr.bf16.mxu1 %v10163_v62 }
 0x7bc   : > { %v4295_v33 = vadd.f32 %v8228_v45, %v10034_v31  ;;  %v4286_v46 = vpop.f32.mrb[35].mxu0  ;;  %8302 = vmatmul.mubr.bf16.gmra.mrb[216].mxu1 %v10161_v36  ;;  %8364 = vmatmul.mubr.msk.bf16.gmra.mrb[92].mxu0 %vm472_vm1, %v9191_v51  ;;  %v4444_v41 = vmax.f32 %v4292_v20, 0.0 }
 0x7bd   : > { %v4287_v21 = vadd.f32 %v10034_v31, %v4286_v46  ;;  %8367 = vmatprep.mubr.msk.bf16.mxu0 %vm472_vm1, %v9193_v52  ;;  %v4442_v8 = vmax.f32 %v4284_v38, 0.0 }
 0x7be   : > { %v4445_v34 = vmax.f32 %v4295_v33, 0.0 }
 0x7bf   : > { %v4443_v10 = vmax.f32 %v4287_v21, 0.0 }
 0x7c0   : > { %v10175_v44 = vpack.c.bf16 %v4445_v34, %v4444_v41 }
 0x7c1   : > { %v10177_v47 = vpack.c.bf16 %v4443_v10, %v4442_v8  ;;  %v8231_v60 = vpop.f32.mrb[36].mxu0 }
 0x7c2   : > { %v4308_v48 = vadd.f32 %v8231_v60, %v10034_v31  ;;  %v4299_v1 = vpop.f32.mrb[37].mxu0 }
 0x7c3   : > { %v4300_v27 = vadd.f32 %v10034_v31, %v4299_v1  ;;  %v8232_v51 = vpop.f32.mrb[38].mxu0  ;;  %8305 = vmatprep.mubr.bf16.mxu1 %v10177_v47 }
 0x7c4   : > { %v4311_v4 = vadd.f32 %v8232_v51, %v10034_v31  ;;  %v4302_v52 = vpop.f32.mrb[39].mxu0  ;;  %8306 = vmatmul.mubr.bf16.gmra.mrb[220].mxu1 %v10175_v44  ;;  %8368 = vmatmul.mubr.msk.bf16.gmra.mrb[96].mxu0 %vm472_vm1, %v9203_v57  ;;  %v4448_v39 = vmax.f32 %v4308_v48, 0.0 }
 0x7c5   : > { %v4303_v13 = vadd.f32 %v10034_v31, %v4302_v52  ;;  %8371 = vmatprep.mubr.msk.bf16.mxu0 %vm472_vm1, %v9205_v58  ;;  %v4446_v40 = vmax.f32 %v4300_v27, 0.0 }
 0x7c6   : > { %v4449_v28 = vmax.f32 %v4311_v4, 0.0 }
 0x7c7   : > { %v4447_v7 = vmax.f32 %v4303_v13, 0.0 }
 0x7c8   : > { %v10189_v9 = vpack.c.bf16 %v4449_v28, %v4448_v39 }
 0x7c9   : > { %v10191_v11 = vpack.c.bf16 %v4447_v7, %v4446_v40  ;;  %v8235_v16 = vpop.f32.mrb[40].mxu0 }
 0x7ca   : > { %v4324_v59 = vadd.f32 %v8235_v16, %v10034_v31  ;;  %v4315_v18 = vpop.f32.mrb[41].mxu0 }
 0x7cb   : > { %v4316_v20 = vadd.f32 %v10034_v31, %v4315_v18  ;;  %v8236_v57 = vpop.f32.mrb[42].mxu0  ;;  %8309 = vmatprep.mubr.bf16.mxu1 %v10191_v11 }
 0x7cc   : > { %v4327_v37 = vadd.f32 %v8236_v57, %v10034_v31  ;;  %v4318_v58 = vpop.f32.mrb[43].mxu0  ;;  %8310 = vmatmul.mubr.bf16.gmra.mrb[224].mxu1 %v10189_v9  ;;  %8372 = vmatmul.mubr.msk.bf16.gmra.mrb[100].mxu0 %vm472_vm1, %v9215_v63  ;;  %v4452_v45 = vmax.f32 %v4324_v59, 0.0 }
 0x7cd   : > { %v4319_v38 = vadd.f32 %v10034_v31, %v4318_v58  ;;  %8375 = vmatprep.mubr.msk.bf16.mxu0 %vm472_vm1, %v9217_v0  ;;  %v4450_v46 = vmax.f32 %v4316_v20, 0.0 }
 0x7ce   : > { %v4453_v33 = vmax.f32 %v4327_v37, 0.0 }
 0x7cf   : > { %v4451_v21 = vmax.f32 %v4319_v38, 0.0 }
 0x7d0   : > { %v10203_v41 = vpack.c.bf16 %v4453_v33, %v4452_v45 }
 0x7d1   : > { %v10205_v34 = vpack.c.bf16 %v4451_v21, %v4450_v46  ;;  %v8239_v8 = vpop.f32.mrb[44].mxu0 }
 0x7d2   : > { %v4340_v10 = vadd.f32 %v8239_v8, %v10034_v31  ;;  %v4331_v60 = vpop.f32.mrb[45].mxu0 }
 0x7d3   : > { %v4332_v48 = vadd.f32 %v10034_v31, %v4331_v60  ;;  %v8240_v63 = vpop.f32.mrb[46].mxu0  ;;  %8313 = vmatprep.mubr.bf16.mxu1 %v10205_v34 }
 0x7d4   : > { %v4343_v1 = vadd.f32 %v8240_v63, %v10034_v31  ;;  %v4334_v0 = vpop.f32.mrb[47].mxu0  ;;  %8314 = vmatmul.mubr.bf16.gmra.mrb[228].mxu1 %v10203_v41  ;;  %8376 = vmatmul.mubr.msk.bf16.gmra.mrb[104].mxu0 %vm472_vm1, %v9227_v5  ;;  %v4456_v51 = vmax.f32 %v4340_v10, 0.0 }
 0x7d5   : > { %v4335_v27 = vadd.f32 %v10034_v31, %v4334_v0  ;;  %8379 = vmatprep.mubr.msk.bf16.mxu0 %vm472_vm1, %v9229_v6  ;;  %v4454_v52 = vmax.f32 %v4332_v48, 0.0 }
 0x7d6   : > { %v4457_v4 = vmax.f32 %v4343_v1, 0.0 }
 0x7d7   : > { %v4455_v13 = vmax.f32 %v4335_v27, 0.0 }
 0x7d8   : > { %v10217_v39 = vpack.c.bf16 %v4457_v4, %v4456_v51 }
 0x7d9   : > { %v10219_v28 = vpack.c.bf16 %v4455_v13, %v4454_v52  ;;  %v8243_v40 = vpop.f32.mrb[48].mxu0 }
 0x7da   : > { %v4356_v7 = vadd.f32 %v8243_v40, %v10034_v31  ;;  %v4347_v16 = vpop.f32.mrb[49].mxu0 }
 0x7db   : > { %v4348_v59 = vadd.f32 %v10034_v31, %v4347_v16  ;;  %v8244_v5 = vpop.f32.mrb[50].mxu0  ;;  %8317 = vmatprep.mubr.bf16.mxu1 %v10219_v28 }
 0x7dc   : > { %v4359_v18 = vadd.f32 %v8244_v5, %v10034_v31  ;;  %v4350_v6 = vpop.f32.mrb[51].mxu0  ;;  %8318 = vmatmul.mubr.bf16.gmra.mrb[232].mxu1 %v10217_v39  ;;  %8380 = vmatmul.mubr.msk.bf16.gmra.mrb[108].mxu0 %vm472_vm1, %v9239_v14  ;;  %v4460_v57 = vmax.f32 %v4356_v7, 0.0 }
 0x7dd   : > { %v4351_v20 = vadd.f32 %v10034_v31, %v4350_v6  ;;  %8383 = vmatprep.mubr.msk.bf16.mxu0 %vm472_vm1, %v9241_v15  ;;  %v4458_v58 = vmax.f32 %v4348_v59, 0.0 }
 0x7de   : > { %v4461_v37 = vmax.f32 %v4359_v18, 0.0 }
 0x7df   : > { %v4459_v38 = vmax.f32 %v4351_v20, 0.0 }
 0x7e0   : > { %v10231_v45 = vpack.c.bf16 %v4461_v37, %v4460_v57 }
 0x7e1   : > { %v10233_v33 = vpack.c.bf16 %v4459_v38, %v4458_v58  ;;  %v8247_v46 = vpop.f32.mrb[52].mxu0 }
 0x7e2   : > { %v4372_v21 = vadd.f32 %v8247_v46, %v10034_v31  ;;  %v4363_v8 = vpop.f32.mrb[53].mxu0 }
 0x7e3   : > { %v4364_v10 = vadd.f32 %v10034_v31, %v4363_v8  ;;  %v8248_v14 = vpop.f32.mrb[54].mxu0  ;;  %8321 = vmatprep.mubr.bf16.mxu1 %v10233_v33 }
 0x7e4   : > { %v4375_v60 = vadd.f32 %v8248_v14, %v10034_v31  ;;  %v4366_v15 = vpop.f32.mrb[55].mxu0  ;;  %8322 = vmatmul.mubr.bf16.gmra.mrb[236].mxu1 %v10231_v45  ;;  %8384 = vmatmul.mubr.msk.bf16.gmra.mrb[112].mxu0 %vm472_vm1, %v9251_v22  ;;  %v4464_v63 = vmax.f32 %v4372_v21, 0.0 }
 0x7e5   : > { %v4367_v48 = vadd.f32 %v10034_v31, %v4366_v15  ;;  %8387 = vmatprep.mubr.msk.bf16.mxu0 %vm472_vm1, %v9256_v24  ;;  %v4462_v0 = vmax.f32 %v4364_v10, 0.0 }
 0x7e6   : > { %v4465_v1 = vmax.f32 %v4375_v60, 0.0 }
 0x7e7   : > { %v4463_v27 = vmax.f32 %v4367_v48, 0.0 }
 0x7e8   : > { %v10245_v51 = vpack.c.bf16 %v4465_v1, %v4464_v63 }
 0x7e9   : > { %v10247_v4 = vpack.c.bf16 %v4463_v27, %v4462_v0  ;;  %v8251_v52 = vpop.f32.mrb[56].mxu0 }
 0x7ea   : > { %v4388_v13 = vadd.f32 %v8251_v52, %v10034_v31  ;;  %v4379_v40 = vpop.f32.mrb[57].mxu0 }
 0x7eb   : > { %v4380_v7 = vadd.f32 %v10034_v31, %v4379_v40  ;;  %v8252_v22 = vpop.f32.mrb[58].mxu0  ;;  %8325 = vmatprep.mubr.bf16.mxu1 %v10247_v4 }
 0x7ec   : > { %v4391_v16 = vadd.f32 %v8252_v22, %v10034_v31  ;;  %v4382_v24 = vpop.f32.mrb[59].mxu0  ;;  %8326 = vmatmul.mubr.bf16.gmra.mrb[240].mxu1 %v10245_v51  ;;  %8388 = vmatmul.mubr.msk.bf16.gmra.mrb[116].mxu0 %vm472_vm1, %v9269_v32  ;;  %v4468_v5 = vmax.f32 %v4388_v13, 0.0 }
 0x7ed   : > { %v4383_v59 = vadd.f32 %v10034_v31, %v4382_v24  ;;  %8391 = vmatprep.mubr.msk.bf16.mxu0 %vm472_vm1, %v9271_v35  ;;  %v4466_v6 = vmax.f32 %v4380_v7, 0.0 }
 0x7ee   : > { %v4469_v18 = vmax.f32 %v4391_v16, 0.0  ;;  %v8996_v16 = vld [vmem:[%s10738_s8 + $0x18] sm:$0xff]  }
 0x7ef   : > { %v4467_v20 = vmax.f32 %v4383_v59, 0.0 }
 0x7f0   : > { %v10259_v57 = vpack.c.bf16 %v4469_v18, %v4468_v5 }
 0x7f1   : > { %v10261_v37 = vpack.c.bf16 %v4467_v20, %v4466_v6  ;;  %v8255_v58 = vpop.f32.mrb[60].mxu0 }
 0x7f2   : > { %v4404_v38 = vadd.f32 %v8255_v58, %v10034_v31  ;;  %v4395_v46 = vpop.f32.mrb[61].mxu0 }
 0x7f3   : > { %v4396_v21 = vadd.f32 %v10034_v31, %v4395_v46  ;;  %v8256_v32 = vpop.f32.mrb[62].mxu0  ;;  %8329 = vmatprep.mubr.bf16.mxu1 %v10261_v37 }
 0x7f4   : > { %v4407_v8 = vadd.f32 %v8256_v32, %v10034_v31  ;;  %v4398_v35 = vpop.f32.mrb[63].mxu0  ;;  %8330 = vmatmul.mubr.bf16.gmra.mrb[244].mxu1 %v10259_v57  ;;  %8392 = vmatmul.mubr.msk.bf16.gmra.mrb[120].mxu0 %vm472_vm1, %v9281_v42  ;;  %v4472_v14 = vmax.f32 %v4404_v38, 0.0  ;;  %v8993_v42 = vld [vmem:[%s10738_s8] sm:$0xff]  }
 0x7f5   : > { %v4399_v10 = vadd.f32 %v10034_v31, %v4398_v35  ;;  %8395 = vmatprep.mubr.msk.bf16.mxu0 %vm472_vm1, %v9283_v43  ;;  %v4470_v15 = vmax.f32 %v4396_v21, 0.0  ;;  %8483 = vmatprep.subr.bf16.mxu1 %v8993_v42  ;;  %v10291_v31 = vld [vmem:[%s10733_s3 + $0x8] ss:$0 sm:$0xff] }
 0x7f6   : > { %v4473_v60 = vmax.f32 %v4407_v8, 0.0  ;;  %8484 = vmatpush3.bf16.msra.mxu1 %v8993_v42 }
 0x7f7   : > { %v4471_v48 = vmax.f32 %v4399_v10, 0.0 }
 0x7f8   : > { %v10273_v63 = vpack.c.bf16 %v4473_v60, %v4472_v14 }
 0x7f9   : > { %v10275_v1 = vpack.c.bf16 %v4471_v48, %v4470_v15 }
 0x7fb   : > { %8333 = vmatprep.mubr.bf16.mxu1 %v10275_v1 }
 0x7fc   : > { %8334 = vmatmul.mubr.bf16.gmra.mrb[248].mxu1 %v10273_v63  ;;  %8396 = vmatmul.mubr.msk.bf16.gmra.mrb[124].mxu0 %vm472_vm1, %v9293_v50  ;;  %v8994_v50 = vld [vmem:[%s10738_s8 + $0x8] sm:$0xff]  }
 0x7fd   : > { %8399 = vmatprep.mubr.msk.bf16.mxu0 %vm472_vm1, %v9295_v53  ;;  %v8995_v53 = vld [vmem:[%s10738_s8 + $0x10] sm:$0xff]   ;;  %8485 = vmatprep.subr.bf16.mxu1 %v8994_v50 }
 0x7fe   : > { %8486 = vmatpush3.bf16.msra.mxu1 %v8994_v50 }
 0x7ff   : > { %8487 = vmatprep.subr.bf16.mxu1 %v8995_v53 }
 0x802   : > { %8488 = vmatpush3.bf16.msra.mxu1 %v8995_v53 }
 0x803   : > { %8489 = vmatprep.subr.bf16.mxu1 %v8996_v16 }
 0x804   : > { %8400 = vmatmul.mubr.msk.bf16.gmra.mrb[128].mxu0 %vm472_vm1, %v9303_v56 }
 0x806   : > { %8490 = vmatpush3.bf16.msra.mxu1 %v8996_v16 }
 0x857   : > { %v8275_v43 = vpop.f32.mrb[64].mxu0 }
 0x858   : > { %v4610_v0 = vpop.f32.mrb[65].mxu0  ;;  %v4619_v27 = vadd.f32 %v8275_v43, %v10291_v31 }
 0x859   : > { %v8276_v56 = vpop.f32.mrb[66].mxu0  ;;  %v4611_v40 = vadd.f32 %v10291_v31, %v4610_v0 }
 0x85a   : > { %v4622_v52 = vadd.f32 %v8276_v56, %v10291_v31  ;;  %v4613_v13 = vpop.f32.mrb[67].mxu0 }
 0x85b   : > { %v4614_v7 = vadd.f32 %v10291_v31, %v4613_v13 }
 0x85c   : > { %v4882_v22 = vpack.c.bf16 %v4622_v52, %v4619_v27 }
 0x85d   : > { %v4881_v24 = vpack.c.bf16 %v4614_v7, %v4611_v40 }
 0x85f   : > { %v8279_v59 = vpop.f32.mrb[192].mxu1  ;;  %8419 = vmatprep.mubr.bf16.mxu0 %v4881_v24 }
 0x860   : > { %v4626_v5 = vpop.f32.mrb[193].mxu1  ;;  %8420 = vmatmul.mubr.bf16.vlgmr.msra.gmra.mrb[68].mxu0 %v4882_v22  ;;  %v4635_v6 = vadd.f32 %v8279_v59, %v10291_v31 }
 0x861   : > { %v8280_v18 = vpop.f32.mrb[194].mxu1  ;;  %v4627_v38 = vadd.f32 %v10291_v31, %v4626_v5 }
 0x862   : > { %v4638_v20 = vadd.f32 %v8280_v18, %v10291_v31  ;;  %v4629_v58 = vpop.f32.mrb[195].mxu1 }
 0x863   : > { %v4630_v46 = vadd.f32 %v10291_v31, %v4629_v58 }
 0x864   : > { %v4884_v21 = vpack.c.bf16 %v4638_v20, %v4635_v6 }
 0x865   : > { %v4883_v32 = vpack.c.bf16 %v4630_v46, %v4627_v38 }
 0x867   : > { %v8283_v8 = vpop.f32.mrb[196].mxu1  ;;  %8423 = vmatprep.mubr.bf16.mxu0 %v4883_v32 }
 0x868   : > { %v4642_v35 = vpop.f32.mrb[197].mxu1  ;;  %8424 = vmatmul.mubr.bf16.gmra.mrb[72].mxu0 %v4884_v21  ;;  %v4651_v14 = vadd.f32 %v8283_v8, %v10291_v31 }
 0x869   : > { %v8284_v10 = vpop.f32.mrb[198].mxu1  ;;  %v4643_v48 = vadd.f32 %v10291_v31, %v4642_v35 }
 0x86a   : > { %v4654_v60 = vadd.f32 %v8284_v10, %v10291_v31  ;;  %v4645_v15 = vpop.f32.mrb[199].mxu1 }
 0x86b   : > { %v4646_v42 = vadd.f32 %v10291_v31, %v4645_v15 }
 0x86c   : > { %v4886_v43 = vpack.c.bf16 %v4654_v60, %v4651_v14 }
 0x86d   : > { %v4885_v0 = vpack.c.bf16 %v4646_v42, %v4643_v48 }
 0x86f   : > { %v8287_v50 = vpop.f32.mrb[200].mxu1  ;;  %8427 = vmatprep.mubr.bf16.mxu0 %v4885_v0 }
 0x870   : > { %v4658_v53 = vpop.f32.mrb[201].mxu1  ;;  %8428 = vmatmul.mubr.bf16.gmra.mrb[76].mxu0 %v4886_v43  ;;  %v4667_v27 = vadd.f32 %v8287_v50, %v10291_v31 }
 0x871   : > { %v8288_v56 = vpop.f32.mrb[202].mxu1  ;;  %v4659_v40 = vadd.f32 %v10291_v31, %v4658_v53 }
 0x872   : > { %v4670_v52 = vadd.f32 %v8288_v56, %v10291_v31  ;;  %v4661_v13 = vpop.f32.mrb[203].mxu1 }
 0x873   : > { %v4662_v7 = vadd.f32 %v10291_v31, %v4661_v13 }
 0x874   : > { %v4888_v22 = vpack.c.bf16 %v4670_v52, %v4667_v27 }
 0x875   : > { %v4887_v16 = vpack.c.bf16 %v4662_v7, %v4659_v40 }
 0x877   : > { %v8291_v24 = vpop.f32.mrb[204].mxu1  ;;  %8431 = vmatprep.mubr.bf16.mxu0 %v4887_v16 }
 0x878   : > { %v4674_v59 = vpop.f32.mrb[205].mxu1  ;;  %8432 = vmatmul.mubr.bf16.gmra.mrb[80].mxu0 %v4888_v22  ;;  %v4683_v18 = vadd.f32 %v8291_v24, %v10291_v31 }
 0x879   : > { %v8292_v5 = vpop.f32.mrb[206].mxu1  ;;  %v4675_v58 = vadd.f32 %v10291_v31, %v4674_v59 }
 0x87a   : > { %v4686_v6 = vadd.f32 %v8292_v5, %v10291_v31  ;;  %v4677_v20 = vpop.f32.mrb[207].mxu1 }
 0x87b   : > { %v4678_v38 = vadd.f32 %v10291_v31, %v4677_v20 }
 0x87c   : > { %v4890_v46 = vpack.c.bf16 %v4686_v6, %v4683_v18 }
 0x87d   : > { %v4889_v21 = vpack.c.bf16 %v4678_v38, %v4675_v58 }
 0x87f   : > { %v8295_v32 = vpop.f32.mrb[208].mxu1  ;;  %8435 = vmatprep.mubr.bf16.mxu0 %v4889_v21 }
 0x880   : > { %v4690_v8 = vpop.f32.mrb[209].mxu1  ;;  %8436 = vmatmul.mubr.bf16.gmra.mrb[84].mxu0 %v4890_v46  ;;  %v4699_v10 = vadd.f32 %v8295_v32, %v10291_v31 }
 0x881   : > { %v8296_v35 = vpop.f32.mrb[210].mxu1  ;;  %v4691_v15 = vadd.f32 %v10291_v31, %v4690_v8 }
 0x882   : > { %v4702_v14 = vadd.f32 %v8296_v35, %v10291_v31  ;;  %v4693_v60 = vpop.f32.mrb[211].mxu1 }
 0x883   : > { %v4694_v48 = vadd.f32 %v10291_v31, %v4693_v60 }
 0x884   : > { %v4892_v42 = vpack.c.bf16 %v4702_v14, %v4699_v10 }
 0x885   : > { %v4891_v43 = vpack.c.bf16 %v4694_v48, %v4691_v15 }
 0x887   : > { %v8299_v0 = vpop.f32.mrb[212].mxu1  ;;  %8439 = vmatprep.mubr.bf16.mxu0 %v4891_v43 }
 0x888   : > { %v4706_v50 = vpop.f32.mrb[213].mxu1  ;;  %8440 = vmatmul.mubr.bf16.gmra.mrb[88].mxu0 %v4892_v42  ;;  %v4715_v56 = vadd.f32 %v8299_v0, %v10291_v31 }
 0x889   : > { %v8300_v53 = vpop.f32.mrb[214].mxu1  ;;  %v4707_v13 = vadd.f32 %v10291_v31, %v4706_v50 }
 0x88a   : > { %v4718_v27 = vadd.f32 %v8300_v53, %v10291_v31  ;;  %v4709_v52 = vpop.f32.mrb[215].mxu1 }
 0x88b   : > { %v4710_v40 = vadd.f32 %v10291_v31, %v4709_v52 }
 0x88c   : > { %v4894_v7 = vpack.c.bf16 %v4718_v27, %v4715_v56 }
 0x88d   : > { %v4893_v22 = vpack.c.bf16 %v4710_v40, %v4707_v13 }
 0x88f   : > { %v8303_v16 = vpop.f32.mrb[216].mxu1  ;;  %8443 = vmatprep.mubr.bf16.mxu0 %v4893_v22 }
 0x890   : > { %v4722_v24 = vpop.f32.mrb[217].mxu1  ;;  %8444 = vmatmul.mubr.bf16.gmra.mrb[92].mxu0 %v4894_v7  ;;  %v4731_v5 = vadd.f32 %v8303_v16, %v10291_v31 }
 0x891   : > { %v8304_v59 = vpop.f32.mrb[218].mxu1  ;;  %v4723_v20 = vadd.f32 %v10291_v31, %v4722_v24 }
 0x892   : > { %v4734_v18 = vadd.f32 %v8304_v59, %v10291_v31  ;;  %v4725_v6 = vpop.f32.mrb[219].mxu1 }
 0x893   : > { %v4726_v58 = vadd.f32 %v10291_v31, %v4725_v6 }
 0x894   : > { %v4896_v38 = vpack.c.bf16 %v4734_v18, %v4731_v5 }
 0x895   : > { %v4895_v46 = vpack.c.bf16 %v4726_v58, %v4723_v20 }
 0x897   : > { %v8307_v21 = vpop.f32.mrb[220].mxu1  ;;  %8447 = vmatprep.mubr.bf16.mxu0 %v4895_v46 }
 0x898   : > { %v4738_v32 = vpop.f32.mrb[221].mxu1  ;;  %8448 = vmatmul.mubr.bf16.gmra.mrb[96].mxu0 %v4896_v38  ;;  %v4747_v35 = vadd.f32 %v8307_v21, %v10291_v31 }
 0x899   : > { %v8308_v8 = vpop.f32.mrb[222].mxu1  ;;  %v4739_v60 = vadd.f32 %v10291_v31, %v4738_v32 }
 0x89a   : > { %v4750_v10 = vadd.f32 %v8308_v8, %v10291_v31  ;;  %v4741_v14 = vpop.f32.mrb[223].mxu1 }
 0x89b   : > { %v4742_v15 = vadd.f32 %v10291_v31, %v4741_v14 }
 0x89c   : > { %v4898_v48 = vpack.c.bf16 %v4750_v10, %v4747_v35 }
 0x89d   : > { %v4897_v42 = vpack.c.bf16 %v4742_v15, %v4739_v60 }
 0x89f   : > { %v8311_v43 = vpop.f32.mrb[224].mxu1  ;;  %8451 = vmatprep.mubr.bf16.mxu0 %v4897_v42 }
 0x8a0   : > { %v4754_v0 = vpop.f32.mrb[225].mxu1  ;;  %8452 = vmatmul.mubr.bf16.gmra.mrb[100].mxu0 %v4898_v48  ;;  %v4763_v53 = vadd.f32 %v8311_v43, %v10291_v31 }
 0x8a1   : > { %v8312_v50 = vpop.f32.mrb[226].mxu1  ;;  %v4755_v52 = vadd.f32 %v10291_v31, %v4754_v0 }
 0x8a2   : > { %v4766_v56 = vadd.f32 %v8312_v50, %v10291_v31  ;;  %v4757_v27 = vpop.f32.mrb[227].mxu1 }
 0x8a3   : > { %v4758_v13 = vadd.f32 %v10291_v31, %v4757_v27 }
 0x8a4   : > { %v4900_v40 = vpack.c.bf16 %v4766_v56, %v4763_v53 }
 0x8a5   : > { %v4899_v7 = vpack.c.bf16 %v4758_v13, %v4755_v52 }
 0x8a7   : > { %v8315_v22 = vpop.f32.mrb[228].mxu1  ;;  %8455 = vmatprep.mubr.bf16.mxu0 %v4899_v7 }
 0x8a8   : > { %v4770_v16 = vpop.f32.mrb[229].mxu1  ;;  %8456 = vmatmul.mubr.bf16.gmra.mrb[104].mxu0 %v4900_v40  ;;  %v4779_v59 = vadd.f32 %v8315_v22, %v10291_v31 }
 0x8a9   : > { %v8316_v24 = vpop.f32.mrb[230].mxu1  ;;  %v4771_v6 = vadd.f32 %v10291_v31, %v4770_v16 }
 0x8aa   : > { %v4782_v5 = vadd.f32 %v8316_v24, %v10291_v31  ;;  %v4773_v18 = vpop.f32.mrb[231].mxu1 }
 0x8ab   : > { %v4774_v20 = vadd.f32 %v10291_v31, %v4773_v18  ;;  %v8997_v18 = vld [vmem:[%s10737_s7] sm:$0xff]  }
 0x8ac   : > { %v4902_v58 = vpack.c.bf16 %v4782_v5, %v4779_v59  ;;  %8555 = vmatprep.subr.bf16.mxu1 %v8997_v18 }
 0x8ad   : > { %v4901_v38 = vpack.c.bf16 %v4774_v20, %v4771_v6 }
 0x8af   : > { %v8319_v46 = vpop.f32.mrb[232].mxu1  ;;  %8459 = vmatprep.mubr.bf16.mxu0 %v4901_v38 }
 0x8b0   : > { %v4786_v21 = vpop.f32.mrb[233].mxu1  ;;  %8460 = vmatmul.mubr.bf16.gmra.mrb[108].mxu0 %v4902_v58  ;;  %v4795_v8 = vadd.f32 %v8319_v46, %v10291_v31 }
 0x8b1   : > { %v8320_v32 = vpop.f32.mrb[234].mxu1  ;;  %v4787_v14 = vadd.f32 %v10291_v31, %v4786_v21 }
 0x8b2   : > { %v4798_v35 = vadd.f32 %v8320_v32, %v10291_v31  ;;  %v4789_v10 = vpop.f32.mrb[235].mxu1 }
 0x8b3   : > { %v4790_v60 = vadd.f32 %v10291_v31, %v4789_v10 }
 0x8b4   : > { %v4904_v15 = vpack.c.bf16 %v4798_v35, %v4795_v8 }
 0x8b5   : > { %v4903_v48 = vpack.c.bf16 %v4790_v60, %v4787_v14 }
 0x8b7   : > { %v8323_v42 = vpop.f32.mrb[236].mxu1  ;;  %8463 = vmatprep.mubr.bf16.mxu0 %v4903_v48 }
 0x8b8   : > { %v4802_v43 = vpop.f32.mrb[237].mxu1  ;;  %8464 = vmatmul.mubr.bf16.gmra.mrb[112].mxu0 %v4904_v15  ;;  %v4811_v50 = vadd.f32 %v8323_v42, %v10291_v31 }
 0x8b9   : > { %v8324_v0 = vpop.f32.mrb[238].mxu1  ;;  %v4803_v27 = vadd.f32 %v10291_v31, %v4802_v43 }
 0x8ba   : > { %v4814_v53 = vadd.f32 %v8324_v0, %v10291_v31  ;;  %v4805_v56 = vpop.f32.mrb[239].mxu1 }
 0x8bb   : > { %v4806_v52 = vadd.f32 %v10291_v31, %v4805_v56 }
 0x8bc   : > { %v4906_v13 = vpack.c.bf16 %v4814_v53, %v4811_v50 }
 0x8bd   : > { %v4905_v40 = vpack.c.bf16 %v4806_v52, %v4803_v27 }
 0x8bf   : > { %v8327_v7 = vpop.f32.mrb[240].mxu1  ;;  %8467 = vmatprep.mubr.bf16.mxu0 %v4905_v40 }
 0x8c0   : > { %v4818_v22 = vpop.f32.mrb[241].mxu1  ;;  %8468 = vmatmul.mubr.bf16.gmra.mrb[116].mxu0 %v4906_v13  ;;  %v4827_v24 = vadd.f32 %v8327_v7, %v10291_v31  ;;  %v10372_v7 = vld [vmem:[%s10736_s6] ss:$0 sm:$0xff] }
 0x8c1   : > { %v8328_v16 = vpop.f32.mrb[242].mxu1  ;;  %v4819_v6 = vadd.f32 %v10291_v31, %v4818_v22 }
 0x8c2   : > { %v4830_v59 = vadd.f32 %v8328_v16, %v10291_v31  ;;  %v4821_v5 = vpop.f32.mrb[243].mxu1 }
 0x8c3   : > { %v4822_v20 = vadd.f32 %v10291_v31, %v4821_v5 }
 0x8c4   : > { %v4908_v58 = vpack.c.bf16 %v4830_v59, %v4827_v24 }
 0x8c5   : > { %v4907_v38 = vpack.c.bf16 %v4822_v20, %v4819_v6 }
 0x8c7   : > { %v8331_v46 = vpop.f32.mrb[244].mxu1  ;;  %8471 = vmatprep.mubr.bf16.mxu0 %v4907_v38 }
 0x8c8   : > { %v4834_v21 = vpop.f32.mrb[245].mxu1  ;;  %8472 = vmatmul.mubr.bf16.gmra.mrb[120].mxu0 %v4908_v58  ;;  %v4843_v8 = vadd.f32 %v8331_v46, %v10291_v31 }
 0x8c9   : > { %v8332_v32 = vpop.f32.mrb[246].mxu1  ;;  %v4835_v14 = vadd.f32 %v10291_v31, %v4834_v21 }
 0x8ca   : > { %v4846_v35 = vadd.f32 %v8332_v32, %v10291_v31  ;;  %v4837_v10 = vpop.f32.mrb[247].mxu1 }
 0x8cb   : > { %v4838_v60 = vadd.f32 %v10291_v31, %v4837_v10 }
 0x8cc   : > { %v4910_v15 = vpack.c.bf16 %v4846_v35, %v4843_v8 }
 0x8cd   : > { %v4909_v48 = vpack.c.bf16 %v4838_v60, %v4835_v14  ;;  %v8998_v60 = vld [vmem:[%s10737_s7 + $0x8] sm:$0xff]  }
 0x8cf   : > { %v8335_v42 = vpop.f32.mrb[248].mxu1  ;;  %8475 = vmatprep.mubr.bf16.mxu0 %v4909_v48 }
 0x8d0   : > { %v4850_v43 = vpop.f32.mrb[249].mxu1  ;;  %8476 = vmatmul.mubr.bf16.gmra.mrb[124].mxu0 %v4910_v15  ;;  %v4859_v50 = vadd.f32 %v8335_v42, %v10291_v31 }
 0x8d1   : > { %v8336_v0 = vpop.f32.mrb[250].mxu1  ;;  %v4851_v27 = vadd.f32 %v10291_v31, %v4850_v43 }
 0x8d2   : > { %v4862_v53 = vadd.f32 %v8336_v0, %v10291_v31  ;;  %v4853_v56 = vpop.f32.mrb[251].mxu1 }
 0x8d3   : > { %v4854_v52 = vadd.f32 %v10291_v31, %v4853_v56  ;;  %v8999_v56 = vld [vmem:[%s10737_s7 + $0x10] sm:$0xff]  }
 0x8d4   : > { %v4912_v13 = vpack.c.bf16 %v4862_v53, %v4859_v50 }
 0x8d5   : > { %v4911_v40 = vpack.c.bf16 %v4854_v52, %v4851_v27 }
 0x8d7   : > { %8479 = vmatprep.mubr.bf16.mxu0 %v4911_v40 }
 0x8d8   : > { %8480 = vmatmul.mubr.bf16.gmra.mrb[128].mxu0 %v4912_v13 }
 0x933   : > { %v8421_v22 = vpop.f32.mrb[68].mxu0 }
 0x934   : > { %v5574_v16 = vadd.f32 %v8421_v22, %v10372_v7  ;;  %v5310_v24 = vpop.f32.mrb[69].mxu0 }
 0x935   : > { %v5572_v59 = vadd.f32 %v10372_v7, %v5310_v24  ;;  %v8422_v5 = vpop.f32.mrb[70].mxu0 }
 0x936   : > { %v5575_v6 = vadd.f32 %v8422_v5, %v10372_v7  ;;  %v5313_v20 = vpop.f32.mrb[71].mxu0  ;;  %v5638_v58 = vmax.f32 %v5574_v16, 0.0 }
 0x937   : > { %v5573_v31 = vadd.f32 %v10372_v7, %v5313_v20  ;;  %v5636_v46 = vmax.f32 %v5572_v59, 0.0 }
 0x938   : > { %v5639_v38 = vmax.f32 %v5575_v6, 0.0 }
 0x939   : > { %v5637_v21 = vmax.f32 %v5573_v31, 0.0 }
 0x93a   : > { %v5701_v32 = vpack.c.bf16 %v5639_v38, %v5638_v58 }
 0x93b   : > { %v5700_v8 = vpack.c.bf16 %v5637_v21, %v5636_v46  ;;  %v8425_v35 = vpop.f32.mrb[72].mxu0  ;;  %v9001_v46 = vld [vmem:[%s10737_s7 + $0x20] sm:$0xff]  }
 0x93c   : > { %v5578_v10 = vadd.f32 %v8425_v35, %v10372_v7  ;;  %v5326_v14 = vpop.f32.mrb[73].mxu0 }
 0x93d   : > { %v5576_v15 = vadd.f32 %v10372_v7, %v5326_v14  ;;  %v8426_v48 = vpop.f32.mrb[74].mxu0  ;;  %8491 = vmatprep.mubr.msk.bf16.mxu1 %vm5764_vm2, %v5700_v8 }
 0x93e   : > { %v5579_v42 = vadd.f32 %v8426_v48, %v10372_v7  ;;  %v5329_v43 = vpop.f32.mrb[75].mxu0  ;;  %8492 = vmatmul.mubr.msk.bf16.vlgmr.msra.gmra.mrb[252].mxu1 %vm5764_vm2, %v5701_v32  ;;  %v5642_v50 = vmax.f32 %v5578_v10, 0.0 }
 0x93f   : > { %v5577_v0 = vadd.f32 %v10372_v7, %v5329_v43  ;;  %8556 = vmatpush3.bf16.msra.mxu1 %v8997_v18  ;;  %v5640_v27 = vmax.f32 %v5576_v15, 0.0  ;;  %v9000_v18 = vld [vmem:[%s10737_s7 + $0x18] sm:$0xff]   ;;  %v9002_v15 = vld [vmem:[%s10737_s7 + $0x28] sm:$0xff]  }
 0x940   : > { %v5643_v53 = vmax.f32 %v5579_v42, 0.0  ;;  %8557 = vmatprep.subr.bf16.mxu1 %v8998_v60 }
 0x941   : > { %v5641_v52 = vmax.f32 %v5577_v0, 0.0 }
 0x942   : > { %v5703_v13 = vpack.c.bf16 %v5643_v53, %v5642_v50 }
 0x943   : > { %v5702_v40 = vpack.c.bf16 %v5641_v52, %v5640_v27  ;;  %v8429_v22 = vpop.f32.mrb[76].mxu0  ;;  %8558 = vmatpush3.bf16.msra.mxu1 %v8998_v60  ;;  %v9003_v27 = vld [vmem:[%s10737_s7 + $0x30] sm:$0xff]  }
 0x944   : > { %v5582_v16 = vadd.f32 %v8429_v22, %v10372_v7  ;;  %v5342_v24 = vpop.f32.mrb[77].mxu0  ;;  %8559 = vmatprep.subr.bf16.mxu1 %v8999_v56 }
 0x945   : > { %v5580_v59 = vadd.f32 %v10372_v7, %v5342_v24  ;;  %v8430_v5 = vpop.f32.mrb[78].mxu0  ;;  %8495 = vmatprep.mubr.msk.bf16.mxu1 %vm5764_vm2, %v5702_v40 }
 0x946   : > { %v5583_v6 = vadd.f32 %v8430_v5, %v10372_v7  ;;  %v5345_v20 = vpop.f32.mrb[79].mxu0  ;;  %8496 = vmatmul.mubr.msk.bf16.gmra.mrb[0].mxu1 %vm5764_vm2, %v5703_v13  ;;  %v5646_v58 = vmax.f32 %v5582_v16, 0.0 }
 0x947   : > { %v5581_v31 = vadd.f32 %v10372_v7, %v5345_v20  ;;  %8560 = vmatpush3.bf16.msra.mxu1 %v8999_v56  ;;  %v5644_v21 = vmax.f32 %v5580_v59, 0.0  ;;  %v9004_v59 = vld [vmem:[%s10737_s7 + $0x38] sm:$0xff]  }
 0x948   : > { %v5647_v38 = vmax.f32 %v5583_v6, 0.0  ;;  %8561 = vmatprep.subr.bf16.mxu1 %v9000_v18 }
 0x949   : > { %v5645_v32 = vmax.f32 %v5581_v31, 0.0 }
 0x94a   : > { %v5705_v8 = vpack.c.bf16 %v5647_v38, %v5646_v58 }
 0x94b   : > { %v5704_v35 = vpack.c.bf16 %v5645_v32, %v5644_v21  ;;  %v8433_v10 = vpop.f32.mrb[80].mxu0  ;;  %8562 = vmatpush3.bf16.msra.mxu1 %v9000_v18 }
 0x94c   : > { %v5586_v14 = vadd.f32 %v8433_v10, %v10372_v7  ;;  %v5358_v60 = vpop.f32.mrb[81].mxu0  ;;  %8563 = vmatprep.subr.bf16.mxu1 %v9001_v46 }
 0x94d   : > { %v5584_v48 = vadd.f32 %v10372_v7, %v5358_v60  ;;  %v8434_v42 = vpop.f32.mrb[82].mxu0  ;;  %8499 = vmatprep.mubr.msk.bf16.mxu1 %vm5764_vm2, %v5704_v35 }
 0x94e   : > { %v5587_v43 = vadd.f32 %v8434_v42, %v10372_v7  ;;  %v5361_v0 = vpop.f32.mrb[83].mxu0  ;;  %8500 = vmatmul.mubr.msk.bf16.gmra.mrb[4].mxu1 %vm5764_vm2, %v5705_v8  ;;  %v5650_v53 = vmax.f32 %v5586_v14, 0.0 }
 0x94f   : > { %v5585_v50 = vadd.f32 %v10372_v7, %v5361_v0  ;;  %8564 = vmatpush3.bf16.msra.mxu1 %v9001_v46  ;;  %v5648_v52 = vmax.f32 %v5584_v48, 0.0 }
 0x950   : > { %v5651_v56 = vmax.f32 %v5587_v43, 0.0  ;;  %8565 = vmatprep.subr.bf16.mxu1 %v9002_v15 }
 0x951   : > { %v5649_v13 = vmax.f32 %v5585_v50, 0.0 }
 0x952   : > { %v5707_v40 = vpack.c.bf16 %v5651_v56, %v5650_v53 }
 0x953   : > { %v5706_v22 = vpack.c.bf16 %v5649_v13, %v5648_v52  ;;  %v8437_v16 = vpop.f32.mrb[84].mxu0  ;;  %8566 = vmatpush3.bf16.msra.mxu1 %v9002_v15 }
 0x954   : > { %v5590_v24 = vadd.f32 %v8437_v16, %v10372_v7  ;;  %v5374_v18 = vpop.f32.mrb[85].mxu0  ;;  %8567 = vmatprep.subr.bf16.mxu1 %v9003_v27 }
 0x955   : > { %v5588_v5 = vadd.f32 %v10372_v7, %v5374_v18  ;;  %v8438_v6 = vpop.f32.mrb[86].mxu0  ;;  %8503 = vmatprep.mubr.msk.bf16.mxu1 %vm5764_vm2, %v5706_v22 }
 0x956   : > { %v5591_v20 = vadd.f32 %v8438_v6, %v10372_v7  ;;  %v5377_v31 = vpop.f32.mrb[87].mxu0  ;;  %8504 = vmatmul.mubr.msk.bf16.gmra.mrb[8].mxu1 %vm5764_vm2, %v5707_v40  ;;  %v5654_v38 = vmax.f32 %v5590_v24, 0.0 }
 0x957   : > { %v5589_v58 = vadd.f32 %v10372_v7, %v5377_v31  ;;  %8568 = vmatpush3.bf16.msra.mxu1 %v9003_v27  ;;  %v5652_v21 = vmax.f32 %v5588_v5, 0.0 }
 0x958   : > { %v5655_v46 = vmax.f32 %v5591_v20, 0.0  ;;  %8569 = vmatprep.subr.bf16.mxu1 %v9004_v59 }
 0x959   : > { %v5653_v32 = vmax.f32 %v5589_v58, 0.0 }
 0x95a   : > { %v5709_v8 = vpack.c.bf16 %v5655_v46, %v5654_v38 }
 0x95b   : > { %v5708_v35 = vpack.c.bf16 %v5653_v32, %v5652_v21  ;;  %v8441_v10 = vpop.f32.mrb[88].mxu0  ;;  %8570 = vmatpush3.bf16.msra.mxu1 %v9004_v59 }
 0x95c   : > { %v5594_v14 = vadd.f32 %v8441_v10, %v10372_v7  ;;  %v5390_v60 = vpop.f32.mrb[89].mxu0 }
 0x95d   : > { %v5592_v15 = vadd.f32 %v10372_v7, %v5390_v60  ;;  %v8442_v48 = vpop.f32.mrb[90].mxu0  ;;  %8507 = vmatprep.mubr.msk.bf16.mxu1 %vm5764_vm2, %v5708_v35 }
 0x95e   : > { %v5595_v42 = vadd.f32 %v8442_v48, %v10372_v7  ;;  %v5393_v43 = vpop.f32.mrb[91].mxu0  ;;  %8508 = vmatmul.mubr.msk.bf16.gmra.mrb[12].mxu1 %vm5764_vm2, %v5709_v8  ;;  %v5658_v50 = vmax.f32 %v5594_v14, 0.0 }
 0x95f   : > { %v5593_v0 = vadd.f32 %v10372_v7, %v5393_v43  ;;  %v5656_v56 = vmax.f32 %v5592_v15, 0.0 }
 0x960   : > { %v5659_v53 = vmax.f32 %v5595_v42, 0.0 }
 0x961   : > { %v5657_v27 = vmax.f32 %v5593_v0, 0.0 }
 0x962   : > { %v5711_v52 = vpack.c.bf16 %v5659_v53, %v5658_v50 }
 0x963   : > { %v5710_v13 = vpack.c.bf16 %v5657_v27, %v5656_v56  ;;  %v8445_v40 = vpop.f32.mrb[92].mxu0 }
 0x964   : > { %v5598_v22 = vadd.f32 %v8445_v40, %v10372_v7  ;;  %v5406_v16 = vpop.f32.mrb[93].mxu0 }
 0x965   : > { %v5596_v24 = vadd.f32 %v10372_v7, %v5406_v16  ;;  %v8446_v18 = vpop.f32.mrb[94].mxu0  ;;  %8511 = vmatprep.mubr.msk.bf16.mxu1 %vm5764_vm2, %v5710_v13 }
 0x966   : > { %v5599_v59 = vadd.f32 %v8446_v18, %v10372_v7  ;;  %v5409_v5 = vpop.f32.mrb[95].mxu0  ;;  %8512 = vmatmul.mubr.msk.bf16.gmra.mrb[16].mxu1 %vm5764_vm2, %v5711_v52  ;;  %v5662_v20 = vmax.f32 %v5598_v22, 0.0 }
 0x967   : > { %v5597_v6 = vadd.f32 %v10372_v7, %v5409_v5  ;;  %v5660_v58 = vmax.f32 %v5596_v24, 0.0 }
 0x968   : > { %v5663_v31 = vmax.f32 %v5599_v59, 0.0 }
 0x969   : > { %v5661_v38 = vmax.f32 %v5597_v6, 0.0 }
 0x96a   : > { %v5713_v46 = vpack.c.bf16 %v5663_v31, %v5662_v20 }
 0x96b   : > { %v5712_v21 = vpack.c.bf16 %v5661_v38, %v5660_v58  ;;  %v8449_v32 = vpop.f32.mrb[96].mxu0 }
 0x96c   : > { %v5602_v8 = vadd.f32 %v8449_v32, %v10372_v7  ;;  %v5422_v35 = vpop.f32.mrb[97].mxu0 }
 0x96d   : > { %v5600_v10 = vadd.f32 %v10372_v7, %v5422_v35  ;;  %v8450_v14 = vpop.f32.mrb[98].mxu0  ;;  %8515 = vmatprep.mubr.msk.bf16.mxu1 %vm5764_vm2, %v5712_v21 }
 0x96e   : > { %v5603_v60 = vadd.f32 %v8450_v14, %v10372_v7  ;;  %v5425_v15 = vpop.f32.mrb[99].mxu0  ;;  %8516 = vmatmul.mubr.msk.bf16.gmra.mrb[20].mxu1 %vm5764_vm2, %v5713_v46  ;;  %v5666_v42 = vmax.f32 %v5602_v8, 0.0 }
 0x96f   : > { %v5601_v48 = vadd.f32 %v10372_v7, %v5425_v15  ;;  %v5664_v0 = vmax.f32 %v5600_v10, 0.0 }
 0x970   : > { %v5667_v43 = vmax.f32 %v5603_v60, 0.0 }
 0x971   : > { %v5665_v50 = vmax.f32 %v5601_v48, 0.0 }
 0x972   : > { %v5715_v53 = vpack.c.bf16 %v5667_v43, %v5666_v42 }
 0x973   : > { %v5714_v56 = vpack.c.bf16 %v5665_v50, %v5664_v0  ;;  %v8453_v27 = vpop.f32.mrb[100].mxu0 }
 0x974   : > { %v5606_v52 = vadd.f32 %v8453_v27, %v10372_v7  ;;  %v5438_v13 = vpop.f32.mrb[101].mxu0 }
 0x975   : > { %v5604_v40 = vadd.f32 %v10372_v7, %v5438_v13  ;;  %v8454_v22 = vpop.f32.mrb[102].mxu0  ;;  %8519 = vmatprep.mubr.msk.bf16.mxu1 %vm5764_vm2, %v5714_v56 }
 0x976   : > { %v5607_v16 = vadd.f32 %v8454_v22, %v10372_v7  ;;  %v5441_v24 = vpop.f32.mrb[103].mxu0  ;;  %8520 = vmatmul.mubr.msk.bf16.gmra.mrb[24].mxu1 %vm5764_vm2, %v5715_v53  ;;  %v5670_v59 = vmax.f32 %v5606_v52, 0.0 }
 0x977   : > { %v5605_v18 = vadd.f32 %v10372_v7, %v5441_v24  ;;  %v5668_v6 = vmax.f32 %v5604_v40, 0.0 }
 0x978   : > { %v5671_v5 = vmax.f32 %v5607_v16, 0.0 }
 0x979   : > { %v5669_v20 = vmax.f32 %v5605_v18, 0.0 }
 0x97a   : > { %v5717_v31 = vpack.c.bf16 %v5671_v5, %v5670_v59 }
 0x97b   : > { %v5716_v58 = vpack.c.bf16 %v5669_v20, %v5668_v6  ;;  %v8457_v38 = vpop.f32.mrb[104].mxu0 }
 0x97c   : > { %v5610_v46 = vadd.f32 %v8457_v38, %v10372_v7  ;;  %v5454_v21 = vpop.f32.mrb[105].mxu0 }
 0x97d   : > { %v5608_v32 = vadd.f32 %v10372_v7, %v5454_v21  ;;  %v8458_v8 = vpop.f32.mrb[106].mxu0  ;;  %8523 = vmatprep.mubr.msk.bf16.mxu1 %vm5764_vm2, %v5716_v58 }
 0x97e   : > { %v5611_v35 = vadd.f32 %v8458_v8, %v10372_v7  ;;  %v5457_v10 = vpop.f32.mrb[107].mxu0  ;;  %8524 = vmatmul.mubr.msk.bf16.gmra.mrb[28].mxu1 %vm5764_vm2, %v5717_v31  ;;  %v5674_v60 = vmax.f32 %v5610_v46, 0.0 }
 0x97f   : > { %v5609_v14 = vadd.f32 %v10372_v7, %v5457_v10  ;;  %v5672_v48 = vmax.f32 %v5608_v32, 0.0 }
 0x980   : > { %v5675_v15 = vmax.f32 %v5611_v35, 0.0 }
 0x981   : > { %v5673_v42 = vmax.f32 %v5609_v14, 0.0 }
 0x982   : > { %v5719_v43 = vpack.c.bf16 %v5675_v15, %v5674_v60 }
 0x983   : > { %v5718_v0 = vpack.c.bf16 %v5673_v42, %v5672_v48  ;;  %v8461_v50 = vpop.f32.mrb[108].mxu0 }
 0x984   : > { %v5614_v53 = vadd.f32 %v8461_v50, %v10372_v7  ;;  %v5470_v56 = vpop.f32.mrb[109].mxu0 }
 0x985   : > { %v5612_v27 = vadd.f32 %v10372_v7, %v5470_v56  ;;  %v8462_v52 = vpop.f32.mrb[110].mxu0  ;;  %8527 = vmatprep.mubr.msk.bf16.mxu1 %vm5764_vm2, %v5718_v0 }
 0x986   : > { %v5615_v13 = vadd.f32 %v8462_v52, %v10372_v7  ;;  %v5473_v40 = vpop.f32.mrb[111].mxu0  ;;  %8528 = vmatmul.mubr.msk.bf16.gmra.mrb[32].mxu1 %vm5764_vm2, %v5719_v43  ;;  %v5678_v16 = vmax.f32 %v5614_v53, 0.0 }
 0x987   : > { %v5613_v22 = vadd.f32 %v10372_v7, %v5473_v40  ;;  %v5676_v18 = vmax.f32 %v5612_v27, 0.0 }
 0x988   : > { %v5679_v24 = vmax.f32 %v5615_v13, 0.0 }
 0x989   : > { %v5677_v59 = vmax.f32 %v5613_v22, 0.0 }
 0x98a   : > { %v5721_v5 = vpack.c.bf16 %v5679_v24, %v5678_v16 }
 0x98b   : > { %v5720_v6 = vpack.c.bf16 %v5677_v59, %v5676_v18  ;;  %v8465_v20 = vpop.f32.mrb[112].mxu0 }
 0x98c   : > { %v5618_v31 = vadd.f32 %v8465_v20, %v10372_v7  ;;  %v5486_v58 = vpop.f32.mrb[113].mxu0 }
 0x98d   : > { %v5616_v38 = vadd.f32 %v10372_v7, %v5486_v58  ;;  %v8466_v46 = vpop.f32.mrb[114].mxu0  ;;  %8531 = vmatprep.mubr.msk.bf16.mxu1 %vm5764_vm2, %v5720_v6 }
 0x98e   : > { %v5619_v21 = vadd.f32 %v8466_v46, %v10372_v7  ;;  %v5489_v32 = vpop.f32.mrb[115].mxu0  ;;  %8532 = vmatmul.mubr.msk.bf16.gmra.mrb[36].mxu1 %vm5764_vm2, %v5721_v5  ;;  %v5682_v35 = vmax.f32 %v5618_v31, 0.0 }
 0x98f   : > { %v5617_v8 = vadd.f32 %v10372_v7, %v5489_v32  ;;  %v5680_v14 = vmax.f32 %v5616_v38, 0.0 }
 0x990   : > { %v5683_v10 = vmax.f32 %v5619_v21, 0.0 }
 0x991   : > { %v5681_v60 = vmax.f32 %v5617_v8, 0.0 }
 0x992   : > { %v5723_v15 = vpack.c.bf16 %v5683_v10, %v5682_v35 }
 0x993   : > { %v5722_v48 = vpack.c.bf16 %v5681_v60, %v5680_v14  ;;  %v8469_v42 = vpop.f32.mrb[116].mxu0 }
 0x994   : > { %v5622_v43 = vadd.f32 %v8469_v42, %v10372_v7  ;;  %v5502_v0 = vpop.f32.mrb[117].mxu0 }
 0x995   : > { %v5620_v50 = vadd.f32 %v10372_v7, %v5502_v0  ;;  %v8470_v53 = vpop.f32.mrb[118].mxu0  ;;  %8535 = vmatprep.mubr.msk.bf16.mxu1 %vm5764_vm2, %v5722_v48 }
 0x996   : > { %v5623_v56 = vadd.f32 %v8470_v53, %v10372_v7  ;;  %v5505_v27 = vpop.f32.mrb[119].mxu0  ;;  %8536 = vmatmul.mubr.msk.bf16.gmra.mrb[40].mxu1 %vm5764_vm2, %v5723_v15  ;;  %v5686_v13 = vmax.f32 %v5622_v43, 0.0 }
 0x997   : > { %v5621_v52 = vadd.f32 %v10372_v7, %v5505_v27  ;;  %v5684_v22 = vmax.f32 %v5620_v50, 0.0 }
 0x998   : > { %v5687_v40 = vmax.f32 %v5623_v56, 0.0 }
 0x999   : > { %v5685_v16 = vmax.f32 %v5621_v52, 0.0 }
 0x99a   : > { %v5725_v24 = vpack.c.bf16 %v5687_v40, %v5686_v13 }
 0x99b   : > { %v5724_v18 = vpack.c.bf16 %v5685_v16, %v5684_v22  ;;  %v8473_v59 = vpop.f32.mrb[120].mxu0 }
 0x99c   : > { %v5626_v5 = vadd.f32 %v8473_v59, %v10372_v7  ;;  %v5518_v6 = vpop.f32.mrb[121].mxu0 }
 0x99d   : > { %v5624_v20 = vadd.f32 %v10372_v7, %v5518_v6  ;;  %v8474_v31 = vpop.f32.mrb[122].mxu0  ;;  %8539 = vmatprep.mubr.msk.bf16.mxu1 %vm5764_vm2, %v5724_v18 }
 0x99e   : > { %v5627_v58 = vadd.f32 %v8474_v31, %v10372_v7  ;;  %v5521_v38 = vpop.f32.mrb[123].mxu0  ;;  %8540 = vmatmul.mubr.msk.bf16.gmra.mrb[44].mxu1 %vm5764_vm2, %v5725_v24  ;;  %v5690_v21 = vmax.f32 %v5626_v5, 0.0 }
 0x99f   : > { %v5625_v46 = vadd.f32 %v10372_v7, %v5521_v38  ;;  %v5688_v8 = vmax.f32 %v5624_v20, 0.0 }
 0x9a0   : > { %v5691_v32 = vmax.f32 %v5627_v58, 0.0 }
 0x9a1   : > { %v5689_v35 = vmax.f32 %v5625_v46, 0.0 }
 0x9a2   : > { %v5727_v10 = vpack.c.bf16 %v5691_v32, %v5690_v21 }
 0x9a3   : > { %v5726_v14 = vpack.c.bf16 %v5689_v35, %v5688_v8  ;;  %v8477_v60 = vpop.f32.mrb[124].mxu0 }
 0x9a4   : > { %v5630_v15 = vadd.f32 %v8477_v60, %v10372_v7  ;;  %v5534_v48 = vpop.f32.mrb[125].mxu0 }
 0x9a5   : > { %v5628_v42 = vadd.f32 %v10372_v7, %v5534_v48  ;;  %v8478_v43 = vpop.f32.mrb[126].mxu0  ;;  %8543 = vmatprep.mubr.msk.bf16.mxu1 %vm5764_vm2, %v5726_v14 }
 0x9a6   : > { %v5631_v0 = vadd.f32 %v8478_v43, %v10372_v7  ;;  %v5537_v50 = vpop.f32.mrb[127].mxu0  ;;  %8544 = vmatmul.mubr.msk.bf16.gmra.mrb[48].mxu1 %vm5764_vm2, %v5727_v10  ;;  %v5694_v56 = vmax.f32 %v5630_v15, 0.0 }
 0x9a7   : > { %v5629_v53 = vadd.f32 %v10372_v7, %v5537_v50  ;;  %v5692_v52 = vmax.f32 %v5628_v42, 0.0 }
 0x9a8   : > { %v5695_v27 = vmax.f32 %v5631_v0, 0.0 }
 0x9a9   : > { %v5693_v13 = vmax.f32 %v5629_v53, 0.0 }
 0x9aa   : > { %v5729_v40 = vpack.c.bf16 %v5695_v27, %v5694_v56 }
 0x9ab   : > { %v5728_v22 = vpack.c.bf16 %v5693_v13, %v5692_v52  ;;  %v8481_v16 = vpop.f32.mrb[128].mxu0 }
 0x9ac   : > { %v5634_v24 = vadd.f32 %v8481_v16, %v10372_v7  ;;  %v5550_v18 = vpop.f32.mrb[129].mxu0 }
 0x9ad   : > { %v5632_v59 = vadd.f32 %v10372_v7, %v5550_v18  ;;  %v8482_v5 = vpop.f32.mrb[130].mxu0  ;;  %8547 = vmatprep.mubr.msk.bf16.mxu1 %vm5764_vm2, %v5728_v22 }
 0x9ae   : > { %v5635_v6 = vadd.f32 %v8482_v5, %v10372_v7  ;;  %v5553_v20 = vpop.f32.mrb[131].mxu0  ;;  %8548 = vmatmul.mubr.msk.bf16.gmra.mrb[52].mxu1 %vm5764_vm2, %v5729_v40  ;;  %v5698_v58 = vmax.f32 %v5634_v24, 0.0 }
 0x9af   : > { %v5633_v31 = vadd.f32 %v10372_v7, %v5553_v20  ;;  %v5696_v46 = vmax.f32 %v5632_v59, 0.0 }
 0x9b0   : > { %v5699_v38 = vmax.f32 %v5635_v6, 0.0 }
 0x9b1   : > { %v5697_v21 = vmax.f32 %v5633_v31, 0.0 }
 0x9b2   : > { %v5731_v32 = vpack.c.bf16 %v5699_v38, %v5698_v58 }
 0x9b3   : > { %v5730_v8 = vpack.c.bf16 %v5697_v21, %v5696_v46 }
 0x9b5   : > { %8551 = vmatprep.mubr.msk.bf16.mxu1 %vm5764_vm2, %v5730_v8 }
 0x9b6   : > { %8552 = vmatmul.mubr.msk.bf16.gmra.mrb[56].mxu1 %vm5764_vm2, %v5731_v32 }
 0x9b7   : > { %8571 = vmatprep.mubr.bf16.mxu1 %v10042_v2 }
 0x9be   : > { %8572 = vmatmul.mubr.bf16.vlgmr.msra.gmra.mrb[252].mxu1 %v10040_v17  ;;  %v10526_v17 = vld [vmem:[%s10739_s9] ss:$0 sm:$0xff] }
 0x9bf   : > { %8575 = vmatprep.mubr.bf16.mxu1 %v10058_v30 }
 0x9c6   : > { %8576 = vmatmul.mubr.bf16.gmra.mrb[0].mxu1 %v10056_v55 }
 0x9c7   : > { %8579 = vmatprep.mubr.bf16.mxu1 %v10078_v61 }
 0x9ce   : > { %8580 = vmatmul.mubr.bf16.gmra.mrb[4].mxu1 %v10076_v26 }
 0x9cf   : > { %8583 = vmatprep.mubr.bf16.mxu1 %v10098_v25 }
 0x9d6   : > { %8584 = vmatmul.mubr.bf16.gmra.mrb[8].mxu1 %v10096_v23 }
 0x9d7   : > { %8587 = vmatprep.mubr.bf16.mxu1 %v10118_v3 }
 0x9de   : > { %8588 = vmatmul.mubr.bf16.gmra.mrb[12].mxu1 %v10116_v12 }
 0x9df   : > { %8591 = vmatprep.mubr.bf16.mxu1 %v10135_v19 }
 0x9e6   : > { %8592 = vmatmul.mubr.bf16.gmra.mrb[16].mxu1 %v10133_v29 }
 0x9e7   : > { %8595 = vmatprep.mubr.bf16.mxu1 %v10149_v49 }
 0x9ee   : > { %8596 = vmatmul.mubr.bf16.gmra.mrb[20].mxu1 %v10147_v54 }
 0x9ef   : > { %8599 = vmatprep.mubr.bf16.mxu1 %v10163_v62 }
 0x9f6   : > { %8600 = vmatmul.mubr.bf16.gmra.mrb[24].mxu1 %v10161_v36 }
 0x9f7   : > { %8603 = vmatprep.mubr.bf16.mxu1 %v10177_v47 }
 0x9fe   : > { %8604 = vmatmul.mubr.bf16.gmra.mrb[28].mxu1 %v10175_v44 }
 0x9ff   : > { %8607 = vmatprep.mubr.bf16.mxu1 %v10191_v11 }
 0xa06   : > { %8608 = vmatmul.mubr.bf16.gmra.mrb[32].mxu1 %v10189_v9 }
 0xa07   : > { %8611 = vmatprep.mubr.bf16.mxu1 %v10205_v34 }
 0xa0e   : > { %8612 = vmatmul.mubr.bf16.gmra.mrb[36].mxu1 %v10203_v41 }
 0xa0f   : > { %8615 = vmatprep.mubr.bf16.mxu1 %v10219_v28 }
 0xa16   : > { %8616 = vmatmul.mubr.bf16.gmra.mrb[40].mxu1 %v10217_v39 }
 0xa17   : > { %8619 = vmatprep.mubr.bf16.mxu1 %v10233_v33 }
 0xa1e   : > { %8620 = vmatmul.mubr.bf16.gmra.mrb[44].mxu1 %v10231_v45 }
 0xa1f   : > { %8623 = vmatprep.mubr.bf16.mxu1 %v10247_v4 }
 0xa26   : > { %8624 = vmatmul.mubr.bf16.gmra.mrb[48].mxu1 %v10245_v51 }
 0xa27   : > { %8627 = vmatprep.mubr.bf16.mxu1 %v10261_v37 }
 0xa2e   : > { %8628 = vmatmul.mubr.bf16.gmra.mrb[52].mxu1 %v10259_v57 }
 0xa2f   : > { %8631 = vmatprep.mubr.bf16.mxu1 %v10275_v1 }
 0xa36   : > { %8632 = vmatmul.mubr.bf16.gmra.mrb[56].mxu1 %v10273_v63 }
 0xa91   : > { %v8573_v2 = vpop.f32.mrb[252].mxu1 }
 0xa92   : > { %v6496_v55 = vadd.f32 %v8573_v2, %v10526_v17  ;;  %v6232_v30 = vpop.f32.mrb[253].mxu1 }
 0xa93   : > { %v6494_v26 = vadd.f32 %v10526_v17, %v6232_v30  ;;  %v8574_v61 = vpop.f32.mrb[254].mxu1 }
 0xa94   : > { %6561 = vst.msk [vmem:[%s10533_s11 + $0x10] sm:$0xff] %vm6558_vm3, %v6496_v55  ;;  %v6497_v23 = vadd.f32 %v8574_v61, %v10526_v17  ;;  %v6235_v25 = vpop.f32.mrb[255].mxu1 }
 0xa95   : > { %6559 = vst.msk [vmem:[%s10533_s11] sm:$0xff] %vm6558_vm3, %v6494_v26  ;;  %v6495_v12 = vadd.f32 %v10526_v17, %v6235_v25 }
 0xa96   : > { %6562 = vst.msk [vmem:[%s10533_s11 + $0x18] sm:$0xff] %vm6558_vm3, %v6497_v23 }
 0xa97   : > { %6560 = vst.msk [vmem:[%s10533_s11 + $0x8] sm:$0xff] %vm6558_vm3, %v6495_v12 }
 0xa99   : > { %v8577_v3 = vpop.f32.mrb[0].mxu1 }
 0xa9a   : > { %v6500_v29 = vadd.f32 %v8577_v3, %v10526_v17  ;;  %v6248_v19 = vpop.f32.mrb[1].mxu1 }
 0xa9b   : > { %v6498_v54 = vadd.f32 %v10526_v17, %v6248_v19  ;;  %v8578_v49 = vpop.f32.mrb[2].mxu1 }
 0xa9c   : > { %6565 = vst.msk [vmem:[%s10533_s11 + $0x30] sm:$0xff] %vm6558_vm3, %v6500_v29  ;;  %v6501_v36 = vadd.f32 %v8578_v49, %v10526_v17  ;;  %v6251_v62 = vpop.f32.mrb[3].mxu1 }
 0xa9d   : > { %6563 = vst.msk [vmem:[%s10533_s11 + $0x20] sm:$0xff] %vm6558_vm3, %v6498_v54  ;;  %v6499_v44 = vadd.f32 %v10526_v17, %v6251_v62 }
 0xa9e   : > { %6566 = vst.msk [vmem:[%s10533_s11 + $0x38] sm:$0xff] %vm6558_vm3, %v6501_v36 }
 0xa9f   : > { %6564 = vst.msk [vmem:[%s10533_s11 + $0x28] sm:$0xff] %vm6558_vm3, %v6499_v44 }
 0xaa1   : > { %v8581_v47 = vpop.f32.mrb[4].mxu1 }
 0xaa2   : > { %v6504_v9 = vadd.f32 %v8581_v47, %v10526_v17  ;;  %v6264_v11 = vpop.f32.mrb[5].mxu1 }
 0xaa3   : > { %v6502_v41 = vadd.f32 %v10526_v17, %v6264_v11  ;;  %v8582_v34 = vpop.f32.mrb[6].mxu1 }
 0xaa4   : > { %6569 = vst.msk [vmem:[%s10533_s11 + $0x50] sm:$0xff] %vm6558_vm3, %v6504_v9  ;;  %v6505_v39 = vadd.f32 %v8582_v34, %v10526_v17  ;;  %v6267_v28 = vpop.f32.mrb[7].mxu1 }
 0xaa5   : > { %6567 = vst.msk [vmem:[%s10533_s11 + $0x40] sm:$0xff] %vm6558_vm3, %v6502_v41  ;;  %v6503_v45 = vadd.f32 %v10526_v17, %v6267_v28 }
 0xaa6   : > { %6570 = vst.msk [vmem:[%s10533_s11 + $0x58] sm:$0xff] %vm6558_vm3, %v6505_v39 }
 0xaa7   : > { %6568 = vst.msk [vmem:[%s10533_s11 + $0x48] sm:$0xff] %vm6558_vm3, %v6503_v45 }
 0xaa9   : > { %v8585_v33 = vpop.f32.mrb[8].mxu1 }
 0xaaa   : > { %v6508_v51 = vadd.f32 %v8585_v33, %v10526_v17  ;;  %v6280_v4 = vpop.f32.mrb[9].mxu1 }
 0xaab   : > { %v6506_v57 = vadd.f32 %v10526_v17, %v6280_v4  ;;  %v8586_v37 = vpop.f32.mrb[10].mxu1 }
 0xaac   : > { %6573 = vst.msk [vmem:[%s10533_s11 + $0x70] sm:$0xff] %vm6558_vm3, %v6508_v51  ;;  %v6509_v63 = vadd.f32 %v8586_v37, %v10526_v17  ;;  %v6283_v1 = vpop.f32.mrb[11].mxu1 }
 0xaad   : > { %6571 = vst.msk [vmem:[%s10533_s11 + $0x60] sm:$0xff] %vm6558_vm3, %v6506_v57  ;;  %v6507_v7 = vadd.f32 %v10526_v17, %v6283_v1 }
 0xaae   : > { %6574 = vst.msk [vmem:[%s10533_s11 + $0x78] sm:$0xff] %vm6558_vm3, %v6509_v63 }
 0xaaf   : > { %6572 = vst.msk [vmem:[%s10533_s11 + $0x68] sm:$0xff] %vm6558_vm3, %v6507_v7 }
 0xab1   : > { %v8589_v35 = vpop.f32.mrb[12].mxu1 }
 0xab2   : > { %v6512_v10 = vadd.f32 %v8589_v35, %v10526_v17  ;;  %v6296_v14 = vpop.f32.mrb[13].mxu1 }
 0xab3   : > { %v6510_v60 = vadd.f32 %v10526_v17, %v6296_v14  ;;  %v8590_v15 = vpop.f32.mrb[14].mxu1 }
 0xab4   : > { %6577 = vst.msk [vmem:[%s10533_s11 + $0x90] sm:$0xff] %vm6558_vm3, %v6512_v10  ;;  %v6513_v48 = vadd.f32 %v8590_v15, %v10526_v17  ;;  %v6299_v42 = vpop.f32.mrb[15].mxu1 }
 0xab5   : > { %6575 = vst.msk [vmem:[%s10533_s11 + $0x80] sm:$0xff] %vm6558_vm3, %v6510_v60  ;;  %v6511_v43 = vadd.f32 %v10526_v17, %v6299_v42 }
 0xab6   : > { %6578 = vst.msk [vmem:[%s10533_s11 + $0x98] sm:$0xff] %vm6558_vm3, %v6513_v48 }
 0xab7   : > { %6576 = vst.msk [vmem:[%s10533_s11 + $0x88] sm:$0xff] %vm6558_vm3, %v6511_v43 }
 0xab9   : > { %v8593_v0 = vpop.f32.mrb[16].mxu1 }
 0xaba   : > { %v6516_v50 = vadd.f32 %v8593_v0, %v10526_v17  ;;  %v6312_v53 = vpop.f32.mrb[17].mxu1 }
 0xabb   : > { %v6514_v56 = vadd.f32 %v10526_v17, %v6312_v53  ;;  %v8594_v27 = vpop.f32.mrb[18].mxu1 }
 0xabc   : > { %6581 = vst.msk [vmem:[%s10533_s11 + $0xb0] sm:$0xff] %vm6558_vm3, %v6516_v50  ;;  %v6517_v52 = vadd.f32 %v8594_v27, %v10526_v17  ;;  %v6315_v13 = vpop.f32.mrb[19].mxu1 }
 0xabd   : > { %6579 = vst.msk [vmem:[%s10533_s11 + $0xa0] sm:$0xff] %vm6558_vm3, %v6514_v56  ;;  %v6515_v40 = vadd.f32 %v10526_v17, %v6315_v13 }
 0xabe   : > { %6582 = vst.msk [vmem:[%s10533_s11 + $0xb8] sm:$0xff] %vm6558_vm3, %v6517_v52 }
 0xabf   : > { %6580 = vst.msk [vmem:[%s10533_s11 + $0xa8] sm:$0xff] %vm6558_vm3, %v6515_v40 }
 0xac1   : > { %v8597_v22 = vpop.f32.mrb[20].mxu1 }
 0xac2   : > { %v6520_v16 = vadd.f32 %v8597_v22, %v10526_v17  ;;  %v6328_v24 = vpop.f32.mrb[21].mxu1 }
 0xac3   : > { %v6518_v18 = vadd.f32 %v10526_v17, %v6328_v24  ;;  %v8598_v59 = vpop.f32.mrb[22].mxu1 }
 0xac4   : > { %6585 = vst.msk [vmem:[%s10533_s11 + $0xd0] sm:$0xff] %vm6558_vm3, %v6520_v16  ;;  %v6521_v5 = vadd.f32 %v8598_v59, %v10526_v17  ;;  %v6331_v6 = vpop.f32.mrb[23].mxu1 }
 0xac5   : > { %6583 = vst.msk [vmem:[%s10533_s11 + $0xc0] sm:$0xff] %vm6558_vm3, %v6518_v18  ;;  %v6519_v20 = vadd.f32 %v10526_v17, %v6331_v6 }
 0xac6   : > { %6586 = vst.msk [vmem:[%s10533_s11 + $0xd8] sm:$0xff] %vm6558_vm3, %v6521_v5 }
 0xac7   : > { %6584 = vst.msk [vmem:[%s10533_s11 + $0xc8] sm:$0xff] %vm6558_vm3, %v6519_v20 }
 0xac9   : > { %v8601_v31 = vpop.f32.mrb[24].mxu1 }
 0xaca   : > { %v6524_v58 = vadd.f32 %v8601_v31, %v10526_v17  ;;  %v6344_v38 = vpop.f32.mrb[25].mxu1 }
 0xacb   : > { %v6522_v46 = vadd.f32 %v10526_v17, %v6344_v38  ;;  %v8602_v21 = vpop.f32.mrb[26].mxu1 }
 0xacc   : > { %6589 = vst.msk [vmem:[%s10533_s11 + $0xf0] sm:$0xff] %vm6558_vm3, %v6524_v58  ;;  %v6525_v32 = vadd.f32 %v8602_v21, %v10526_v17  ;;  %v6347_v8 = vpop.f32.mrb[27].mxu1 }
 0xacd   : > { %6587 = vst.msk [vmem:[%s10533_s11 + $0xe0] sm:$0xff] %vm6558_vm3, %v6522_v46  ;;  %v6523_v2 = vadd.f32 %v10526_v17, %v6347_v8 }
 0xace   : > { %6590 = vst.msk [vmem:[%s10533_s11 + $0xf8] sm:$0xff] %vm6558_vm3, %v6525_v32 }
 0xacf   : > { %6588 = vst.msk [vmem:[%s10533_s11 + $0xe8] sm:$0xff] %vm6558_vm3, %v6523_v2 }
 0xad1   : > { %v8605_v55 = vpop.f32.mrb[28].mxu1 }
 0xad2   : > { %v6528_v30 = vadd.f32 %v8605_v55, %v10526_v17  ;;  %v6360_v26 = vpop.f32.mrb[29].mxu1 }
 0xad3   : > { %v6526_v61 = vadd.f32 %v10526_v17, %v6360_v26  ;;  %v8606_v23 = vpop.f32.mrb[30].mxu1 }
 0xad4   : > { %6593 = vst.msk [vmem:[%s10533_s11 + $0x110] sm:$0xff] %vm6558_vm3, %v6528_v30  ;;  %v6529_v25 = vadd.f32 %v8606_v23, %v10526_v17  ;;  %v6363_v12 = vpop.f32.mrb[31].mxu1 }
 0xad5   : > { %6591 = vst.msk [vmem:[%s10533_s11 + $0x100] sm:$0xff] %vm6558_vm3, %v6526_v61  ;;  %v6527_v3 = vadd.f32 %v10526_v17, %v6363_v12 }
 0xad6   : > { %6594 = vst.msk [vmem:[%s10533_s11 + $0x118] sm:$0xff] %vm6558_vm3, %v6529_v25 }
 0xad7   : > { %6592 = vst.msk [vmem:[%s10533_s11 + $0x108] sm:$0xff] %vm6558_vm3, %v6527_v3 }
 0xad9   : > { %v8609_v29 = vpop.f32.mrb[32].mxu1 }
 0xada   : > { %v6532_v19 = vadd.f32 %v8609_v29, %v10526_v17  ;;  %v6376_v54 = vpop.f32.mrb[33].mxu1 }
 0xadb   : > { %v6530_v49 = vadd.f32 %v10526_v17, %v6376_v54  ;;  %v8610_v36 = vpop.f32.mrb[34].mxu1 }
 0xadc   : > { %6597 = vst.msk [vmem:[%s10533_s11 + $0x130] sm:$0xff] %vm6558_vm3, %v6532_v19  ;;  %v6533_v62 = vadd.f32 %v8610_v36, %v10526_v17  ;;  %v6379_v44 = vpop.f32.mrb[35].mxu1 }
 0xadd   : > { %6595 = vst.msk [vmem:[%s10533_s11 + $0x120] sm:$0xff] %vm6558_vm3, %v6530_v49  ;;  %v6531_v47 = vadd.f32 %v10526_v17, %v6379_v44 }
 0xade   : > { %6598 = vst.msk [vmem:[%s10533_s11 + $0x138] sm:$0xff] %vm6558_vm3, %v6533_v62 }
 0xadf   : > { %6596 = vst.msk [vmem:[%s10533_s11 + $0x128] sm:$0xff] %vm6558_vm3, %v6531_v47 }
 0xae1   : > { %v8613_v9 = vpop.f32.mrb[36].mxu1 }
 0xae2   : > { %v6536_v11 = vadd.f32 %v8613_v9, %v10526_v17  ;;  %v6392_v41 = vpop.f32.mrb[37].mxu1 }
 0xae3   : > { %v6534_v34 = vadd.f32 %v10526_v17, %v6392_v41  ;;  %v8614_v39 = vpop.f32.mrb[38].mxu1 }
 0xae4   : > { %6601 = vst.msk [vmem:[%s10533_s11 + $0x150] sm:$0xff] %vm6558_vm3, %v6536_v11  ;;  %v6537_v28 = vadd.f32 %v8614_v39, %v10526_v17  ;;  %v6395_v45 = vpop.f32.mrb[39].mxu1 }
 0xae5   : > { %6599 = vst.msk [vmem:[%s10533_s11 + $0x140] sm:$0xff] %vm6558_vm3, %v6534_v34  ;;  %v6535_v33 = vadd.f32 %v10526_v17, %v6395_v45 }
 0xae6   : > { %6602 = vst.msk [vmem:[%s10533_s11 + $0x158] sm:$0xff] %vm6558_vm3, %v6537_v28 }
 0xae7   : > { %6600 = vst.msk [vmem:[%s10533_s11 + $0x148] sm:$0xff] %vm6558_vm3, %v6535_v33 }
 0xae9   : > { %v8617_v51 = vpop.f32.mrb[40].mxu1 }
 0xaea   : > { %v6540_v4 = vadd.f32 %v8617_v51, %v10526_v17  ;;  %v6408_v57 = vpop.f32.mrb[41].mxu1 }
 0xaeb   : > { %v6538_v37 = vadd.f32 %v10526_v17, %v6408_v57  ;;  %v8618_v63 = vpop.f32.mrb[42].mxu1 }
 0xaec   : > { %6605 = vst.msk [vmem:[%s10533_s11 + $0x170] sm:$0xff] %vm6558_vm3, %v6540_v4  ;;  %v6541_v1 = vadd.f32 %v8618_v63, %v10526_v17  ;;  %v6411_v7 = vpop.f32.mrb[43].mxu1 }
 0xaed   : > { %6603 = vst.msk [vmem:[%s10533_s11 + $0x160] sm:$0xff] %vm6558_vm3, %v6538_v37  ;;  %v6539_v35 = vadd.f32 %v10526_v17, %v6411_v7 }
 0xaee   : > { %6606 = vst.msk [vmem:[%s10533_s11 + $0x178] sm:$0xff] %vm6558_vm3, %v6541_v1 }
 0xaef   : > { %6604 = vst.msk [vmem:[%s10533_s11 + $0x168] sm:$0xff] %vm6558_vm3, %v6539_v35 }
 0xaf1   : > { %v8621_v10 = vpop.f32.mrb[44].mxu1 }
 0xaf2   : > { %v6544_v14 = vadd.f32 %v8621_v10, %v10526_v17  ;;  %v6424_v60 = vpop.f32.mrb[45].mxu1 }
 0xaf3   : > { %v6542_v15 = vadd.f32 %v10526_v17, %v6424_v60  ;;  %v8622_v48 = vpop.f32.mrb[46].mxu1 }
 0xaf4   : > { %6609 = vst.msk [vmem:[%s10533_s11 + $0x190] sm:$0xff] %vm6558_vm3, %v6544_v14  ;;  %v6545_v42 = vadd.f32 %v8622_v48, %v10526_v17  ;;  %v6427_v43 = vpop.f32.mrb[47].mxu1 }
 0xaf5   : > { %6607 = vst.msk [vmem:[%s10533_s11 + $0x180] sm:$0xff] %vm6558_vm3, %v6542_v15  ;;  %v6543_v0 = vadd.f32 %v10526_v17, %v6427_v43 }
 0xaf6   : > { %6610 = vst.msk [vmem:[%s10533_s11 + $0x198] sm:$0xff] %vm6558_vm3, %v6545_v42 }
 0xaf7   : > { %6608 = vst.msk [vmem:[%s10533_s11 + $0x188] sm:$0xff] %vm6558_vm3, %v6543_v0 }
 0xaf9   : > { %v8625_v50 = vpop.f32.mrb[48].mxu1 }
 0xafa   : > { %v6548_v53 = vadd.f32 %v8625_v50, %v10526_v17  ;;  %v6440_v56 = vpop.f32.mrb[49].mxu1 }
 0xafb   : > { %v6546_v27 = vadd.f32 %v10526_v17, %v6440_v56  ;;  %v8626_v52 = vpop.f32.mrb[50].mxu1 }
 0xafc   : > { %6613 = vst.msk [vmem:[%s10533_s11 + $0x1b0] sm:$0xff] %vm6558_vm3, %v6548_v53  ;;  %v6549_v13 = vadd.f32 %v8626_v52, %v10526_v17  ;;  %v6443_v40 = vpop.f32.mrb[51].mxu1 }
 0xafd   : > { %6611 = vst.msk [vmem:[%s10533_s11 + $0x1a0] sm:$0xff] %vm6558_vm3, %v6546_v27  ;;  %v6547_v22 = vadd.f32 %v10526_v17, %v6443_v40 }
 0xafe   : > { %6614 = vst.msk [vmem:[%s10533_s11 + $0x1b8] sm:$0xff] %vm6558_vm3, %v6549_v13 }
 0xaff   : > { %6612 = vst.msk [vmem:[%s10533_s11 + $0x1a8] sm:$0xff] %vm6558_vm3, %v6547_v22 }
 0xb01   : > { %v8629_v16 = vpop.f32.mrb[52].mxu1 }
 0xb02   : > { %v6552_v24 = vadd.f32 %v8629_v16, %v10526_v17  ;;  %v6456_v18 = vpop.f32.mrb[53].mxu1 }
 0xb03   : > { %v6550_v59 = vadd.f32 %v10526_v17, %v6456_v18  ;;  %v8630_v5 = vpop.f32.mrb[54].mxu1 }
 0xb04   : > { %6617 = vst.msk [vmem:[%s10533_s11 + $0x1d0] sm:$0xff] %vm6558_vm3, %v6552_v24  ;;  %v6553_v6 = vadd.f32 %v8630_v5, %v10526_v17  ;;  %v6459_v20 = vpop.f32.mrb[55].mxu1 }
 0xb05   : > { %6615 = vst.msk [vmem:[%s10533_s11 + $0x1c0] sm:$0xff] %vm6558_vm3, %v6550_v59  ;;  %v6551_v31 = vadd.f32 %v10526_v17, %v6459_v20 }
 0xb06   : > { %6618 = vst.msk [vmem:[%s10533_s11 + $0x1d8] sm:$0xff] %vm6558_vm3, %v6553_v6 }
 0xb07   : > { %6616 = vst.msk [vmem:[%s10533_s11 + $0x1c8] sm:$0xff] %vm6558_vm3, %v6551_v31 }
 0xb09   : > { %v8633_v58 = vpop.f32.mrb[56].mxu1 }
 0xb0a   : > { %v6556_v38 = vadd.f32 %v8633_v58, %v10526_v17  ;;  %v6472_v46 = vpop.f32.mrb[57].mxu1 }
 0xb0b   : > { %v6554_v21 = vadd.f32 %v10526_v17, %v6472_v46  ;;  %v8634_v32 = vpop.f32.mrb[58].mxu1 }
 0xb0c   : > { %6621 = vst.msk [vmem:[%s10533_s11 + $0x1f0] sm:$0xff] %vm6558_vm3, %v6556_v38  ;;  %v6557_v8 = vadd.f32 %v8634_v32, %v10526_v17  ;;  %v6475_v2 = vpop.f32.mrb[59].mxu1 }
 0xb0d   : > { %6619 = vst.msk [vmem:[%s10533_s11 + $0x1e0] sm:$0xff] %vm6558_vm3, %v6554_v21  ;;  %v6555_v55 = vadd.f32 %v10526_v17, %v6475_v2 }
 0xb0e   : > { %6622 = vst.msk [vmem:[%s10533_s11 + $0x1f8] sm:$0xff] %vm6558_vm3, %v6557_v8 }
 0xb0f   : > { %6620 = vst.msk [vmem:[%s10533_s11 + $0x1e8] sm:$0xff] %vm6558_vm3, %v6555_v55 }
 0xb10 PF: > { %s20_s13 = sadd.s32 1, %s9011_s13  }
 0xb11   : > { %p17_p4 = scmp.ge.s32.totalorder %s20_s13, 5  }
 0xb13   :  { %19 = sbr.rel (!%p17_p4) target bundleno = 1 (0x1), region = 98 }

</bundles_post_ra>
